<compile_context>
chip_gen: v7x
topology: tpu7x:2x2x1
jax: 0.10.0
libtpu: 0.0.40
codegen_flags: <defaults>
</compile_context>

<pallas_src>
import jax
import jax.numpy as jnp
from jax.experimental import pallas as pl
from jax.experimental.pallas import tpu as pltpu

KSIZE = 7
PAD = 3
HALO = KSIZE - 1          # 6 extra halo rows/cols per tile
OUT_LANES = 128           # lane-dense padded output-channel width


def _round_up(a, b):
    return (a + b - 1) // b * b


def _conv_block_kernel(x_ref, w_ref, b_ref, o_ref):
    """One output row-block of the 7x7 conv as 49 accumulated MXU matmuls.

    x_ref: (1, th+6, wk+6, cin)  bf16   halo'd NHWC input row block
    w_ref: (49, cin, 128)        bf16   weights, (ky*7+kx, c, oc) layout
    b_ref: (1, 128)              f32    bias (zero-padded to 128 lanes)
    o_ref: (1, th*wk, 128)       f32    output rows, row-major (r, j)
    """
    th = x_ref.shape[1] - HALO
    wk = x_ref.shape[2] - HALO
    cin = x_ref.shape[3]

    x = x_ref[0]                                        # (th+6, wk+6, cin)
    acc = jnp.zeros((th * wk, OUT_LANES), jnp.float32)
    for ky in range(KSIZE):
        for kx in range(KSIZE):
            patch = x[ky:ky + th, kx:kx + wk, :].reshape(th * wk, cin)
            acc = acc + jnp.dot(patch, w_ref[ky * KSIZE + kx],
                                preferred_element_type=jnp.float32)
    o_ref[0] = (acc + b_ref[...]).astype(o_ref.dtype)


def _derive_row_tile(N, H, W, cin, th_target=32, vmem_budget=24 << 20):
    """Pick the output-row tile.

    Keep >= 4 total grid steps when possible (>= 2 per TensorCore on v7x) and
    keep the double-buffered tile footprint inside a VMEM budget that also
    fits v7x's 64 MiB physical VMEM with headroom.
    """
    wk = _round_up(max(W, 8), 8)

    def tile_bytes(th):
        # VMEM is (sublane, lane)-tiled: last dim pads to 128 lanes, the
        # second-to-last to the sublane tile (16 bf16 / 8 f32).
        x_buf = (th + HALO) * _round_up(wk + HALO, 16) * _round_up(cin, 128) * 2
        out_buf = _round_up(th * wk, 8) * OUT_LANES * 4
        w_buf = KSIZE * KSIZE * _round_up(cin, 16) * OUT_LANES * 2
        b_buf = 8 * OUT_LANES * 4
        acc = _round_up(th * wk, 8) * OUT_LANES * 4
        return 2 * (x_buf + out_buf + w_buf + b_buf) + acc

    need_blocks = (4 + N - 1) // N                       # row blocks per image
    th_cap_steps = max(1, (H + need_blocks - 1) // need_blocks)
    th = max(1, min(th_target, H, th_cap_steps))
    while th > 1 and tile_bytes(th) > vmem_budget:
        th = max(1, th // 2)
    return th, wk, tile_bytes(th)


@jax.jit
def conv_block_forward(x_nchw, weight, bias):
    """ConvBlock forward.

    x_nchw: (N, in_c, H, W) f32
    weight: (outc, in_c, 7, 7) f32 (PyTorch OIHW layout)
    bias:   (outc,) f32
    returns (N, outc, H, W) f32
    """
    N, cin, H, W = x_nchw.shape
    outc = weight.shape[0]
    assert outc <= OUT_LANES, "outc > 128 output-lane tiling not implemented"

    th, wk, tile_vmem = _derive_row_tile(N, H, W, cin)
    nbh = (H + th - 1) // th
    hk = nbh * th                                        # padded output rows
    nblk = N * nbh

    # ---- wrapper-side data prep -------------------------------------------
    # NCHW -> NHWC, zero-pad (conv pad 3 + alignment pad), cast to bf16.
    x = jnp.transpose(x_nchw, (0, 2, 3, 1))
    x = jnp.pad(x, ((0, 0),
                    (PAD, PAD + (hk - H)),
                    (PAD, PAD + (wk - W)),
                    (0, 0))).astype(jnp.bfloat16)        # (N, hk+6, wk+6, cin)

    # Row blocks with a 6-row halo: (N*nbh, th+6, wk+6, cin).  Duplication is
    # only (th+6)/th (vs. 49x for a full im2col); the 49 (ky, kx) taps are
    # built inside the kernel from shifted VMEM views.
    # TODO(synk): an overlapping/halo BlockSpec has no clean Pallas form; a
    # pl.ANY + make_async_copy pipeline would avoid even this small halo
    # duplication.
    x_blk = jnp.stack([x[:, ib * th: ib * th + th + HALO]
                       for ib in range(nbh)], axis=1)
    x_blk = x_blk.reshape(nblk, th + HALO, wk + HALO, cin)

    # Weights (outc, cin, 7, 7) -> (49, cin, 128): (ky, kx)-major, channels in
    # sublanes, zero-padded output channels in lanes.  Stays resident in VMEM.
    w3d = jnp.transpose(weight, (2, 3, 1, 0)).reshape(KSIZE * KSIZE, cin, outc)
    w3d = jnp.pad(w3d, ((0, 0), (0, 0), (0, OUT_LANES - outc))).astype(jnp.bfloat16)
    b2d = jnp.pad(bias.reshape(1, outc),
                  ((0, 0), (0, OUT_LANES - outc))).astype(jnp.float32)

    flops = 2 * nblk * (th * wk) * (KSIZE * KSIZE * cin) * OUT_LANES
    bytes_accessed = (x_blk.size * 2 + w3d.size * 2 + b2d.size * 4
                      + nblk * th * wk * OUT_LANES * 4)
    cost = pl.CostEstimate(flops=flops, transcendentals=0,
                           bytes_accessed=bytes_accessed)

    # Scoped VMEM derived from the actual double-buffered tiles (generous
    # headroom, capped below v7x's 64 MiB physical VMEM).
    vmem_limit = int(min(60 << 20, max(16 << 20, 2 * tile_vmem)))

    out = pl.pallas_call(
        _conv_block_kernel,
        out_shape=jax.ShapeDtypeStruct((nblk, th * wk, OUT_LANES), jnp.float32),
        grid=(nblk,),
        in_specs=[
            pl.BlockSpec((1, th + HALO, wk + HALO, cin), lambda s: (s, 0, 0, 0)),
            pl.BlockSpec((KSIZE * KSIZE, cin, OUT_LANES), lambda s: (0, 0, 0)),
            pl.BlockSpec((1, OUT_LANES), lambda s: (0, 0)),
        ],
        out_specs=pl.BlockSpec((1, th * wk, OUT_LANES), lambda s: (s, 0, 0)),
        compiler_params=pltpu.CompilerParams(
            dimension_semantics=("parallel",),
            vmem_limit_bytes=vmem_limit,
        ),
        cost_estimate=cost,
    )(x_blk, w3d, b2d)

    # (N*nbh, th*wk, 128) -> (N, outc, H, W); padded rows/cols/lanes dropped.
    out = out.reshape(N, nbh, th, wk, OUT_LANES)[:, :, :, :W, :outc]
    out = out.reshape(N, hk, W, outc)[:, :H]             # (N, H, W, outc)
    # TODO(synk): NCHW return matches the PyTorch module; keeping NHWC through
    # the surrounding model would save this extra HBM transpose pass.
    return jnp.transpose(out, (0, 3, 1, 2))


def conv_block_reference(x_nchw, weight, bias):
    """Pure-JAX reference of the PyTorch forward (for verification)."""
    y = jax.lax.conv_general_dilated(
        x_nchw, weight, window_strides=(1, 1),
        padding=((PAD, PAD), (PAD, PAD)),
        dimension_numbers=("NCHW", "OIHW", "NCHW"),
        precision=jax.lax.Precision.HIGHEST)
    return y + bias.reshape(1, -1, 1, 1)


if __name__ == "__main__":
    # Small shapes consistent with the module's forward contract.
    N, Cin, H, W = 2, 4, 16, 16
    outc = 8

    key = jax.random.PRNGKey(0)
    kx_, kw_, kb_ = jax.random.split(key, 3)
    x = jax.random.normal(kx_, (N, Cin, H, W), dtype=jnp.float32)
    weight = jax.random.normal(kw_, (outc, Cin, KSIZE, KSIZE),
                               dtype=jnp.float32) * 0.05
    bias = jax.random.normal(kb_, (outc,), dtype=jnp.float32) * 0.05

    out = conv_block_forward(x, weight, bias)
    out = jax.block_until_ready(out)
    assert out.shape == (N, outc, H, W), out.shape

    # The kernel feeds the MXU bf16 operands with f32 accumulation; compare
    # against a reference on identically bf16-rounded operands so only the
    # kernel math (not the intentional bf16 cast) is measured.
    x_q = x.astype(jnp.bfloat16).astype(jnp.float32)
    w_q = weight.astype(jnp.bfloat16).astype(jnp.float32)
    ref = conv_block_reference(x_q, w_q, bias)
    err = float(jnp.max(jnp.abs(out - ref)))
    assert jnp.allclose(out, ref, atol=2e-3, rtol=2e-3), f"max abs err {err}"

    print("KERNEL_OK")
</pallas_src>

<mosaic_0001>
module attributes {stable_mosaic.version = 11 : i64} {
  func.func @_conv_block_kernel(%arg0: i32, %arg1: memref<1x14x22x4xbf16, #tpu.memory_space<vmem>>, %arg2: memref<49x4x128xbf16, #tpu.memory_space<vmem>>, %arg3: memref<1x128xf32, #tpu.memory_space<vmem>>, %arg4: memref<1x128x128xf32, #tpu.memory_space<vmem>>) attributes {dimension_semantics = [#tpu.dimension_semantics<parallel>], iteration_bounds = array<i64: 4>, scalar_prefetch = 0 : i64, scratch_operands = 0 : i64, tpu.core_type = #tpu.core_type<tc>, window_params = [{transform_indices = @transform_0, window_bounds = array<i64: 1, 14, 22, 4>}, {pipeline_mode = #tpu.pipeline_mode<synchronous>, transform_indices = @transform_1, window_bounds = array<i64: 49, 4, 128>}, {pipeline_mode = #tpu.pipeline_mode<synchronous>, transform_indices = @transform_2, window_bounds = array<i64: 1, 128>}, {transform_indices = @transform_3, window_bounds = array<i64: 1, 128, 128>}]} {
    %c0 = arith.constant 0 : index
    %c0_0 = arith.constant 0 : index
    %c0_1 = arith.constant 0 : index
    %c0_2 = arith.constant 0 : index
    %0 = vector.load %arg1[%c0, %c0_0, %c0_1, %c0_2] : memref<1x14x22x4xbf16, #tpu.memory_space<vmem>>, vector<1x14x22x4xbf16>
    %1 = vector.shape_cast %0 : vector<1x14x22x4xbf16> to vector<14x22x4xbf16>
    %cst = arith.constant 0.000000e+00 : f32
    %2 = vector.broadcast %cst : f32 to vector<128x128xf32>
    %3 = vector.extract_strided_slice %1 {offsets = [0, 0, 0], sizes = [8, 16, 4], strides = [1, 1, 1]} : vector<14x22x4xbf16> to vector<8x16x4xbf16>
    %4 = vector.shape_cast %3 : vector<8x16x4xbf16> to vector<128x4xbf16>
    %c0_3 = arith.constant 0 : index
    %c0_4 = arith.constant 0 : index
    %c0_5 = arith.constant 0 : index
    %5 = vector.load %arg2[%c0_3, %c0_4, %c0_5] : memref<49x4x128xbf16, #tpu.memory_space<vmem>>, vector<1x4x128xbf16>
    %6 = vector.shape_cast %5 : vector<1x4x128xbf16> to vector<4x128xbf16>
    %cst_6 = arith.constant dense<0.000000e+00> : vector<128x128xf32>
    %7 = tpu.matmul %4, %6, %cst_6 {dimension_numbers = #tpu.dot_dimension_numbers<[1], [0], [0], [1], [0, 0, 1, 1], [], []>} : vector<128x4xbf16>, vector<4x128xbf16>, vector<128x128xf32> -> vector<128x128xf32>
    %8 = arith.addf %2, %7 : vector<128x128xf32>
    %9 = vector.extract_strided_slice %1 {offsets = [0, 1, 0], sizes = [8, 16, 4], strides = [1, 1, 1]} : vector<14x22x4xbf16> to vector<8x16x4xbf16>
    %10 = vector.shape_cast %9 : vector<8x16x4xbf16> to vector<128x4xbf16>
    %c1 = arith.constant 1 : index
    %c0_7 = arith.constant 0 : index
    %c0_8 = arith.constant 0 : index
    %11 = vector.load %arg2[%c1, %c0_7, %c0_8] : memref<49x4x128xbf16, #tpu.memory_space<vmem>>, vector<1x4x128xbf16>
    %12 = vector.shape_cast %11 : vector<1x4x128xbf16> to vector<4x128xbf16>
    %cst_9 = arith.constant dense<0.000000e+00> : vector<128x128xf32>
    %13 = tpu.matmul %10, %12, %cst_9 {dimension_numbers = #tpu.dot_dimension_numbers<[1], [0], [0], [1], [0, 0, 1, 1], [], []>} : vector<128x4xbf16>, vector<4x128xbf16>, vector<128x128xf32> -> vector<128x128xf32>
    %14 = arith.addf %8, %13 : vector<128x128xf32>
    %15 = vector.extract_strided_slice %1 {offsets = [0, 2, 0], sizes = [8, 16, 4], strides = [1, 1, 1]} : vector<14x22x4xbf16> to vector<8x16x4xbf16>
    %16 = vector.shape_cast %15 : vector<8x16x4xbf16> to vector<128x4xbf16>
    %c2 = arith.constant 2 : index
    %c0_10 = arith.constant 0 : index
    %c0_11 = arith.constant 0 : index
    %17 = vector.load %arg2[%c2, %c0_10, %c0_11] : memref<49x4x128xbf16, #tpu.memory_space<vmem>>, vector<1x4x128xbf16>
    %18 = vector.shape_cast %17 : vector<1x4x128xbf16> to vector<4x128xbf16>
    %cst_12 = arith.constant dense<0.000000e+00> : vector<128x128xf32>
    %19 = tpu.matmul %16, %18, %cst_12 {dimension_numbers = #tpu.dot_dimension_numbers<[1], [0], [0], [1], [0, 0, 1, 1], [], []>} : vector<128x4xbf16>, vector<4x128xbf16>, vector<128x128xf32> -> vector<128x128xf32>
    %20 = arith.addf %14, %19 : vector<128x128xf32>
    %21 = vector.extract_strided_slice %1 {offsets = [0, 3, 0], sizes = [8, 16, 4], strides = [1, 1, 1]} : vector<14x22x4xbf16> to vector<8x16x4xbf16>
    %22 = vector.shape_cast %21 : vector<8x16x4xbf16> to vector<128x4xbf16>
    %c3 = arith.constant 3 : index
    %c0_13 = arith.constant 0 : index
    %c0_14 = arith.constant 0 : index
    %23 = vector.load %arg2[%c3, %c0_13, %c0_14] : memref<49x4x128xbf16, #tpu.memory_space<vmem>>, vector<1x4x128xbf16>
    %24 = vector.shape_cast %23 : vector<1x4x128xbf16> to vector<4x128xbf16>
    %cst_15 = arith.constant dense<0.000000e+00> : vector<128x128xf32>
    %25 = tpu.matmul %22, %24, %cst_15 {dimension_numbers = #tpu.dot_dimension_numbers<[1], [0], [0], [1], [0, 0, 1, 1], [], []>} : vector<128x4xbf16>, vector<4x128xbf16>, vector<128x128xf32> -> vector<128x128xf32>
    %26 = arith.addf %20, %25 : vector<128x128xf32>
    %27 = vector.extract_strided_slice %1 {offsets = [0, 4, 0], sizes = [8, 16, 4], strides = [1, 1, 1]} : vector<14x22x4xbf16> to vector<8x16x4xbf16>
    %28 = vector.shape_cast %27 : vector<8x16x4xbf16> to vector<128x4xbf16>
    %c4 = arith.constant 4 : index
    %c0_16 = arith.constant 0 : index
    %c0_17 = arith.constant 0 : index
    %29 = vector.load %arg2[%c4, %c0_16, %c0_17] : memref<49x4x128xbf16, #tpu.memory_space<vmem>>, vector<1x4x128xbf16>
    %30 = vector.shape_cast %29 : vector<1x4x128xbf16> to vector<4x128xbf16>
    %cst_18 = arith.constant dense<0.000000e+00> : vector<128x128xf32>
    %31 = tpu.matmul %28, %30, %cst_18 {dimension_numbers = #tpu.dot_dimension_numbers<[1], [0], [0], [1], [0, 0, 1, 1], [], []>} : vector<128x4xbf16>, vector<4x128xbf16>, vector<128x128xf32> -> vector<128x128xf32>
    %32 = arith.addf %26, %31 : vector<128x128xf32>
    %33 = vector.extract_strided_slice %1 {offsets = [0, 5, 0], sizes = [8, 16, 4], strides = [1, 1, 1]} : vector<14x22x4xbf16> to vector<8x16x4xbf16>
    %34 = vector.shape_cast %33 : vector<8x16x4xbf16> to vector<128x4xbf16>
    %c5 = arith.constant 5 : index
    %c0_19 = arith.constant 0 : index
    %c0_20 = arith.constant 0 : index
    %35 = vector.load %arg2[%c5, %c0_19, %c0_20] : memref<49x4x128xbf16, #tpu.memory_space<vmem>>, vector<1x4x128xbf16>
    %36 = vector.shape_cast %35 : vector<1x4x128xbf16> to vector<4x128xbf16>
    %cst_21 = arith.constant dense<0.000000e+00> : vector<128x128xf32>
    %37 = tpu.matmul %34, %36, %cst_21 {dimension_numbers = #tpu.dot_dimension_numbers<[1], [0], [0], [1], [0, 0, 1, 1], [], []>} : vector<128x4xbf16>, vector<4x128xbf16>, vector<128x128xf32> -> vector<128x128xf32>
    %38 = arith.addf %32, %37 : vector<128x128xf32>
    %39 = vector.extract_strided_slice %1 {offsets = [0, 6, 0], sizes = [8, 16, 4], strides = [1, 1, 1]} : vector<14x22x4xbf16> to vector<8x16x4xbf16>
    %40 = vector.shape_cast %39 : vector<8x16x4xbf16> to vector<128x4xbf16>
    %c6 = arith.constant 6 : index
    %c0_22 = arith.constant 0 : index
    %c0_23 = arith.constant 0 : index
    %41 = vector.load %arg2[%c6, %c0_22, %c0_23] : memref<49x4x128xbf16, #tpu.memory_space<vmem>>, vector<1x4x128xbf16>
    %42 = vector.shape_cast %41 : vector<1x4x128xbf16> to vector<4x128xbf16>
    %cst_24 = arith.constant dense<0.000000e+00> : vector<128x128xf32>
    %43 = tpu.matmul %40, %42, %cst_24 {dimension_numbers = #tpu.dot_dimension_numbers<[1], [0], [0], [1], [0, 0, 1, 1], [], []>} : vector<128x4xbf16>, vector<4x128xbf16>, vector<128x128xf32> -> vector<128x128xf32>
    %44 = arith.addf %38, %43 : vector<128x128xf32>
    %45 = vector.extract_strided_slice %1 {offsets = [1, 0, 0], sizes = [8, 16, 4], strides = [1, 1, 1]} : vector<14x22x4xbf16> to vector<8x16x4xbf16>
    %46 = vector.shape_cast %45 : vector<8x16x4xbf16> to vector<128x4xbf16>
    %c7 = arith.constant 7 : index
    %c0_25 = arith.constant 0 : index
    %c0_26 = arith.constant 0 : index
    %47 = vector.load %arg2[%c7, %c0_25, %c0_26] : memref<49x4x128xbf16, #tpu.memory_space<vmem>>, vector<1x4x128xbf16>
    %48 = vector.shape_cast %47 : vector<1x4x128xbf16> to vector<4x128xbf16>
    %cst_27 = arith.constant dense<0.000000e+00> : vector<128x128xf32>
    %49 = tpu.matmul %46, %48, %cst_27 {dimension_numbers = #tpu.dot_dimension_numbers<[1], [0], [0], [1], [0, 0, 1, 1], [], []>} : vector<128x4xbf16>, vector<4x128xbf16>, vector<128x128xf32> -> vector<128x128xf32>
    %50 = arith.addf %44, %49 : vector<128x128xf32>
    %51 = vector.extract_strided_slice %1 {offsets = [1, 1, 0], sizes = [8, 16, 4], strides = [1, 1, 1]} : vector<14x22x4xbf16> to vector<8x16x4xbf16>
    %52 = vector.shape_cast %51 : vector<8x16x4xbf16> to vector<128x4xbf16>
    %c8 = arith.constant 8 : index
    %c0_28 = arith.constant 0 : index
    %c0_29 = arith.constant 0 : index
    %53 = vector.load %arg2[%c8, %c0_28, %c0_29] : memref<49x4x128xbf16, #tpu.memory_space<vmem>>, vector<1x4x128xbf16>
    %54 = vector.shape_cast %53 : vector<1x4x128xbf16> to vector<4x128xbf16>
    %cst_30 = arith.constant dense<0.000000e+00> : vector<128x128xf32>
    %55 = tpu.matmul %52, %54, %cst_30 {dimension_numbers = #tpu.dot_dimension_numbers<[1], [0], [0], [1], [0, 0, 1, 1], [], []>} : vector<128x4xbf16>, vector<4x128xbf16>, vector<128x128xf32> -> vector<128x128xf32>
    %56 = arith.addf %50, %55 : vector<128x128xf32>
    %57 = vector.extract_strided_slice %1 {offsets = [1, 2, 0], sizes = [8, 16, 4], strides = [1, 1, 1]} : vector<14x22x4xbf16> to vector<8x16x4xbf16>
    %58 = vector.shape_cast %57 : vector<8x16x4xbf16> to vector<128x4xbf16>
    %c9 = arith.constant 9 : index
    %c0_31 = arith.constant 0 : index
    %c0_32 = arith.constant 0 : index
    %59 = vector.load %arg2[%c9, %c0_31, %c0_32] : memref<49x4x128xbf16, #tpu.memory_space<vmem>>, vector<1x4x128xbf16>
    %60 = vector.shape_cast %59 : vector<1x4x128xbf16> to vector<4x128xbf16>
    %cst_33 = arith.constant dense<0.000000e+00> : vector<128x128xf32>
    %61 = tpu.matmul %58, %60, %cst_33 {dimension_numbers = #tpu.dot_dimension_numbers<[1], [0], [0], [1], [0, 0, 1, 1], [], []>} : vector<128x4xbf16>, vector<4x128xbf16>, vector<128x128xf32> -> vector<128x128xf32>
    %62 = arith.addf %56, %61 : vector<128x128xf32>
    %63 = vector.extract_strided_slice %1 {offsets = [1, 3, 0], sizes = [8, 16, 4], strides = [1, 1, 1]} : vector<14x22x4xbf16> to vector<8x16x4xbf16>
    %64 = vector.shape_cast %63 : vector<8x16x4xbf16> to vector<128x4xbf16>
    %c10 = arith.constant 10 : index
    %c0_34 = arith.constant 0 : index
    %c0_35 = arith.constant 0 : index
    %65 = vector.load %arg2[%c10, %c0_34, %c0_35] : memref<49x4x128xbf16, #tpu.memory_space<vmem>>, vector<1x4x128xbf16>
    %66 = vector.shape_cast %65 : vector<1x4x128xbf16> to vector<4x128xbf16>
    %cst_36 = arith.constant dense<0.000000e+00> : vector<128x128xf32>
    %67 = tpu.matmul %64, %66, %cst_36 {dimension_numbers = #tpu.dot_dimension_numbers<[1], [0], [0], [1], [0, 0, 1, 1], [], []>} : vector<128x4xbf16>, vector<4x128xbf16>, vector<128x128xf32> -> vector<128x128xf32>
    %68 = arith.addf %62, %67 : vector<128x128xf32>
    %69 = vector.extract_strided_slice %1 {offsets = [1, 4, 0], sizes = [8, 16, 4], strides = [1, 1, 1]} : vector<14x22x4xbf16> to vector<8x16x4xbf16>
    %70 = vector.shape_cast %69 : vector<8x16x4xbf16> to vector<128x4xbf16>
    %c11 = arith.constant 11 : index
    %c0_37 = arith.constant 0 : index
    %c0_38 = arith.constant 0 : index
    %71 = vector.load %arg2[%c11, %c0_37, %c0_38] : memref<49x4x128xbf16, #tpu.memory_space<vmem>>, vector<1x4x128xbf16>
    %72 = vector.shape_cast %71 : vector<1x4x128xbf16> to vector<4x128xbf16>
    %cst_39 = arith.constant dense<0.000000e+00> : vector<128x128xf32>
    %73 = tpu.matmul %70, %72, %cst_39 {dimension_numbers = #tpu.dot_dimension_numbers<[1], [0], [0], [1], [0, 0, 1, 1], [], []>} : vector<128x4xbf16>, vector<4x128xbf16>, vector<128x128xf32> -> vector<128x128xf32>
    %74 = arith.addf %68, %73 : vector<128x128xf32>
    %75 = vector.extract_strided_slice %1 {offsets = [1, 5, 0], sizes = [8, 16, 4], strides = [1, 1, 1]} : vector<14x22x4xbf16> to vector<8x16x4xbf16>
    %76 = vector.shape_cast %75 : vector<8x16x4xbf16> to vector<128x4xbf16>
    %c12 = arith.constant 12 : index
    %c0_40 = arith.constant 0 : index
    %c0_41 = arith.constant 0 : index
    %77 = vector.load %arg2[%c12, %c0_40, %c0_41] : memref<49x4x128xbf16, #tpu.memory_space<vmem>>, vector<1x4x128xbf16>
    %78 = vector.shape_cast %77 : vector<1x4x128xbf16> to vector<4x128xbf16>
    %cst_42 = arith.constant dense<0.000000e+00> : vector<128x128xf32>
    %79 = tpu.matmul %76, %78, %cst_42 {dimension_numbers = #tpu.dot_dimension_numbers<[1], [0], [0], [1], [0, 0, 1, 1], [], []>} : vector<128x4xbf16>, vector<4x128xbf16>, vector<128x128xf32> -> vector<128x128xf32>
    %80 = arith.addf %74, %79 : vector<128x128xf32>
    %81 = vector.extract_strided_slice %1 {offsets = [1, 6, 0], sizes = [8, 16, 4], strides = [1, 1, 1]} : vector<14x22x4xbf16> to vector<8x16x4xbf16>
    %82 = vector.shape_cast %81 : vector<8x16x4xbf16> to vector<128x4xbf16>
    %c13 = arith.constant 13 : index
    %c0_43 = arith.constant 0 : index
    %c0_44 = arith.constant 0 : index
    %83 = vector.load %arg2[%c13, %c0_43, %c0_44] : memref<49x4x128xbf16, #tpu.memory_space<vmem>>, vector<1x4x128xbf16>
    %84 = vector.shape_cast %83 : vector<1x4x128xbf16> to vector<4x128xbf16>
    %cst_45 = arith.constant dense<0.000000e+00> : vector<128x128xf32>
    %85 = tpu.matmul %82, %84, %cst_45 {dimension_numbers = #tpu.dot_dimension_numbers<[1], [0], [0], [1], [0, 0, 1, 1], [], []>} : vector<128x4xbf16>, vector<4x128xbf16>, vector<128x128xf32> -> vector<128x128xf32>
    %86 = arith.addf %80, %85 : vector<128x128xf32>
    %87 = vector.extract_strided_slice %1 {offsets = [2, 0, 0], sizes = [8, 16, 4], strides = [1, 1, 1]} : vector<14x22x4xbf16> to vector<8x16x4xbf16>
    %88 = vector.shape_cast %87 : vector<8x16x4xbf16> to vector<128x4xbf16>
    %c14 = arith.constant 14 : index
    %c0_46 = arith.constant 0 : index
    %c0_47 = arith.constant 0 : index
    %89 = vector.load %arg2[%c14, %c0_46, %c0_47] : memref<49x4x128xbf16, #tpu.memory_space<vmem>>, vector<1x4x128xbf16>
    %90 = vector.shape_cast %89 : vector<1x4x128xbf16> to vector<4x128xbf16>
    %cst_48 = arith.constant dense<0.000000e+00> : vector<128x128xf32>
    %91 = tpu.matmul %88, %90, %cst_48 {dimension_numbers = #tpu.dot_dimension_numbers<[1], [0], [0], [1], [0, 0, 1, 1], [], []>} : vector<128x4xbf16>, vector<4x128xbf16>, vector<128x128xf32> -> vector<128x128xf32>
    %92 = arith.addf %86, %91 : vector<128x128xf32>
    %93 = vector.extract_strided_slice %1 {offsets = [2, 1, 0], sizes = [8, 16, 4], strides = [1, 1, 1]} : vector<14x22x4xbf16> to vector<8x16x4xbf16>
    %94 = vector.shape_cast %93 : vector<8x16x4xbf16> to vector<128x4xbf16>
    %c15 = arith.constant 15 : index
    %c0_49 = arith.constant 0 : index
    %c0_50 = arith.constant 0 : index
    %95 = vector.load %arg2[%c15, %c0_49, %c0_50] : memref<49x4x128xbf16, #tpu.memory_space<vmem>>, vector<1x4x128xbf16>
    %96 = vector.shape_cast %95 : vector<1x4x128xbf16> to vector<4x128xbf16>
    %cst_51 = arith.constant dense<0.000000e+00> : vector<128x128xf32>
    %97 = tpu.matmul %94, %96, %cst_51 {dimension_numbers = #tpu.dot_dimension_numbers<[1], [0], [0], [1], [0, 0, 1, 1], [], []>} : vector<128x4xbf16>, vector<4x128xbf16>, vector<128x128xf32> -> vector<128x128xf32>
    %98 = arith.addf %92, %97 : vector<128x128xf32>
    %99 = vector.extract_strided_slice %1 {offsets = [2, 2, 0], sizes = [8, 16, 4], strides = [1, 1, 1]} : vector<14x22x4xbf16> to vector<8x16x4xbf16>
    %100 = vector.shape_cast %99 : vector<8x16x4xbf16> to vector<128x4xbf16>
    %c16 = arith.constant 16 : index
    %c0_52 = arith.constant 0 : index
    %c0_53 = arith.constant 0 : index
    %101 = vector.load %arg2[%c16, %c0_52, %c0_53] : memref<49x4x128xbf16, #tpu.memory_space<vmem>>, vector<1x4x128xbf16>
    %102 = vector.shape_cast %101 : vector<1x4x128xbf16> to vector<4x128xbf16>
    %cst_54 = arith.constant dense<0.000000e+00> : vector<128x128xf32>
    %103 = tpu.matmul %100, %102, %cst_54 {dimension_numbers = #tpu.dot_dimension_numbers<[1], [0], [0], [1], [0, 0, 1, 1], [], []>} : vector<128x4xbf16>, vector<4x128xbf16>, vector<128x128xf32> -> vector<128x128xf32>
    %104 = arith.addf %98, %103 : vector<128x128xf32>
    %105 = vector.extract_strided_slice %1 {offsets = [2, 3, 0], sizes = [8, 16, 4], strides = [1, 1, 1]} : vector<14x22x4xbf16> to vector<8x16x4xbf16>
    %106 = vector.shape_cast %105 : vector<8x16x4xbf16> to vector<128x4xbf16>
    %c17 = arith.constant 17 : index
    %c0_55 = arith.constant 0 : index
    %c0_56 = arith.constant 0 : index
    %107 = vector.load %arg2[%c17, %c0_55, %c0_56] : memref<49x4x128xbf16, #tpu.memory_space<vmem>>, vector<1x4x128xbf16>
    %108 = vector.shape_cast %107 : vector<1x4x128xbf16> to vector<4x128xbf16>
    %cst_57 = arith.constant dense<0.000000e+00> : vector<128x128xf32>
    %109 = tpu.matmul %106, %108, %cst_57 {dimension_numbers = #tpu.dot_dimension_numbers<[1], [0], [0], [1], [0, 0, 1, 1], [], []>} : vector<128x4xbf16>, vector<4x128xbf16>, vector<128x128xf32> -> vector<128x128xf32>
    %110 = arith.addf %104, %109 : vector<128x128xf32>
    %111 = vector.extract_strided_slice %1 {offsets = [2, 4, 0], sizes = [8, 16, 4], strides = [1, 1, 1]} : vector<14x22x4xbf16> to vector<8x16x4xbf16>
    %112 = vector.shape_cast %111 : vector<8x16x4xbf16> to vector<128x4xbf16>
    %c18 = arith.constant 18 : index
    %c0_58 = arith.constant 0 : index
    %c0_59 = arith.constant 0 : index
    %113 = vector.load %arg2[%c18, %c0_58, %c0_59] : memref<49x4x128xbf16, #tpu.memory_space<vmem>>, vector<1x4x128xbf16>
    %114 = vector.shape_cast %113 : vector<1x4x128xbf16> to vector<4x128xbf16>
    %cst_60 = arith.constant dense<0.000000e+00> : vector<128x128xf32>
    %115 = tpu.matmul %112, %114, %cst_60 {dimension_numbers = #tpu.dot_dimension_numbers<[1], [0], [0], [1], [0, 0, 1, 1], [], []>} : vector<128x4xbf16>, vector<4x128xbf16>, vector<128x128xf32> -> vector<128x128xf32>
    %116 = arith.addf %110, %115 : vector<128x128xf32>
    %117 = vector.extract_strided_slice %1 {offsets = [2, 5, 0], sizes = [8, 16, 4], strides = [1, 1, 1]} : vector<14x22x4xbf16> to vector<8x16x4xbf16>
    %118 = vector.shape_cast %117 : vector<8x16x4xbf16> to vector<128x4xbf16>
    %c19 = arith.constant 19 : index
    %c0_61 = arith.constant 0 : index
    %c0_62 = arith.constant 0 : index
    %119 = vector.load %arg2[%c19, %c0_61, %c0_62] : memref<49x4x128xbf16, #tpu.memory_space<vmem>>, vector<1x4x128xbf16>
    %120 = vector.shape_cast %119 : vector<1x4x128xbf16> to vector<4x128xbf16>
    %cst_63 = arith.constant dense<0.000000e+00> : vector<128x128xf32>
    %121 = tpu.matmul %118, %120, %cst_63 {dimension_numbers = #tpu.dot_dimension_numbers<[1], [0], [0], [1], [0, 0, 1, 1], [], []>} : vector<128x4xbf16>, vector<4x128xbf16>, vector<128x128xf32> -> vector<128x128xf32>
    %122 = arith.addf %116, %121 : vector<128x128xf32>
    %123 = vector.extract_strided_slice %1 {offsets = [2, 6, 0], sizes = [8, 16, 4], strides = [1, 1, 1]} : vector<14x22x4xbf16> to vector<8x16x4xbf16>
    %124 = vector.shape_cast %123 : vector<8x16x4xbf16> to vector<128x4xbf16>
    %c20 = arith.constant 20 : index
    %c0_64 = arith.constant 0 : index
    %c0_65 = arith.constant 0 : index
    %125 = vector.load %arg2[%c20, %c0_64, %c0_65] : memref<49x4x128xbf16, #tpu.memory_space<vmem>>, vector<1x4x128xbf16>
    %126 = vector.shape_cast %125 : vector<1x4x128xbf16> to vector<4x128xbf16>
    %cst_66 = arith.constant dense<0.000000e+00> : vector<128x128xf32>
    %127 = tpu.matmul %124, %126, %cst_66 {dimension_numbers = #tpu.dot_dimension_numbers<[1], [0], [0], [1], [0, 0, 1, 1], [], []>} : vector<128x4xbf16>, vector<4x128xbf16>, vector<128x128xf32> -> vector<128x128xf32>
    %128 = arith.addf %122, %127 : vector<128x128xf32>
    %129 = vector.extract_strided_slice %1 {offsets = [3, 0, 0], sizes = [8, 16, 4], strides = [1, 1, 1]} : vector<14x22x4xbf16> to vector<8x16x4xbf16>
    %130 = vector.shape_cast %129 : vector<8x16x4xbf16> to vector<128x4xbf16>
    %c21 = arith.constant 21 : index
    %c0_67 = arith.constant 0 : index
    %c0_68 = arith.constant 0 : index
    %131 = vector.load %arg2[%c21, %c0_67, %c0_68] : memref<49x4x128xbf16, #tpu.memory_space<vmem>>, vector<1x4x128xbf16>
    %132 = vector.shape_cast %131 : vector<1x4x128xbf16> to vector<4x128xbf16>
    %cst_69 = arith.constant dense<0.000000e+00> : vector<128x128xf32>
    %133 = tpu.matmul %130, %132, %cst_69 {dimension_numbers = #tpu.dot_dimension_numbers<[1], [0], [0], [1], [0, 0, 1, 1], [], []>} : vector<128x4xbf16>, vector<4x128xbf16>, vector<128x128xf32> -> vector<128x128xf32>
    %134 = arith.addf %128, %133 : vector<128x128xf32>
    %135 = vector.extract_strided_slice %1 {offsets = [3, 1, 0], sizes = [8, 16, 4], strides = [1, 1, 1]} : vector<14x22x4xbf16> to vector<8x16x4xbf16>
    %136 = vector.shape_cast %135 : vector<8x16x4xbf16> to vector<128x4xbf16>
    %c22 = arith.constant 22 : index
    %c0_70 = arith.constant 0 : index
    %c0_71 = arith.constant 0 : index
    %137 = vector.load %arg2[%c22, %c0_70, %c0_71] : memref<49x4x128xbf16, #tpu.memory_space<vmem>>, vector<1x4x128xbf16>
    %138 = vector.shape_cast %137 : vector<1x4x128xbf16> to vector<4x128xbf16>
    %cst_72 = arith.constant dense<0.000000e+00> : vector<128x128xf32>
    %139 = tpu.matmul %136, %138, %cst_72 {dimension_numbers = #tpu.dot_dimension_numbers<[1], [0], [0], [1], [0, 0, 1, 1], [], []>} : vector<128x4xbf16>, vector<4x128xbf16>, vector<128x128xf32> -> vector<128x128xf32>
    %140 = arith.addf %134, %139 : vector<128x128xf32>
    %141 = vector.extract_strided_slice %1 {offsets = [3, 2, 0], sizes = [8, 16, 4], strides = [1, 1, 1]} : vector<14x22x4xbf16> to vector<8x16x4xbf16>
    %142 = vector.shape_cast %141 : vector<8x16x4xbf16> to vector<128x4xbf16>
    %c23 = arith.constant 23 : index
    %c0_73 = arith.constant 0 : index
    %c0_74 = arith.constant 0 : index
    %143 = vector.load %arg2[%c23, %c0_73, %c0_74] : memref<49x4x128xbf16, #tpu.memory_space<vmem>>, vector<1x4x128xbf16>
    %144 = vector.shape_cast %143 : vector<1x4x128xbf16> to vector<4x128xbf16>
    %cst_75 = arith.constant dense<0.000000e+00> : vector<128x128xf32>
    %145 = tpu.matmul %142, %144, %cst_75 {dimension_numbers = #tpu.dot_dimension_numbers<[1], [0], [0], [1], [0, 0, 1, 1], [], []>} : vector<128x4xbf16>, vector<4x128xbf16>, vector<128x128xf32> -> vector<128x128xf32>
    %146 = arith.addf %140, %145 : vector<128x128xf32>
    %147 = vector.extract_strided_slice %1 {offsets = [3, 3, 0], sizes = [8, 16, 4], strides = [1, 1, 1]} : vector<14x22x4xbf16> to vector<8x16x4xbf16>
    %148 = vector.shape_cast %147 : vector<8x16x4xbf16> to vector<128x4xbf16>
    %c24 = arith.constant 24 : index
    %c0_76 = arith.constant 0 : index
    %c0_77 = arith.constant 0 : index
    %149 = vector.load %arg2[%c24, %c0_76, %c0_77] : memref<49x4x128xbf16, #tpu.memory_space<vmem>>, vector<1x4x128xbf16>
    %150 = vector.shape_cast %149 : vector<1x4x128xbf16> to vector<4x128xbf16>
    %cst_78 = arith.constant dense<0.000000e+00> : vector<128x128xf32>
    %151 = tpu.matmul %148, %150, %cst_78 {dimension_numbers = #tpu.dot_dimension_numbers<[1], [0], [0], [1], [0, 0, 1, 1], [], []>} : vector<128x4xbf16>, vector<4x128xbf16>, vector<128x128xf32> -> vector<128x128xf32>
    %152 = arith.addf %146, %151 : vector<128x128xf32>
    %153 = vector.extract_strided_slice %1 {offsets = [3, 4, 0], sizes = [8, 16, 4], strides = [1, 1, 1]} : vector<14x22x4xbf16> to vector<8x16x4xbf16>
    %154 = vector.shape_cast %153 : vector<8x16x4xbf16> to vector<128x4xbf16>
    %c25 = arith.constant 25 : index
    %c0_79 = arith.constant 0 : index
    %c0_80 = arith.constant 0 : index
    %155 = vector.load %arg2[%c25, %c0_79, %c0_80] : memref<49x4x128xbf16, #tpu.memory_space<vmem>>, vector<1x4x128xbf16>
    %156 = vector.shape_cast %155 : vector<1x4x128xbf16> to vector<4x128xbf16>
    %cst_81 = arith.constant dense<0.000000e+00> : vector<128x128xf32>
    %157 = tpu.matmul %154, %156, %cst_81 {dimension_numbers = #tpu.dot_dimension_numbers<[1], [0], [0], [1], [0, 0, 1, 1], [], []>} : vector<128x4xbf16>, vector<4x128xbf16>, vector<128x128xf32> -> vector<128x128xf32>
    %158 = arith.addf %152, %157 : vector<128x128xf32>
    %159 = vector.extract_strided_slice %1 {offsets = [3, 5, 0], sizes = [8, 16, 4], strides = [1, 1, 1]} : vector<14x22x4xbf16> to vector<8x16x4xbf16>
    %160 = vector.shape_cast %159 : vector<8x16x4xbf16> to vector<128x4xbf16>
    %c26 = arith.constant 26 : index
    %c0_82 = arith.constant 0 : index
    %c0_83 = arith.constant 0 : index
    %161 = vector.load %arg2[%c26, %c0_82, %c0_83] : memref<49x4x128xbf16, #tpu.memory_space<vmem>>, vector<1x4x128xbf16>
    %162 = vector.shape_cast %161 : vector<1x4x128xbf16> to vector<4x128xbf16>
    %cst_84 = arith.constant dense<0.000000e+00> : vector<128x128xf32>
    %163 = tpu.matmul %160, %162, %cst_84 {dimension_numbers = #tpu.dot_dimension_numbers<[1], [0], [0], [1], [0, 0, 1, 1], [], []>} : vector<128x4xbf16>, vector<4x128xbf16>, vector<128x128xf32> -> vector<128x128xf32>
    %164 = arith.addf %158, %163 : vector<128x128xf32>
    %165 = vector.extract_strided_slice %1 {offsets = [3, 6, 0], sizes = [8, 16, 4], strides = [1, 1, 1]} : vector<14x22x4xbf16> to vector<8x16x4xbf16>
    %166 = vector.shape_cast %165 : vector<8x16x4xbf16> to vector<128x4xbf16>
    %c27 = arith.constant 27 : index
    %c0_85 = arith.constant 0 : index
    %c0_86 = arith.constant 0 : index
    %167 = vector.load %arg2[%c27, %c0_85, %c0_86] : memref<49x4x128xbf16, #tpu.memory_space<vmem>>, vector<1x4x128xbf16>
    %168 = vector.shape_cast %167 : vector<1x4x128xbf16> to vector<4x128xbf16>
    %cst_87 = arith.constant dense<0.000000e+00> : vector<128x128xf32>
    %169 = tpu.matmul %166, %168, %cst_87 {dimension_numbers = #tpu.dot_dimension_numbers<[1], [0], [0], [1], [0, 0, 1, 1], [], []>} : vector<128x4xbf16>, vector<4x128xbf16>, vector<128x128xf32> -> vector<128x128xf32>
    %170 = arith.addf %164, %169 : vector<128x128xf32>
    %171 = vector.extract_strided_slice %1 {offsets = [4, 0, 0], sizes = [8, 16, 4], strides = [1, 1, 1]} : vector<14x22x4xbf16> to vector<8x16x4xbf16>
    %172 = vector.shape_cast %171 : vector<8x16x4xbf16> to vector<128x4xbf16>
    %c28 = arith.constant 28 : index
    %c0_88 = arith.constant 0 : index
    %c0_89 = arith.constant 0 : index
    %173 = vector.load %arg2[%c28, %c0_88, %c0_89] : memref<49x4x128xbf16, #tpu.memory_space<vmem>>, vector<1x4x128xbf16>
    %174 = vector.shape_cast %173 : vector<1x4x128xbf16> to vector<4x128xbf16>
    %cst_90 = arith.constant dense<0.000000e+00> : vector<128x128xf32>
    %175 = tpu.matmul %172, %174, %cst_90 {dimension_numbers = #tpu.dot_dimension_numbers<[1], [0], [0], [1], [0, 0, 1, 1], [], []>} : vector<128x4xbf16>, vector<4x128xbf16>, vector<128x128xf32> -> vector<128x128xf32>
    %176 = arith.addf %170, %175 : vector<128x128xf32>
    %177 = vector.extract_strided_slice %1 {offsets = [4, 1, 0], sizes = [8, 16, 4], strides = [1, 1, 1]} : vector<14x22x4xbf16> to vector<8x16x4xbf16>
    %178 = vector.shape_cast %177 : vector<8x16x4xbf16> to vector<128x4xbf16>
    %c29 = arith.constant 29 : index
    %c0_91 = arith.constant 0 : index
    %c0_92 = arith.constant 0 : index
    %179 = vector.load %arg2[%c29, %c0_91, %c0_92] : memref<49x4x128xbf16, #tpu.memory_space<vmem>>, vector<1x4x128xbf16>
    %180 = vector.shape_cast %179 : vector<1x4x128xbf16> to vector<4x128xbf16>
    %cst_93 = arith.constant dense<0.000000e+00> : vector<128x128xf32>
    %181 = tpu.matmul %178, %180, %cst_93 {dimension_numbers = #tpu.dot_dimension_numbers<[1], [0], [0], [1], [0, 0, 1, 1], [], []>} : vector<128x4xbf16>, vector<4x128xbf16>, vector<128x128xf32> -> vector<128x128xf32>
    %182 = arith.addf %176, %181 : vector<128x128xf32>
    %183 = vector.extract_strided_slice %1 {offsets = [4, 2, 0], sizes = [8, 16, 4], strides = [1, 1, 1]} : vector<14x22x4xbf16> to vector<8x16x4xbf16>
    %184 = vector.shape_cast %183 : vector<8x16x4xbf16> to vector<128x4xbf16>
    %c30 = arith.constant 30 : index
    %c0_94 = arith.constant 0 : index
    %c0_95 = arith.constant 0 : index
    %185 = vector.load %arg2[%c30, %c0_94, %c0_95] : memref<49x4x128xbf16, #tpu.memory_space<vmem>>, vector<1x4x128xbf16>
    %186 = vector.shape_cast %185 : vector<1x4x128xbf16> to vector<4x128xbf16>
    %cst_96 = arith.constant dense<0.000000e+00> : vector<128x128xf32>
    %187 = tpu.matmul %184, %186, %cst_96 {dimension_numbers = #tpu.dot_dimension_numbers<[1], [0], [0], [1], [0, 0, 1, 1], [], []>} : vector<128x4xbf16>, vector<4x128xbf16>, vector<128x128xf32> -> vector<128x128xf32>
    %188 = arith.addf %182, %187 : vector<128x128xf32>
    %189 = vector.extract_strided_slice %1 {offsets = [4, 3, 0], sizes = [8, 16, 4], strides = [1, 1, 1]} : vector<14x22x4xbf16> to vector<8x16x4xbf16>
    %190 = vector.shape_cast %189 : vector<8x16x4xbf16> to vector<128x4xbf16>
    %c31 = arith.constant 31 : index
    %c0_97 = arith.constant 0 : index
    %c0_98 = arith.constant 0 : index
    %191 = vector.load %arg2[%c31, %c0_97, %c0_98] : memref<49x4x128xbf16, #tpu.memory_space<vmem>>, vector<1x4x128xbf16>
    %192 = vector.shape_cast %191 : vector<1x4x128xbf16> to vector<4x128xbf16>
    %cst_99 = arith.constant dense<0.000000e+00> : vector<128x128xf32>
    %193 = tpu.matmul %190, %192, %cst_99 {dimension_numbers = #tpu.dot_dimension_numbers<[1], [0], [0], [1], [0, 0, 1, 1], [], []>} : vector<128x4xbf16>, vector<4x128xbf16>, vector<128x128xf32> -> vector<128x128xf32>
    %194 = arith.addf %188, %193 : vector<128x128xf32>
    %195 = vector.extract_strided_slice %1 {offsets = [4, 4, 0], sizes = [8, 16, 4], strides = [1, 1, 1]} : vector<14x22x4xbf16> to vector<8x16x4xbf16>
    %196 = vector.shape_cast %195 : vector<8x16x4xbf16> to vector<128x4xbf16>
    %c32 = arith.constant 32 : index
    %c0_100 = arith.constant 0 : index
    %c0_101 = arith.constant 0 : index
    %197 = vector.load %arg2[%c32, %c0_100, %c0_101] : memref<49x4x128xbf16, #tpu.memory_space<vmem>>, vector<1x4x128xbf16>
    %198 = vector.shape_cast %197 : vector<1x4x128xbf16> to vector<4x128xbf16>
    %cst_102 = arith.constant dense<0.000000e+00> : vector<128x128xf32>
    %199 = tpu.matmul %196, %198, %cst_102 {dimension_numbers = #tpu.dot_dimension_numbers<[1], [0], [0], [1], [0, 0, 1, 1], [], []>} : vector<128x4xbf16>, vector<4x128xbf16>, vector<128x128xf32> -> vector<128x128xf32>
    %200 = arith.addf %194, %199 : vector<128x128xf32>
    %201 = vector.extract_strided_slice %1 {offsets = [4, 5, 0], sizes = [8, 16, 4], strides = [1, 1, 1]} : vector<14x22x4xbf16> to vector<8x16x4xbf16>
    %202 = vector.shape_cast %201 : vector<8x16x4xbf16> to vector<128x4xbf16>
    %c33 = arith.constant 33 : index
    %c0_103 = arith.constant 0 : index
    %c0_104 = arith.constant 0 : index
    %203 = vector.load %arg2[%c33, %c0_103, %c0_104] : memref<49x4x128xbf16, #tpu.memory_space<vmem>>, vector<1x4x128xbf16>
    %204 = vector.shape_cast %203 : vector<1x4x128xbf16> to vector<4x128xbf16>
    %cst_105 = arith.constant dense<0.000000e+00> : vector<128x128xf32>
    %205 = tpu.matmul %202, %204, %cst_105 {dimension_numbers = #tpu.dot_dimension_numbers<[1], [0], [0], [1], [0, 0, 1, 1], [], []>} : vector<128x4xbf16>, vector<4x128xbf16>, vector<128x128xf32> -> vector<128x128xf32>
    %206 = arith.addf %200, %205 : vector<128x128xf32>
    %207 = vector.extract_strided_slice %1 {offsets = [4, 6, 0], sizes = [8, 16, 4], strides = [1, 1, 1]} : vector<14x22x4xbf16> to vector<8x16x4xbf16>
    %208 = vector.shape_cast %207 : vector<8x16x4xbf16> to vector<128x4xbf16>
    %c34 = arith.constant 34 : index
    %c0_106 = arith.constant 0 : index
    %c0_107 = arith.constant 0 : index
    %209 = vector.load %arg2[%c34, %c0_106, %c0_107] : memref<49x4x128xbf16, #tpu.memory_space<vmem>>, vector<1x4x128xbf16>
    %210 = vector.shape_cast %209 : vector<1x4x128xbf16> to vector<4x128xbf16>
    %cst_108 = arith.constant dense<0.000000e+00> : vector<128x128xf32>
    %211 = tpu.matmul %208, %210, %cst_108 {dimension_numbers = #tpu.dot_dimension_numbers<[1], [0], [0], [1], [0, 0, 1, 1], [], []>} : vector<128x4xbf16>, vector<4x128xbf16>, vector<128x128xf32> -> vector<128x128xf32>
    %212 = arith.addf %206, %211 : vector<128x128xf32>
    %213 = vector.extract_strided_slice %1 {offsets = [5, 0, 0], sizes = [8, 16, 4], strides = [1, 1, 1]} : vector<14x22x4xbf16> to vector<8x16x4xbf16>
    %214 = vector.shape_cast %213 : vector<8x16x4xbf16> to vector<128x4xbf16>
    %c35 = arith.constant 35 : index
    %c0_109 = arith.constant 0 : index
    %c0_110 = arith.constant 0 : index
    %215 = vector.load %arg2[%c35, %c0_109, %c0_110] : memref<49x4x128xbf16, #tpu.memory_space<vmem>>, vector<1x4x128xbf16>
    %216 = vector.shape_cast %215 : vector<1x4x128xbf16> to vector<4x128xbf16>
    %cst_111 = arith.constant dense<0.000000e+00> : vector<128x128xf32>
    %217 = tpu.matmul %214, %216, %cst_111 {dimension_numbers = #tpu.dot_dimension_numbers<[1], [0], [0], [1], [0, 0, 1, 1], [], []>} : vector<128x4xbf16>, vector<4x128xbf16>, vector<128x128xf32> -> vector<128x128xf32>
    %218 = arith.addf %212, %217 : vector<128x128xf32>
    %219 = vector.extract_strided_slice %1 {offsets = [5, 1, 0], sizes = [8, 16, 4], strides = [1, 1, 1]} : vector<14x22x4xbf16> to vector<8x16x4xbf16>
    %220 = vector.shape_cast %219 : vector<8x16x4xbf16> to vector<128x4xbf16>
    %c36 = arith.constant 36 : index
    %c0_112 = arith.constant 0 : index
    %c0_113 = arith.constant 0 : index
    %221 = vector.load %arg2[%c36, %c0_112, %c0_113] : memref<49x4x128xbf16, #tpu.memory_space<vmem>>, vector<1x4x128xbf16>
    %222 = vector.shape_cast %221 : vector<1x4x128xbf16> to vector<4x128xbf16>
    %cst_114 = arith.constant dense<0.000000e+00> : vector<128x128xf32>
    %223 = tpu.matmul %220, %222, %cst_114 {dimension_numbers = #tpu.dot_dimension_numbers<[1], [0], [0], [1], [0, 0, 1, 1], [], []>} : vector<128x4xbf16>, vector<4x128xbf16>, vector<128x128xf32> -> vector<128x128xf32>
    %224 = arith.addf %218, %223 : vector<128x128xf32>
    %225 = vector.extract_strided_slice %1 {offsets = [5, 2, 0], sizes = [8, 16, 4], strides = [1, 1, 1]} : vector<14x22x4xbf16> to vector<8x16x4xbf16>
    %226 = vector.shape_cast %225 : vector<8x16x4xbf16> to vector<128x4xbf16>
    %c37 = arith.constant 37 : index
    %c0_115 = arith.constant 0 : index
    %c0_116 = arith.constant 0 : index
    %227 = vector.load %arg2[%c37, %c0_115, %c0_116] : memref<49x4x128xbf16, #tpu.memory_space<vmem>>, vector<1x4x128xbf16>
    %228 = vector.shape_cast %227 : vector<1x4x128xbf16> to vector<4x128xbf16>
    %cst_117 = arith.constant dense<0.000000e+00> : vector<128x128xf32>
    %229 = tpu.matmul %226, %228, %cst_117 {dimension_numbers = #tpu.dot_dimension_numbers<[1], [0], [0], [1], [0, 0, 1, 1], [], []>} : vector<128x4xbf16>, vector<4x128xbf16>, vector<128x128xf32> -> vector<128x128xf32>
    %230 = arith.addf %224, %229 : vector<128x128xf32>
    %231 = vector.extract_strided_slice %1 {offsets = [5, 3, 0], sizes = [8, 16, 4], strides = [1, 1, 1]} : vector<14x22x4xbf16> to vector<8x16x4xbf16>
    %232 = vector.shape_cast %231 : vector<8x16x4xbf16> to vector<128x4xbf16>
    %c38 = arith.constant 38 : index
    %c0_118 = arith.constant 0 : index
    %c0_119 = arith.constant 0 : index
    %233 = vector.load %arg2[%c38, %c0_118, %c0_119] : memref<49x4x128xbf16, #tpu.memory_space<vmem>>, vector<1x4x128xbf16>
    %234 = vector.shape_cast %233 : vector<1x4x128xbf16> to vector<4x128xbf16>
    %cst_120 = arith.constant dense<0.000000e+00> : vector<128x128xf32>
    %235 = tpu.matmul %232, %234, %cst_120 {dimension_numbers = #tpu.dot_dimension_numbers<[1], [0], [0], [1], [0, 0, 1, 1], [], []>} : vector<128x4xbf16>, vector<4x128xbf16>, vector<128x128xf32> -> vector<128x128xf32>
    %236 = arith.addf %230, %235 : vector<128x128xf32>
    %237 = vector.extract_strided_slice %1 {offsets = [5, 4, 0], sizes = [8, 16, 4], strides = [1, 1, 1]} : vector<14x22x4xbf16> to vector<8x16x4xbf16>
    %238 = vector.shape_cast %237 : vector<8x16x4xbf16> to vector<128x4xbf16>
    %c39 = arith.constant 39 : index
    %c0_121 = arith.constant 0 : index
    %c0_122 = arith.constant 0 : index
    %239 = vector.load %arg2[%c39, %c0_121, %c0_122] : memref<49x4x128xbf16, #tpu.memory_space<vmem>>, vector<1x4x128xbf16>
    %240 = vector.shape_cast %239 : vector<1x4x128xbf16> to vector<4x128xbf16>
    %cst_123 = arith.constant dense<0.000000e+00> : vector<128x128xf32>
    %241 = tpu.matmul %238, %240, %cst_123 {dimension_numbers = #tpu.dot_dimension_numbers<[1], [0], [0], [1], [0, 0, 1, 1], [], []>} : vector<128x4xbf16>, vector<4x128xbf16>, vector<128x128xf32> -> vector<128x128xf32>
    %242 = arith.addf %236, %241 : vector<128x128xf32>
    %243 = vector.extract_strided_slice %1 {offsets = [5, 5, 0], sizes = [8, 16, 4], strides = [1, 1, 1]} : vector<14x22x4xbf16> to vector<8x16x4xbf16>
    %244 = vector.shape_cast %243 : vector<8x16x4xbf16> to vector<128x4xbf16>
    %c40 = arith.constant 40 : index
    %c0_124 = arith.constant 0 : index
    %c0_125 = arith.constant 0 : index
    %245 = vector.load %arg2[%c40, %c0_124, %c0_125] : memref<49x4x128xbf16, #tpu.memory_space<vmem>>, vector<1x4x128xbf16>
    %246 = vector.shape_cast %245 : vector<1x4x128xbf16> to vector<4x128xbf16>
    %cst_126 = arith.constant dense<0.000000e+00> : vector<128x128xf32>
    %247 = tpu.matmul %244, %246, %cst_126 {dimension_numbers = #tpu.dot_dimension_numbers<[1], [0], [0], [1], [0, 0, 1, 1], [], []>} : vector<128x4xbf16>, vector<4x128xbf16>, vector<128x128xf32> -> vector<128x128xf32>
    %248 = arith.addf %242, %247 : vector<128x128xf32>
    %249 = vector.extract_strided_slice %1 {offsets = [5, 6, 0], sizes = [8, 16, 4], strides = [1, 1, 1]} : vector<14x22x4xbf16> to vector<8x16x4xbf16>
    %250 = vector.shape_cast %249 : vector<8x16x4xbf16> to vector<128x4xbf16>
    %c41 = arith.constant 41 : index
    %c0_127 = arith.constant 0 : index
    %c0_128 = arith.constant 0 : index
    %251 = vector.load %arg2[%c41, %c0_127, %c0_128] : memref<49x4x128xbf16, #tpu.memory_space<vmem>>, vector<1x4x128xbf16>
    %252 = vector.shape_cast %251 : vector<1x4x128xbf16> to vector<4x128xbf16>
    %cst_129 = arith.constant dense<0.000000e+00> : vector<128x128xf32>
    %253 = tpu.matmul %250, %252, %cst_129 {dimension_numbers = #tpu.dot_dimension_numbers<[1], [0], [0], [1], [0, 0, 1, 1], [], []>} : vector<128x4xbf16>, vector<4x128xbf16>, vector<128x128xf32> -> vector<128x128xf32>
    %254 = arith.addf %248, %253 : vector<128x128xf32>
    %255 = vector.extract_strided_slice %1 {offsets = [6, 0, 0], sizes = [8, 16, 4], strides = [1, 1, 1]} : vector<14x22x4xbf16> to vector<8x16x4xbf16>
    %256 = vector.shape_cast %255 : vector<8x16x4xbf16> to vector<128x4xbf16>
    %c42 = arith.constant 42 : index
    %c0_130 = arith.constant 0 : index
    %c0_131 = arith.constant 0 : index
    %257 = vector.load %arg2[%c42, %c0_130, %c0_131] : memref<49x4x128xbf16, #tpu.memory_space<vmem>>, vector<1x4x128xbf16>
    %258 = vector.shape_cast %257 : vector<1x4x128xbf16> to vector<4x128xbf16>
    %cst_132 = arith.constant dense<0.000000e+00> : vector<128x128xf32>
    %259 = tpu.matmul %256, %258, %cst_132 {dimension_numbers = #tpu.dot_dimension_numbers<[1], [0], [0], [1], [0, 0, 1, 1], [], []>} : vector<128x4xbf16>, vector<4x128xbf16>, vector<128x128xf32> -> vector<128x128xf32>
    %260 = arith.addf %254, %259 : vector<128x128xf32>
    %261 = vector.extract_strided_slice %1 {offsets = [6, 1, 0], sizes = [8, 16, 4], strides = [1, 1, 1]} : vector<14x22x4xbf16> to vector<8x16x4xbf16>
    %262 = vector.shape_cast %261 : vector<8x16x4xbf16> to vector<128x4xbf16>
    %c43 = arith.constant 43 : index
    %c0_133 = arith.constant 0 : index
    %c0_134 = arith.constant 0 : index
    %263 = vector.load %arg2[%c43, %c0_133, %c0_134] : memref<49x4x128xbf16, #tpu.memory_space<vmem>>, vector<1x4x128xbf16>
    %264 = vector.shape_cast %263 : vector<1x4x128xbf16> to vector<4x128xbf16>
    %cst_135 = arith.constant dense<0.000000e+00> : vector<128x128xf32>
    %265 = tpu.matmul %262, %264, %cst_135 {dimension_numbers = #tpu.dot_dimension_numbers<[1], [0], [0], [1], [0, 0, 1, 1], [], []>} : vector<128x4xbf16>, vector<4x128xbf16>, vector<128x128xf32> -> vector<128x128xf32>
    %266 = arith.addf %260, %265 : vector<128x128xf32>
    %267 = vector.extract_strided_slice %1 {offsets = [6, 2, 0], sizes = [8, 16, 4], strides = [1, 1, 1]} : vector<14x22x4xbf16> to vector<8x16x4xbf16>
    %268 = vector.shape_cast %267 : vector<8x16x4xbf16> to vector<128x4xbf16>
    %c44 = arith.constant 44 : index
    %c0_136 = arith.constant 0 : index
    %c0_137 = arith.constant 0 : index
    %269 = vector.load %arg2[%c44, %c0_136, %c0_137] : memref<49x4x128xbf16, #tpu.memory_space<vmem>>, vector<1x4x128xbf16>
    %270 = vector.shape_cast %269 : vector<1x4x128xbf16> to vector<4x128xbf16>
    %cst_138 = arith.constant dense<0.000000e+00> : vector<128x128xf32>
    %271 = tpu.matmul %268, %270, %cst_138 {dimension_numbers = #tpu.dot_dimension_numbers<[1], [0], [0], [1], [0, 0, 1, 1], [], []>} : vector<128x4xbf16>, vector<4x128xbf16>, vector<128x128xf32> -> vector<128x128xf32>
    %272 = arith.addf %266, %271 : vector<128x128xf32>
    %273 = vector.extract_strided_slice %1 {offsets = [6, 3, 0], sizes = [8, 16, 4], strides = [1, 1, 1]} : vector<14x22x4xbf16> to vector<8x16x4xbf16>
    %274 = vector.shape_cast %273 : vector<8x16x4xbf16> to vector<128x4xbf16>
    %c45 = arith.constant 45 : index
    %c0_139 = arith.constant 0 : index
    %c0_140 = arith.constant 0 : index
    %275 = vector.load %arg2[%c45, %c0_139, %c0_140] : memref<49x4x128xbf16, #tpu.memory_space<vmem>>, vector<1x4x128xbf16>
    %276 = vector.shape_cast %275 : vector<1x4x128xbf16> to vector<4x128xbf16>
    %cst_141 = arith.constant dense<0.000000e+00> : vector<128x128xf32>
    %277 = tpu.matmul %274, %276, %cst_141 {dimension_numbers = #tpu.dot_dimension_numbers<[1], [0], [0], [1], [0, 0, 1, 1], [], []>} : vector<128x4xbf16>, vector<4x128xbf16>, vector<128x128xf32> -> vector<128x128xf32>
    %278 = arith.addf %272, %277 : vector<128x128xf32>
    %279 = vector.extract_strided_slice %1 {offsets = [6, 4, 0], sizes = [8, 16, 4], strides = [1, 1, 1]} : vector<14x22x4xbf16> to vector<8x16x4xbf16>
    %280 = vector.shape_cast %279 : vector<8x16x4xbf16> to vector<128x4xbf16>
    %c46 = arith.constant 46 : index
    %c0_142 = arith.constant 0 : index
    %c0_143 = arith.constant 0 : index
    %281 = vector.load %arg2[%c46, %c0_142, %c0_143] : memref<49x4x128xbf16, #tpu.memory_space<vmem>>, vector<1x4x128xbf16>
    %282 = vector.shape_cast %281 : vector<1x4x128xbf16> to vector<4x128xbf16>
    %cst_144 = arith.constant dense<0.000000e+00> : vector<128x128xf32>
    %283 = tpu.matmul %280, %282, %cst_144 {dimension_numbers = #tpu.dot_dimension_numbers<[1], [0], [0], [1], [0, 0, 1, 1], [], []>} : vector<128x4xbf16>, vector<4x128xbf16>, vector<128x128xf32> -> vector<128x128xf32>
    %284 = arith.addf %278, %283 : vector<128x128xf32>
    %285 = vector.extract_strided_slice %1 {offsets = [6, 5, 0], sizes = [8, 16, 4], strides = [1, 1, 1]} : vector<14x22x4xbf16> to vector<8x16x4xbf16>
    %286 = vector.shape_cast %285 : vector<8x16x4xbf16> to vector<128x4xbf16>
    %c47 = arith.constant 47 : index
    %c0_145 = arith.constant 0 : index
    %c0_146 = arith.constant 0 : index
    %287 = vector.load %arg2[%c47, %c0_145, %c0_146] : memref<49x4x128xbf16, #tpu.memory_space<vmem>>, vector<1x4x128xbf16>
    %288 = vector.shape_cast %287 : vector<1x4x128xbf16> to vector<4x128xbf16>
    %cst_147 = arith.constant dense<0.000000e+00> : vector<128x128xf32>
    %289 = tpu.matmul %286, %288, %cst_147 {dimension_numbers = #tpu.dot_dimension_numbers<[1], [0], [0], [1], [0, 0, 1, 1], [], []>} : vector<128x4xbf16>, vector<4x128xbf16>, vector<128x128xf32> -> vector<128x128xf32>
    %290 = arith.addf %284, %289 : vector<128x128xf32>
    %291 = vector.extract_strided_slice %1 {offsets = [6, 6, 0], sizes = [8, 16, 4], strides = [1, 1, 1]} : vector<14x22x4xbf16> to vector<8x16x4xbf16>
    %292 = vector.shape_cast %291 : vector<8x16x4xbf16> to vector<128x4xbf16>
    %c48 = arith.constant 48 : index
    %c0_148 = arith.constant 0 : index
    %c0_149 = arith.constant 0 : index
    %293 = vector.load %arg2[%c48, %c0_148, %c0_149] : memref<49x4x128xbf16, #tpu.memory_space<vmem>>, vector<1x4x128xbf16>
    %294 = vector.shape_cast %293 : vector<1x4x128xbf16> to vector<4x128xbf16>
    %cst_150 = arith.constant dense<0.000000e+00> : vector<128x128xf32>
    %295 = tpu.matmul %292, %294, %cst_150 {dimension_numbers = #tpu.dot_dimension_numbers<[1], [0], [0], [1], [0, 0, 1, 1], [], []>} : vector<128x4xbf16>, vector<4x128xbf16>, vector<128x128xf32> -> vector<128x128xf32>
    %296 = arith.addf %290, %295 : vector<128x128xf32>
    %c0_151 = arith.constant 0 : index
    %c0_152 = arith.constant 0 : index
    %297 = vector.load %arg3[%c0_151, %c0_152] : memref<1x128xf32, #tpu.memory_space<vmem>>, vector<1x128xf32>
    %298 = vector.broadcast %297 : vector<1x128xf32> to vector<128x128xf32>
    %299 = arith.addf %296, %298 : vector<128x128xf32>
    %c0_153 = arith.constant 0 : index
    %c0_154 = arith.constant 0 : index
    %c0_155 = arith.constant 0 : index
    %300 = vector.load %arg4[%c0_153, %c0_154, %c0_155] : memref<1x128x128xf32, #tpu.memory_space<vmem>>, vector<1x128x128xf32>
    %301 = vector.shape_cast %300 : vector<1x128x128xf32> to vector<128x128xf32>
    %302 = vector.shape_cast %299 : vector<128x128xf32> to vector<1x128x128xf32>
    tpu.vector_store %arg4[%c0_153, %c0_154, %c0_155], %302 {strides = array<i32>} : memref<1x128x128xf32, #tpu.memory_space<vmem>>, vector<1x128x128xf32>,
    return
  }
  func.func @transform_0(%arg0: i32) -> (i32, i32, i32, i32) {
    %c0_i32 = arith.constant 0 : i32
    %c0_i32_0 = arith.constant 0 : i32
    %c0_i32_1 = arith.constant 0 : i32
    %c0_i32_2 = arith.constant 0 : i32
    return %arg0, %c0_i32, %c0_i32_0, %c0_i32_1 : i32, i32, i32, i32
  }
  func.func @transform_1(%arg0: i32) -> (i32, i32, i32) {
    %c0_i32 = arith.constant 0 : i32
    %c0_i32_0 = arith.constant 0 : i32
    %c0_i32_1 = arith.constant 0 : i32
    %c0_i32_2 = arith.constant 0 : i32
    return %c0_i32, %c0_i32_0, %c0_i32_1 : i32, i32, i32
  }
  func.func @transform_2(%arg0: i32) -> (i32, i32) {
    %c0_i32 = arith.constant 0 : i32
    %c0_i32_0 = arith.constant 0 : i32
    %c0_i32_1 = arith.constant 0 : i32
    return %c0_i32, %c0_i32_0 : i32, i32
  }
  func.func @transform_3(%arg0: i32) -> (i32, i32, i32) {
    %c0_i32 = arith.constant 0 : i32
    %c0_i32_0 = arith.constant 0 : i32
    %c0_i32_1 = arith.constant 0 : i32
    return %arg0, %c0_i32, %c0_i32_0 : i32, i32, i32
  }
}

</mosaic_0001>

<bundles_post_ra>
// kernel: conv_block_forward.1
= control target key start
LH: loop header
LB: loop body
LE: loop exit
PB: predicated region body
PF: predicated region fallthrough
CT: control target
= control target key end

     0   :  { %s10537_s12 = smov 0   ;;  %s13042_s0 = inlined_call_operand.vmem [shape: bf16[4,14,22,4], index: 0, kind: input, shape index: {}]   ;;  %s13043_s1 = inlined_call_operand.vmem [shape: bf16[49,4,128], index: 1, kind: input, shape index: {}]   ;;  %s13044_s2 = inlined_call_operand.vmem [shape: f32[1,128], index: 2, kind: input, shape index: {}]   ;;  %s13045_s3 = inlined_call_operand.vmem [shape: f32[4,128,128], index: 3, kind: output, shape index: {}]  }
   0x1 LB: > { %s7729_s13 = sadd.s32 4294967295, %s10515_s12   ;;  %p7733_p0 = scmp.ge.s32.totalorder %s10515_s12, 1  ;;  %s10515_s12 = sphi %s10537_s12, %s13_s12  }
   0x2   : > { %p137_p1 = scmp.lt.s32.totalorder %s10515_s12, 5 }
   0x4   : > { %p138_p2 = pnand %p7733_p0, %p137_p1 }
   0x6   : > { %141 = sbr.rel (%p138_p2) target bundleno = 1062 (0x426), region = 32 }
   0xd   : > { %v7737_v0 = vld [vmem:[%s13043_s1 + $0x2] sm:$0x3]  ;;  %vm461_vm0 = vcmask 1041408   ;;  %v8056_v1 = vld [vmem:[%s13043_s1 + $0x30] sm:$0x3]  ;;  %p161_p3 = scmp.lt.s32.totalorder %s7729_s13, 3 }
   0xe   : > { %10414 = vmatprep.subr.msk.bf16.mxu1 %vm461_vm0, %v7737_v0  ;;  %10438 = vmatprep.subr.msk.bf16.mxu0 %vm461_vm0, %v8056_v1  ;;  %v463_v2 = vsel %vm461_vm0, %v7737_v0, 0  ;;  %v10555_v3 = vsel %vm461_vm0, %v8056_v1, 0  ;;  %v10563_v4 = vld [vmem:[%s13043_s1] sm:$0x3]  ;;  %v10570_v5 = vld [vmem:[%s13043_s1 + $0x32] sm:$0x3] }
   0xf   : > { %13304 = vst [vmem:[#allocation2_spill] sm:$0xff] %v10555_v3  ;;  %8763 = vmatpush3.bf16.msra.mxu1 %v463_v2  ;;  %9195 = vmatpush3.bf16.msra.mxu0 %v10555_v3  ;;  %s13651_s13 = smov (!%p161_p3, %s7729_s13), 3  ;;  %vm215_vm1 = vsmask.f32 3328  ;;  %vm216_vm2 = vsmask.f32 7440 }
  0x10   : > { %10415 = vmatprep.subr.msk.bf16.mxu1 %vm461_vm0, %v10563_v4  ;;  %s10464_s22 = smul.u32 168, %s13651_s13  ;;  %10440 = vmatprep.subr.msk.bf16.mxu0 %vm461_vm0, %v10570_v5  ;;  %vm959_vm3 = vsmask.f32 2304  ;;  %vm960_vm4 = vsmask.f32 6416  ;;  %vm436_vm5 = vcmask 31744   ;;  %vm10639_vm6 = vmor %vm215_vm1, %vm216_vm2 }
  0x11   : > { %v13313_v31 = vmov 0  ;;  %vm10668_vm7 = vmor %vm959_vm3, %vm960_vm4  ;;  %v13320_v48 = vmov 0  ;;  %v10679_v55 = vld [vmem:[%s13043_s1 + $0x34] sm:$0x3]  ;;  %v10692_v60 = vld [vmem:[%s13043_s1 + $0x4] sm:$0x3] }
  0x12   : > { %s10578_s25 = scalar_lea.vmem %s13042_s0, %s10464_s22  ;;  %v13314_v31 = vsel %vm10639_vm6, 4294967295, %v13313_v31  ;;  %v13321_v48 = vsel %vm10668_vm7, 4294967295, %v13320_v48  ;;  %v627_v63 = vsel %vm461_vm0, %v10563_v4, 0  ;;  %v10703_v0 = vsel %vm461_vm0, %v10570_v5, 0  ;;  %s8320_s20 = sshll.u32 %s13651_s13, 7 }
  0x13   : > { %v10581_v6 = vld [vmem:[%s10578_s25] sm:$0xf]  ;;  %v10584_v7 = vld [vmem:[%s10578_s25 + $0x4] sm:$0xf]  ;;  %v10587_v8 = vld [vmem:[%s10578_s25 + $0x8] sm:$0x7]  ;;  %s13005_s26 = scalar_lea.vmem %s13045_s3, %s8320_s20 }
  0x14   : > { %13305 = vst [vmem:[#allocation3_spill] sm:$0xff] %v10587_v8  ;;  %v10590_v9 = vshrl.u32 %v10581_v6, 16  ;;  %v10593_v10 = vshll.u32 %v10581_v6, 16  ;;  %v10596_v11 = vshll.u32 %v10584_v7, 16  ;;  %v10599_v12 = vshrl.u32 %v10584_v7, 16  ;;  %13315 = vst [vmem:[#allocation11_spill] sm:$0xff] %v13314_v31 }
  0x15   : > { %v10602_v13 = vld [vmem:[%s10578_s25 + $0x24] sm:$0xf]  ;;  %v10605_v14 = vshll.u32 %v10587_v8, 16  ;;  %v10608_v15 = vld [vmem:[%s10578_s25 + $0x28] sm:$0xf]  ;;  %13322 = vst [vmem:[#allocation16_spill] sm:$0xff] %v13321_v48 }
  0x16   : > { %13306 = vst [vmem:[#allocation4_spill] sm:$0xff] %v10590_v9  ;;  %13307 = vst [vmem:[#allocation5_spill] sm:$0xff] %v10593_v10  ;;  %v10611_v16 = vld [vmem:[%s10578_s25 + $0x2c] sm:$0x7]  ;;  %v10614_v17 = vshrl.u32 %v10602_v13, 16  ;;  %v221_v18 = vrot.slane %v10590_v9, 4 }
  0x17   : > { %13308 = vst [vmem:[#allocation6_spill] sm:$0xff] %v10596_v11  ;;  %13309 = vst [vmem:[#allocation7_spill] sm:$0xff] %v10599_v12  ;;  %v224_v19 = vrot.slane %v10593_v10, 5  ;;  %v230_v20 = vrot.slane %v10596_v11, 5  ;;  %v234_v21 = vrot.slane %v10599_v12, 4  ;;  %v240_v22 = vrot.slane %v10605_v14, 5 }
  0x18   : > { %13310 = vst [vmem:[#allocation8_spill] sm:$0xff] %v10605_v14  ;;  %13311 = vst [vmem:[#allocation9_spill] sm:$0xff] %v10608_v15  ;;  %v10622_v23 = vshll.u32 %v10602_v13, 16  ;;  %v10625_v24 = vshll.u32 %v10608_v15, 16  ;;  %v10628_v25 = vshrl.u32 %v10608_v15, 16  ;;  %v10634_v29 = vshll.u32 %v10611_v16, 16 }
  0x19   : > { %v10631_v26 = vld [vmem:[%s10578_s25 + $0xc] sm:$0xf]  ;;  %v225_v27 = vor.u32 %v224_v19, %v221_v18  ;;  %v235_v28 = vor.u32 %v234_v21, %v230_v20  ;;  %v1007_v30 = vrot.slane %v10614_v17, 5  ;;  %v13046_v35 = vshrl.u32 %v10611_v16, 16  ;;  %v10648_v36 = vld [vmem:[%s10578_s25 + $0x10] sm:$0xf] }
  0x1a   : > { %13312 = vst [vmem:[#allocation10_spill] sm:$0xff] %v10631_v26  ;;  %v1008_v32 = vrot.slane %v10622_v23, 6  ;;  %v1011_v33 = vrot.slane %v10628_v25, 5  ;;  %v1012_v34 = vrot.slane %v10625_v24, 6  ;;  %13316 = vst [vmem:[#allocation12_spill] sm:$0xff] %v10648_v36  ;;  %v1019_v39 = vrot.slane %v10634_v29, 6 }
  0x1b   : > { %v226_v37 = vrot.slane %v225_v27, 4  ;;  %v236_v38 = vrot.slane %v235_v28, 4  ;;  %v10652_v40 = vshrl.u32 %v10631_v26, 16  ;;  %v1018_v43 = vrot.slane %v13046_v35, 5  ;;  %v10657_v44 = vld [vmem:[%s10578_s25 + $0x14] sm:$0x7] }
  0x1c   : > { %v1009_v41 = vor.u32 %v1008_v32, %v1007_v30  ;;  %v1013_v42 = vor.u32 %v1012_v34, %v1011_v33  ;;  %13318 = vst [vmem:[#allocation14_spill] sm:$0xff] %v10657_v44  ;;  %v10660_v45 = vshll.u32 %v10631_v26, 16  ;;  %v10674_v50 = vshll.u32 %v10648_v36, 16  ;;  %v10709_v19 = vld [vmem:[%s10578_s25 + $0x30] sm:$0xf] }
  0x1d   : > { %13317 = vst [vmem:[#allocation13_spill] sm:$0xff] %v10652_v40  ;;  %v231_v46 = vsel %vm10639_vm6, %v226_v37, %v230_v20  ;;  %v241_v47 = vsel %vm10639_vm6, %v236_v38, %v240_v22  ;;  %v245_v49 = vrot.slane %v10652_v40, 4  ;;  %v1020_v54 = vor.u32 %v1019_v39, %v1018_v43  ;;  %13327 = vst [vmem:[#allocation21_spill] sm:$0xff] %v10709_v19  ;;  %v10718_v22 = vld [vmem:[%s10578_s25 + $0x34] sm:$0xf] }
  0x1e   : > { %13319 = vst [vmem:[#allocation15_spill] sm:$0xff] %v10660_v45  ;;  %13323 = vst [vmem:[#allocation17_spill] sm:$0xff] %v10674_v50  ;;  %v7738_v51 = vcombine.low %v231_v46, %v241_v47  ;;  %v1010_v52 = vrot.slane %v1009_v41, 4  ;;  %v1015_v53 = vrot.slane %v1013_v42, 4  ;;  %v248_v56 = vrot.slane %v10660_v45, 5 }
  0x1f   : > { %v254_v57 = vrot.slane %v10674_v50, 5  ;;  %v10684_v58 = vshrl.u32 %v10648_v36, 16  ;;  %v10687_v59 = vshll.u32 %v10657_v44, 16  ;;  %v10713_v20 = vsel %vm461_vm0, %v10679_v55, 0  ;;  %13328 = vst [vmem:[#allocation22_spill] sm:$0xff] %v10718_v22 }
  0x20   : > { %8764 = vmatprep.mubr.msk.bf16.mxu1 %vm436_vm5, %v7738_v51  ;;  %v1014_v61 = vsel %vm10668_vm7, %v1010_v52, %v1013_v42  ;;  %v1021_v62 = vsel %vm10668_vm7, %v1015_v53, %v1020_v54  ;;  %v249_v2 = vor.u32 %v248_v56, %v245_v49  ;;  %v10724_v27 = vsel %vm461_vm0, %v10692_v60, 0  ;;  %v10731_v34 = vld [vmem:[%s10578_s25 + $0x38] sm:$0x7]  ;;  %v10772_v37 = vld [vmem:[%s10578_s25 + $0x20] sm:$0x7] }
  0x21   : > { %13324 = vst [vmem:[#allocation18_spill] sm:$0xff] %v10684_v58  ;;  %13325 = vst [vmem:[#allocation19_spill] sm:$0xff] %v10687_v59  ;;  %v10705_v1 = vcombine.low %v1014_v61, %v1021_v62  ;;  %v258_v18 = vrot.slane %v10684_v58, 4  ;;  %v264_v32 = vrot.slane %v10687_v59, 5  ;;  %v10736_v39 = vshrl.u32 %v10709_v19, 16 }
  0x22   : > { %v250_v28 = vrot.slane %v249_v2, 4  ;;  %13329 = vst [vmem:[#allocation23_spill] sm:$0xff] %v10731_v34  ;;  %v10739_v41 = vshll.u32 %v10709_v19, 16  ;;  %v10742_v42 = vld [vmem:[%s10578_s25 + $0x18] sm:$0xf]  ;;  %v10747_v47 = vshll.u32 %v10718_v22, 16 }
  0x23   : > { %13326 = vst [vmem:[#allocation20_spill] sm:$0xff] %v10705_v1  ;;  %9196 = vmatprep.mubr.msk.bf16.mxu0 %vm436_vm5, %v10705_v1  ;;  %v259_v30 = vor.u32 %v258_v18, %v254_v57  ;;  %v10750_v49 = vshrl.u32 %v10718_v22, 16  ;;  %v10753_v51 = vshll.u32 %v10731_v34, 16  ;;  %v1022_v52 = vrot.slane %v10736_v39, 5  ;;  %v10763_v62 = vld [vmem:[%s10578_s25 + $0x1c] sm:$0xf] }
  0x24   : > { %v255_v43 = vsel %vm10639_vm6, %v250_v28, %v254_v57  ;;  %v1023_v53 = vrot.slane %v10739_v41, 6  ;;  %v1031_v54 = vshrl.u32 %v10731_v34, 16  ;;  %v1027_v61 = vrot.slane %v10747_v47, 6  ;;  %13332 = vst [vmem:[#allocation26_spill] sm:$0xff] %v10772_v37  ;;  %v10792_v35 = vld [vmem:[%s10578_s25 + $0x40] sm:$0xf] }
  0x25   : > { %v260_v46 = vrot.slane %v259_v30, 4  ;;  %v1026_v57 = vrot.slane %v10750_v49, 5  ;;  %v10766_v2 = vshrl.u32 %v10742_v42, 16  ;;  %v1034_v38 = vrot.slane %v10753_v51, 6  ;;  %v10799_v5 = vld [vmem:[%s10578_s25 + $0x44] sm:$0x7] }
  0x26   : > { %v1024_v28 = vor.u32 %v1023_v53, %v1022_v52  ;;  %v1033_v30 = vrot.slane %v1031_v54, 5  ;;  %v10777_v33 = vrot.slane %v1031_v54, 6  ;;  %v10781_v21 = vshll.u32 %v10742_v42, 16  ;;  %v10854_v40 = vld [vmem:[%s10578_s25 + $0x4c] sm:$0xf] }
  0x27   : > { %v265_v56 = vsel %vm10639_vm6, %v260_v46, %v264_v32  ;;  %13330 = vst [vmem:[#allocation24_spill] sm:$0xff] %v10766_v2  ;;  %v10775_v32 = vld [vmem:[%s10578_s25 + $0x3c] sm:$0xf]  ;;  %v1028_v46 = vor.u32 %v1027_v61, %v1026_v57  ;;  %v269_v4 = vrot.slane %v10766_v2, 4  ;;  %v10786_v53 = vshll.u32 %v10763_v62, 16 }
  0x28   : > { %v10768_v18 = vcombine.low %v255_v43, %v265_v56  ;;  %13333 = vst [vmem:[#allocation27_spill] sm:$0xff] %v10777_v33  ;;  %13334 = vst [vmem:[#allocation28_spill] sm:$0xff] %v10781_v21  ;;  %v1025_v43 = vrot.slane %v1024_v28, 4  ;;  %v1035_v52 = vor.u32 %v1034_v38, %v1033_v30  ;;  %v10789_v56 = vshrl.u32 %v10763_v62, 16  ;;  %v10857_v14 = vld [vmem:[%s10578_s25 + $0x50] sm:$0x7] }
  0x29   : > { %13335 = vst [vmem:[#allocation29_spill] sm:$0xff] %v10786_v53  ;;  %v1030_v54 = vrot.slane %v1028_v46, 4  ;;  %v272_v57 = vrot.slane %v10781_v21, 5  ;;  %v10796_v61 = vshll.u32 %v10772_v37, 16  ;;  %v10802_v28 = vshrl.u32 %v10775_v32, 16 }
  0x2a   : > { %13331 = vst [vmem:[#allocation25_spill] sm:$0xff] %v10768_v18  ;;  %8765 = vmatmul.mubr.msk.bf16.vlgmr.msra.gmra.mrb[0].mxu1 %vm436_vm5, %v10768_v18  ;;  %13336 = vst [vmem:[#allocation30_spill] sm:$0xff] %v10789_v56  ;;  %v1029_v38 = vsel %vm10668_vm7, %v1025_v43, %v1028_v46  ;;  %v278_v30 = vrot.slane %v10786_v53, 5  ;;  %v282_v3 = vrot.slane %v10789_v56, 4  ;;  %v10817_v2 = vshll.u32 %v10792_v35, 16 }
  0x2b   : > { %8781 = vmatpush3.bf16.msra.mxu1 %v627_v63  ;;  %13337 = vst [vmem:[#allocation31_spill] sm:$0xff] %v10796_v61  ;;  %v10809_v63 = vshll.u32 %v10775_v32, 16  ;;  %v1036_v18 = vsel %vm10668_vm7, %v1030_v54, %v1035_v52  ;;  %v273_v1 = vor.u32 %v272_v57, %v269_v4  ;;  %v288_v21 = vrot.slane %v10796_v61, 5 }
  0x2c   : > { %10416 = vmatprep.subr.msk.bf16.mxu1 %vm461_vm0, %v10692_v60  ;;  %v10819_v46 = vcombine.low %v1029_v38, %v1036_v18  ;;  %v283_v43 = vor.u32 %v282_v3, %v278_v30  ;;  %v10822_v53 = vshrl.u32 %v10792_v35, 16  ;;  %v10825_v56 = vshll.u32 %v10799_v5, 16 }
  0x2d   : > { %v274_v60 = vrot.slane %v273_v1, 4  ;;  %v1037_v59 = vrot.slane %v10802_v28, 5  ;;  %v1038_v4 = vrot.slane %v10809_v63, 6  ;;  %v1042_v52 = vrot.slane %v10817_v2, 6 }
  0x2e   : > { %13338 = vst [vmem:[#allocation32_spill] sm:$0xff] %v10819_v46  ;;  %9197 = vmatmul.mubr.msk.bf16.vlgmr.msra.gmra.mrb[0].mxu0 %vm436_vm5, %v10819_v46  ;;  %v284_v18 = vrot.slane %v283_v43, 4  ;;  %v1041_v3 = vrot.slane %v10822_v53, 5  ;;  %v1049_v57 = vrot.slane %v10825_v56, 6  ;;  %v293_v61 = vrot.slane %v10614_v17, 4 }
  0x2f   : > { %9213 = vmatpush3.bf16.msra.mxu0 %v10703_v0  ;;  %v279_v1 = vsel %vm10639_vm6, %v274_v60, %v278_v30  ;;  %v1039_v38 = vor.u32 %v1038_v4, %v1037_v59  ;;  %v296_v50 = vrot.slane %v10622_v23, 5  ;;  %v10841_v46 = vld [vmem:[%s10578_s25 + $0x48] sm:$0xf]  ;;  %vm1249_vm8 = vcmask 1045508  }
  0x30   : > { %v289_v43 = vsel %vm10639_vm6, %v284_v18, %v288_v21  ;;  %v1043_v54 = vor.u32 %v1042_v52, %v1041_v3  ;;  %v13339_v58 = vshrl.u32 %v10799_v5, 16  ;;  %v302_v45 = vrot.slane %v10625_v24, 5  ;;  %10441 = vmatprep.subr.msk.bf16.mxu0 %vm461_vm0, %v10679_v55  ;;  %vm10908_vm9 = vmor %vm461_vm0, %vm1249_vm8 }
  0x31   : > { %v10850_v59 = vcombine.low %v279_v1, %v289_v43  ;;  %v1040_v30 = vrot.slane %v1039_v38, 4  ;;  %v297_v60 = vor.u32 %v296_v50, %v293_v61  ;;  %v306_v4 = vrot.slane %v10628_v25, 4 }
  0x32   : > { %v1048_v0 = vrot.slane %v13339_v58, 5  ;;  %v1045_v21 = vrot.slane %v1043_v54, 4  ;;  %v312_v18 = vrot.slane %v10634_v29, 5  ;;  %v10861_v58 = vshrl.u32 %v10841_v46, 16 }
  0x33   : > { %13340 = vst [vmem:[#allocation33_spill] sm:$0xff] %v10850_v59  ;;  %8768 = vmatprep.mubr.msk.bf16.mxu1 %vm436_vm5, %v10850_v59  ;;  %v1044_v55 = vsel %vm10668_vm7, %v1040_v30, %v1043_v54  ;;  %v298_v50 = vrot.slane %v297_v60, 4  ;;  %v307_v61 = vor.u32 %v306_v4, %v302_v45  ;;  %v10868_v3 = vshll.u32 %v10841_v46, 16 }
  0x34   : > { %v1050_v52 = vor.u32 %v1049_v57, %v1048_v0  ;;  %v10873_v57 = vshll.u32 %v10854_v40, 16  ;;  %v10876_v38 = vshrl.u32 %v10854_v40, 16  ;;  %v10879_v43 = vshll.u32 %v10857_v14, 16 }
  0x35   : > { %v303_v54 = vsel %vm10639_vm6, %v298_v50, %v302_v45  ;;  %v308_v30 = vrot.slane %v307_v61, 4  ;;  %v1052_v60 = vrot.slane %v10861_v58, 5  ;;  %v1053_v4 = vrot.slane %v10868_v3, 6 }
  0x36   : > { %v1051_v1 = vsel %vm10668_vm7, %v1045_v21, %v1050_v52  ;;  %13341 = vst [vmem:[#allocation34_spill] sm:$0xff] %v10879_v43  ;;  %v1056_v21 = vrot.slane %v10876_v38, 5  ;;  %v1057_v52 = vrot.slane %v10873_v57, 6  ;;  %v13090_v59 = vshrl.u32 %v10857_v14, 16 }
  0x37   : > { %v10881_v0 = vcombine.low %v1044_v55, %v1051_v1  ;;  %v313_v55 = vsel %vm10639_vm6, %v308_v30, %v312_v18  ;;  %v1064_v1 = vrot.slane %v10879_v43, 6  ;;  %v317_v45 = vrot.slane %v10736_v39, 4 }
  0x38   : > { %v320_v50 = vrot.slane %v10739_v41, 5  ;;  %v10897_v61 = vcombine.low %v303_v54, %v313_v55  ;;  %v1054_v11 = vor.u32 %v1053_v4, %v1052_v60  ;;  %v1058_v12 = vor.u32 %v1057_v52, %v1056_v21 }
  0x39   : > { %13342 = vst [vmem:[#allocation35_spill] sm:$0xff] %v10881_v0  ;;  %9200 = vmatprep.mubr.msk.bf16.mxu0 %vm436_vm5, %v10881_v0  ;;  %v1063_v10 = vrot.slane %v13090_v59, 5  ;;  %v326_v37 = vrot.slane %v10747_v47, 5  ;;  %v330_v0 = vrot.slane %v10750_v49, 4  ;;  %v336_v18 = vrot.slane %v10753_v51, 5 }
  0x3a   : > { %13343 = vst [vmem:[#allocation36_spill] sm:$0xff] %v10897_v61  ;;  %v321_v9 = vor.u32 %v320_v50, %v317_v45  ;;  %8769 = vmatmul.mubr.msk.bf16.gmra.mrb[4].mxu1 %vm436_vm5, %v10897_v61  ;;  %v1055_v30 = vrot.slane %v1054_v11, 4  ;;  %v1060_v44 = vrot.slane %v1058_v12, 4  ;;  %v13344_v54 = vmov 0 }
  0x3b   : > { %v1065_v8 = vor.u32 %v1064_v1, %v1063_v10  ;;  %v13345_v54 = vsel %vm10908_vm9, 4294967295, %v13344_v54  ;;  %v7815_v60 = vrot.slane %v10602_v13, 10  ;;  %v331_v21 = vor.u32 %v330_v0, %v326_v37 }
  0x3c   : > { %13346 = vst [vmem:[#allocation37_spill] sm:$0xff] %v13345_v54  ;;  %v322_v4 = vrot.slane %v321_v9, 4  ;;  %v1274_v52 = vrot.slane %v10608_v15, 6  ;;  %v1277_v55 = vrot.slane %v10611_v16, 6  ;;  %v1059_v45 = vsel %vm10668_vm7, %v1055_v30, %v1058_v12 }
  0x3d   : > { %v1066_v10 = vsel %vm10668_vm7, %v1060_v44, %v1065_v8  ;;  %v341_v11 = vrot.slane %v10802_v28, 4  ;;  %v344_v1 = vrot.slane %v10809_v63, 5  ;;  %v332_v0 = vrot.slane %v331_v21, 4 }
  0x3e   : > { %v10921_v50 = vcombine.low %v1059_v45, %v1066_v10  ;;  %v327_v9 = vsel %vm10639_vm6, %v322_v4, %v326_v37  ;;  %v1275_v59 = vsel %vm10908_vm9, %v7815_v60, %v1274_v52  ;;  %v1276_v61 = vrot.slane %v1274_v52, 4 }
  0x3f   : > { %v345_v33 = vor.u32 %v344_v1, %v341_v11  ;;  %v350_v12 = vrot.slane %v10817_v2, 5  ;;  %v354_v30 = vrot.slane %v10822_v53, 4  ;;  %v337_v8 = vsel %vm10639_vm6, %v332_v0, %v336_v18 }
  0x40   : > { %13347 = vst [vmem:[#allocation38_spill] sm:$0xff] %v10921_v50  ;;  %9201 = vmatmul.mubr.msk.bf16.gmra.mrb[4].mxu0 %vm436_vm5, %v10921_v50  ;;  %v360_v44 = vrot.slane %v10825_v56, 5  ;;  %v7816_v37 = vrot.slane %v10709_v19, 10  ;;  %v1281_v4 = vrot.slane %v10718_v22, 6  ;;  %v10936_v60 = vcombine.low %v327_v9, %v337_v8  ;;  %v10976_v50 = vld [vmem:[%s13043_s1 + $0x36] sm:$0x3] }
  0x41   : > { %v1278_v21 = vsel %vm10908_vm9, %v1276_v61, %v1277_v55  ;;  %v346_v52 = vrot.slane %v345_v33, 4  ;;  %v355_v45 = vor.u32 %v354_v30, %v350_v12  ;;  %v1284_v1 = vrot.slane %v10731_v34, 6  ;;  %v10952_v55 = vld [vmem:[%s10578_s25 + $0x54] sm:$0xf]  ;;  %v10979_v34 = vld [vmem:[%s10578_s25 + $0x5c] sm:$0x7] }
  0x42   : > { %13348 = vst [vmem:[#allocation39_spill] sm:$0xff] %v10936_v60  ;;  %v10940_v10 = vcombine.low %v1275_v59, %v1278_v21  ;;  %v1282_v18 = vsel %vm10908_vm9, %v7816_v37, %v1281_v4  ;;  %v1283_v11 = vrot.slane %v1281_v4, 4  ;;  %8772 = vmatprep.mubr.msk.bf16.mxu1 %vm436_vm5, %v10936_v60  ;;  %v365_v61 = vrot.slane %v10861_v58, 4  ;;  %v10962_v37 = vld [vmem:[%s10578_s25 + $0x58] sm:$0xf]  ;;  %13352 = vst [vmem:[#allocation43_spill] sm:$0xff] %v10979_v34 }
  0x43   : > { %v351_v9 = vsel %vm10639_vm6, %v346_v52, %v350_v12  ;;  %v356_v0 = vrot.slane %v355_v45, 4  ;;  %v368_v33 = vrot.slane %v10868_v3, 5  ;;  %v374_v30 = vrot.slane %v10873_v57, 5 }
  0x44   : > { %13349 = vst [vmem:[#allocation40_spill] sm:$0xff] %v10940_v10  ;;  %9214 = vmatprep.mubr.msk.bf16.mxu0 %vm436_vm5, %v10940_v10  ;;  %v1285_v59 = vsel %vm10908_vm9, %v1283_v11, %v1284_v1  ;;  %v378_v8 = vrot.slane %v10876_v38, 4  ;;  %v384_v12 = vrot.slane %v10879_v43, 5  ;;  %v7817_v45 = vrot.slane %v10775_v32, 10 }
  0x45   : > { %v361_v4 = vsel %vm10639_vm6, %v356_v0, %v360_v44  ;;  %v10966_v21 = vcombine.low %v1282_v18, %v1285_v59  ;;  %v369_v52 = vor.u32 %v368_v33, %v365_v61  ;;  %v1288_v11 = vrot.slane %v10792_v35, 6 }
  0x46   : > { %v10969_v60 = vcombine.low %v351_v9, %v361_v4  ;;  %v379_v10 = vor.u32 %v378_v8, %v374_v30  ;;  %v1291_v1 = vrot.slane %v10799_v5, 6  ;;  %v10982_v44 = vshrl.u32 %v10952_v55, 16 }
  0x47   : > { %13350 = vst [vmem:[#allocation41_spill] sm:$0xff] %v10966_v21  ;;  %v370_v48 = vrot.slane %v369_v52, 4  ;;  %v10985_v18 = vshll.u32 %v10952_v55, 16  ;;  %v10988_v9 = vshll.u32 %v10962_v37, 16  ;;  %v1289_v61 = vsel %vm10908_vm9, %v7817_v45, %v1288_v11 }
  0x48   : > { %13351 = vst [vmem:[#allocation42_spill] sm:$0xff] %v10969_v60  ;;  %13353 = vst [vmem:[#allocation44_spill] sm:$0xff] %v10982_v44  ;;  %8773 = vmatmul.mubr.msk.bf16.gmra.mrb[8].mxu1 %vm436_vm5, %v10969_v60  ;;  %9215 = vmatmul.mubr.msk.bf16.vlgmr.msra.gmra.mrb[0].mxu0 %vm436_vm5, %v10966_v21  ;;  %v380_v0 = vrot.slane %v379_v10, 4  ;;  %v1290_v33 = vrot.slane %v1288_v11, 4  ;;  %v10997_v59 = vshrl.u32 %v10962_v37, 16  ;;  %v389_v4 = vrot.slane %v10982_v44, 4 }
  0x49   : > { %13354 = vst [vmem:[#allocation45_spill] sm:$0xff] %v10985_v18  ;;  %13355 = vst [vmem:[#allocation46_spill] sm:$0xff] %v10988_v9  ;;  %9231 = vmatpush3.bf16.msra.mxu0 %v10713_v20  ;;  %v375_v8 = vsel %vm10639_vm6, %v370_v48, %v374_v30  ;;  %v392_v52 = vrot.slane %v10985_v18, 5  ;;  %v398_v10 = vrot.slane %v10988_v9, 5  ;;  %v11011_v20 = vshll.u32 %v10979_v34, 16 }
  0x4a   : > { %13356 = vst [vmem:[#allocation47_spill] sm:$0xff] %v10997_v59  ;;  %v385_v45 = vsel %vm10639_vm6, %v380_v0, %v384_v12  ;;  %v1292_v11 = vsel %vm10908_vm9, %v1290_v33, %v1291_v1  ;;  %v402_v60 = vrot.slane %v10997_v59, 4  ;;  %10442 = vmatprep.subr.msk.bf16.mxu0 %vm461_vm0, %v10976_v50  ;;  %v7818_v9 = vrot.slane %v10841_v46, 10  ;;  %v11021_v12 = vld [vmem:[%s10578_s25 + $0x60] sm:$0xf] }
  0x4b   : > { %13357 = vst [vmem:[#allocation48_spill] sm:$0xff] %v11011_v20  ;;  %v11015_v48 = vcombine.low %v375_v8, %v385_v45  ;;  %v11017_v30 = vcombine.low %v1289_v61, %v1292_v11  ;;  %v393_v21 = vor.u32 %v392_v52, %v389_v4  ;;  %13360 = vst [vmem:[#allocation51_spill] sm:$0xff] %v11021_v12  ;;  %v408_v1 = vrot.slane %v11011_v20, 5  ;;  %v11027_v18 = vld [vmem:[%s10578_s25 + $0x64] sm:$0xf] }
  0x4c   : > { %v403_v0 = vor.u32 %v402_v60, %v398_v10  ;;  %v1295_v33 = vrot.slane %v10854_v40, 6  ;;  %v1298_v59 = vrot.slane %v10857_v14, 6  ;;  %v7819_v8 = vrot.slane %v10952_v55, 10  ;;  %v11037_v52 = vld [vmem:[%s10578_s25 + $0x68] sm:$0x7] }
  0x4d   : > { %13358 = vst [vmem:[#allocation49_spill] sm:$0xff] %v11015_v48  ;;  %13359 = vst [vmem:[#allocation50_spill] sm:$0xff] %v11017_v30  ;;  %8776 = vmatprep.mubr.msk.bf16.mxu1 %vm436_vm5, %v11015_v48  ;;  %9218 = vmatprep.mubr.msk.bf16.mxu0 %vm436_vm5, %v11017_v30  ;;  %v394_v61 = vrot.slane %v393_v21, 4  ;;  %v1302_v60 = vrot.slane %v10962_v37, 6  ;;  %v1305_v4 = vrot.slane %v10979_v34, 6  ;;  %v11043_v30 = vcombine.low %v10631_v26, %v10648_v36 }
  0x4e   : > { %13361 = vst [vmem:[#allocation52_spill] sm:$0xff] %v11037_v52  ;;  %v404_v45 = vrot.slane %v403_v0, 4  ;;  %v1296_v11 = vsel %vm10908_vm9, %v7818_v9, %v1295_v33  ;;  %v1297_v48 = vrot.slane %v1295_v33, 4  ;;  %vm1473_vm10 = vsmask.f32 1280 }
  0x4f   : > { %13362 = vst [vmem:[#allocation53_spill] sm:$0xff] %v11043_v30  ;;  %vm1474_vm11 = vsmask.f32 5392  ;;  %v399_v21 = vsel %vm10639_vm6, %v394_v61, %v398_v10  ;;  %v1303_v20 = vsel %vm10908_vm9, %v7819_v8, %v1302_v60  ;;  %v1304_v0 = vrot.slane %v1302_v60, 4  ;;  %v11051_v9 = vld [vmem:[%s10578_s25 + $0x6c] sm:$0xf] }
  0x50   : > { %v7920_v44 = vrot.slane %v11021_v12, 10  ;;  %v11054_v33 = vld [vmem:[%s10578_s25 + $0x70] sm:$0xf]  ;;  %v409_v36 = vsel %vm10639_vm6, %v404_v45, %v408_v1  ;;  %v1299_v26 = vsel %vm10908_vm9, %v1297_v48, %v1298_v59  ;;  %v2518_v10 = vrot.slane %v11027_v18, 6  ;;  %v11063_v34 = vld [vmem:[%s10578_s25 + $0x74] sm:$0x7]  ;;  %vm11141_vm14 = vmor %vm1473_vm10, %vm1474_vm11 }
  0x51   : > { %v2521_v61 = vrot.slane %v11037_v52, 6  ;;  %13363 = vst [vmem:[#allocation54_spill] sm:$0xff] %v11063_v34  ;;  %v11066_v8 = vld [vmem:[%s10578_s25 + $0x78] sm:$0xf]  ;;  %v11068_v60 = vcombine.low %v399_v21, %v409_v36  ;;  %v11070_v12 = vcombine.low %v1296_v11, %v1299_v26  ;;  %v1306_v43 = vsel %vm10908_vm9, %v1304_v0, %v1305_v4  ;;  %v11079_v59 = vld [vmem:[%s10578_s25 + $0x7c] sm:$0xf] }
  0x52   : > { %13364 = vst [vmem:[#allocation55_spill] sm:$0xff] %v11066_v8  ;;  %v11076_v1 = vcombine.low %v10742_v42, %v10763_v62  ;;  %v11082_v48 = vld [vmem:[%s10578_s25 + $0x80] sm:$0x7]  ;;  %v11084_v45 = vcombine.low %v1303_v20, %v1306_v43  ;;  %v2519_v31 = vsel %vm10908_vm9, %v7920_v44, %v2518_v10  ;;  %v2520_v36 = vrot.slane %v2518_v10, 4 }
  0x53   : > { %13365 = vst [vmem:[#allocation56_spill] sm:$0xff] %v11068_v60  ;;  %13366 = vst [vmem:[#allocation57_spill] sm:$0xff] %v11070_v12  ;;  %v7993_v26 = vrot.slane %v11051_v9, 10  ;;  %8777 = vmatmul.mubr.msk.bf16.gmra.mrb[12].mxu1 %vm436_vm5, %v11068_v60  ;;  %9219 = vmatmul.mubr.msk.bf16.gmra.mrb[4].mxu0 %vm436_vm5, %v11070_v12  ;;  %v3462_v4 = vrot.slane %v11054_v33, 6  ;;  %v3465_v11 = vrot.slane %v11063_v34, 6  ;;  %v11097_v43 = vcombine.low %v10602_v13, %v10608_v15 }
  0x54   : > { %13367 = vst [vmem:[#allocation58_spill] sm:$0xff] %v11076_v1  ;;  %13368 = vst [vmem:[#allocation59_spill] sm:$0xff] %v11082_v48  ;;  %v8066_v20 = vrot.slane %v11066_v8, 10  ;;  %v13371_v44 = vcombine.low %v10581_v6, %v10584_v7  ;;  %9222 = vmatprep.mubr.msk.bf16.mxu0 %vm436_vm5, %v11084_v45  ;;  %v2522_v21 = vsel %vm10908_vm9, %v2520_v36, %v2521_v61  ;;  %v4406_v0 = vrot.slane %v11079_v59, 6 }
  0x55   : > { %13369 = vst [vmem:[#allocation60_spill] sm:$0xff] %v11084_v45  ;;  %13370 = vst [vmem:[#allocation61_spill] sm:$0xff] %v11097_v43  ;;  %v4409_v10 = vrot.slane %v11082_v48, 6  ;;  %v11112_v60 = vcombine.low %v10709_v19, %v10718_v22  ;;  %v11114_v12 = vcombine.low %v2519_v31, %v2522_v21  ;;  %v3463_v8 = vsel %vm10908_vm9, %v7993_v26, %v3462_v4 }
  0x56   : > { %8782 = vmatprep.mubr.msk.bf16.mxu1 %vm436_vm5, %v13371_v44  ;;  %v3464_v44 = vrot.slane %v3462_v4, 4  ;;  %v1515_v15 = vrot.slane %v10614_v17, 6  ;;  %v4407_v45 = vsel %vm10908_vm9, %v8066_v20, %v4406_v0  ;;  %v4408_v61 = vrot.slane %v4406_v0, 4 }
  0x57   : > { %13372 = vst [vmem:[#allocation62_spill] sm:$0xff] %v11112_v60  ;;  %13373 = vst [vmem:[#allocation63_spill] sm:$0xff] %v11114_v12  ;;  %v1516_v36 = vrot.slane %v10622_v23, 7  ;;  %v1519_v48 = vrot.slane %v10628_v25, 6  ;;  %v1520_v31 = vrot.slane %v10625_v24, 7  ;;  %v13374_v21 = vshrl.u32 %v10611_v16, 16 }
  0x58   : > { %v3466_v22 = vsel %vm10908_vm9, %v3464_v44, %v3465_v11  ;;  %v1525_v26 = vrot.slane %v10634_v29, 7  ;;  %v4410_v17 = vsel %vm10908_vm9, %v4408_v61, %v4409_v10  ;;  %v11135_v23 = vcombine.low %v10775_v32, %v10792_v35  ;;  %v13382_v61 = vld [vmem:[#allocation27_spill] sm:$0xff] }
  0x59   : > { %v1524_v19 = vrot.slane %v13374_v21, 6  ;;  %v11129_v4 = vcombine.low %v3463_v8, %v3466_v22  ;;  %v1517_v20 = vor.u32 %v1516_v36, %v1515_v15  ;;  %vm734_vm12 = vcmask 1042432  }
  0x5a   : > { %13376 = vst [vmem:[#allocation65_spill] sm:$0xff] %v11135_v23  ;;  %vm735_vm13 = vcmask 1046532   ;;  %v11137_v25 = vcombine.low %v4407_v45, %v4410_v17  ;;  %v13378_v24 = vmov 0  ;;  %v1521_v29 = vor.u32 %v1520_v31, %v1519_v48  ;;  %v11152_v45 = vld [vmem:[%s13043_s1 + $0x6] sm:$0x3] }
  0x5b   : > { %13375 = vst [vmem:[#allocation64_spill] sm:$0xff] %v11129_v4  ;;  %v13379_v24 = vsel %vm11141_vm14, 4294967295, %v13378_v24  ;;  %v1526_v22 = vor.u32 %v1525_v26, %v1524_v19  ;;  %v1528_v8 = vrot.slane %v10736_v39, 6  ;;  %v1518_v11 = vrot.slane %v1517_v20, 4  ;;  %8783 = vmatmul.mubr.msk.bf16.vlgmr.msra.gmra.mrb[0].mxu1 %vm436_vm5, %v11043_v30  ;;  %9223 = vmatmul.mubr.msk.bf16.gmra.mrb[8].mxu0 %vm436_vm5, %v11114_v12  ;;  %vm11213_vm15 = vmor %vm734_vm12, %vm735_vm13 }
  0x5c   : > { %13377 = vst [vmem:[#allocation66_spill] sm:$0xff] %v11137_v25  ;;  %13380 = vst [vmem:[#allocation67_spill] sm:$0xff] %v13379_v24  ;;  %v1529_v15 = vrot.slane %v10739_v41, 7  ;;  %v1532_v0 = vrot.slane %v10750_v49, 6  ;;  %v1533_v10 = vrot.slane %v10747_v47, 7  ;;  %v1523_v19 = vrot.slane %v1521_v29, 4  ;;  %8799 = vmatpush3.bf16.msra.mxu1 %v10724_v27  ;;  %8786 = vmatprep.mubr.msk.bf16.mxu1 %vm436_vm5, %v11076_v1 }
  0x5d   : > { %v1538_v39 = vrot.slane %v10753_v51, 7  ;;  %v11161_v41 = vsel %vm461_vm0, %v10976_v50, 0  ;;  %v11165_v47 = vcombine.low %v10841_v46, %v10854_v40  ;;  %v1522_v49 = vsel %vm11141_vm14, %v1518_v11, %v1521_v29  ;;  %9226 = vmatprep.mubr.msk.bf16.mxu0 %vm436_vm5, %v11129_v4  ;;  %10417 = vmatprep.subr.msk.bf16.mxu1 %vm461_vm0, %v11152_v45 }
  0x5e   : > { %v1530_v48 = vor.u32 %v1529_v15, %v1528_v8  ;;  %v1534_v44 = vor.u32 %v1533_v10, %v1532_v0  ;;  %v1541_v51 = vrot.slane %v10802_v28, 6  ;;  %v1527_v50 = vsel %vm11141_vm14, %v1523_v19, %v1526_v22 }
  0x5f   : > { %13381 = vst [vmem:[#allocation68_spill] sm:$0xff] %v11165_v47  ;;  %v1539_v36 = vor.u32 %v1538_v39, %v13382_v61  ;;  %v1542_v27 = vrot.slane %v10809_v63, 7  ;;  %v1545_v31 = vrot.slane %v10822_v53, 6  ;;  %v11182_v21 = vcombine.low %v1522_v49, %v1527_v50  ;;  %v13388_v61 = vld [vmem:[#allocation34_spill] sm:$0xff] }
  0x60   : > { %v1531_v26 = vrot.slane %v1530_v48, 4  ;;  %v1536_v17 = vrot.slane %v1534_v44, 4  ;;  %v1546_v28 = vrot.slane %v10817_v2, 7  ;;  %v13384_v29 = vshrl.u32 %v10799_v5, 16 }
  0x61   : > { %13383 = vst [vmem:[#allocation27_spill] sm:$0xff] %v11182_v21  ;;  %v1543_v20 = vor.u32 %v1542_v27, %v1541_v51  ;;  %v1551_v22 = vrot.slane %v10825_v56, 7  ;;  %v11190_v63 = vcombine.low %v10952_v55, %v10962_v37  ;;  %v1554_v0 = vrot.slane %v10861_v58, 6 }
  0x62   : > { %v1550_v8 = vrot.slane %v13384_v29, 6  ;;  %v1535_v53 = vsel %vm11141_vm14, %v1531_v26, %v1534_v44  ;;  %v1540_v11 = vsel %vm11141_vm14, %v1536_v17, %v1539_v36  ;;  %v1547_v15 = vor.u32 %v1546_v28, %v1545_v31  ;;  %v13392_v26 = vld [vmem:[#allocation3_spill] sm:$0xff] }
  0x63   : > { %13385 = vst [vmem:[#allocation69_spill] sm:$0xff] %v11190_v63  ;;  %v11197_v2 = vcombine.low %v1535_v53, %v1540_v11  ;;  %v1544_v10 = vrot.slane %v1543_v20, 4  ;;  %v1555_v39 = vrot.slane %v10868_v3, 7  ;;  %v1558_v49 = vrot.slane %v10876_v38, 6  ;;  %8787 = vmatmul.mubr.msk.bf16.gmra.mrb[4].mxu1 %vm436_vm5, %v11097_v43  ;;  %9227 = vmatmul.mubr.msk.bf16.gmra.mrb[12].mxu0 %vm436_vm5, %v11137_v25  ;;  %v13402_v25 = vld [vmem:[#allocation12_spill] sm:$0xff] }
  0x64   : > { %v1552_v19 = vor.u32 %v1551_v22, %v1550_v8  ;;  %v1549_v56 = vrot.slane %v1547_v15, 4  ;;  %v1559_v48 = vrot.slane %v10873_v57, 7  ;;  %v13387_v51 = vshrl.u32 %v10857_v14, 16  ;;  %8790 = vmatprep.mubr.msk.bf16.mxu1 %vm436_vm5, %v11112_v60  ;;  %9232 = vmatprep.mubr.msk.bf16.mxu0 %vm436_vm5, %v11182_v21  ;;  %v13394_v8 = vld [vmem:[#allocation43_spill] sm:$0xff] }
  0x65   : > { %13386 = vst [vmem:[#allocation70_spill] sm:$0xff] %v11197_v2  ;;  %v1548_v58 = vsel %vm11141_vm14, %v1544_v10, %v1547_v15  ;;  %v1556_v50 = vor.u32 %v1555_v39, %v1554_v0  ;;  %v1564_v3 = vrot.slane %v13388_v61, 7  ;;  %v13389_v38 = vmov 0  ;;  %v13395_v15 = vld [vmem:[#allocation44_spill] sm:$0xff]  ;;  %v13397_v39 = vld [vmem:[#allocation47_spill] sm:$0xff] }
  0x66   : > { %v1563_v44 = vrot.slane %v13387_v51, 6  ;;  %v13390_v38 = vsel %vm11213_vm15, 4294967295, %v13389_v38  ;;  %v7770_v57 = vrot.slane %v10581_v6, 9  ;;  %v1553_v36 = vsel %vm11141_vm14, %v1549_v56, %v1552_v19  ;;  %v13428_v21 = vld [vmem:[#allocation23_spill] sm:$0xff] }
  0x67   : > { %13391 = vst [vmem:[#allocation34_spill] sm:$0xff] %v13390_v38  ;;  %v1560_v27 = vor.u32 %v1559_v48, %v1558_v49  ;;  %v739_v31 = vrot.slane %v10584_v7, 5  ;;  %v742_v17 = vrot.slane %v13392_v26, 5  ;;  %v11226_v28 = vcombine.low %v1548_v58, %v1553_v36  ;;  %v13396_v7 = vld [vmem:[#allocation45_spill] sm:$0xff]  ;;  %v13398_v49 = vld [vmem:[#allocation46_spill] sm:$0xff] }
  0x68   : > { %v1557_v20 = vrot.slane %v1556_v50, 4  ;;  %v1565_v29 = vor.u32 %v1564_v3, %v1563_v44  ;;  %v13149_v6 = vshrl.u32 %v13394_v8, 16  ;;  %v1567_v0 = vrot.slane %v13395_v15, 6  ;;  %v13399_v50 = vld [vmem:[#allocation48_spill] sm:$0xff]  ;;  %v13401_v26 = vld [vmem:[#allocation10_spill] sm:$0xff] }
  0x69   : > { %13393 = vst [vmem:[#allocation3_spill] sm:$0xff] %v11226_v28  ;;  %v1562_v22 = vrot.slane %v1560_v27, 4  ;;  %v11231_v53 = vsel %vm11213_vm15, %v7770_v57, %v739_v31  ;;  %v741_v11 = vrot.slane %v739_v31, 4  ;;  %v1568_v19 = vrot.slane %v13396_v7, 7 }
  0x6a   : > { %v1561_v10 = vsel %vm11141_vm14, %v1557_v20, %v1560_v27  ;;  %v1571_v56 = vrot.slane %v13397_v39, 6  ;;  %v1572_v48 = vrot.slane %v13398_v49, 7  ;;  %v1576_v58 = vrot.slane %v13149_v6, 6  ;;  %v13408_v6 = vld [vmem:[#allocation26_spill] sm:$0xff] }
  0x6b   : > { %v1566_v51 = vsel %vm11141_vm14, %v1562_v22, %v1565_v29  ;;  %v743_v44 = vsel %vm11213_vm15, %v741_v11, %v742_v17  ;;  %v1577_v61 = vrot.slane %v13399_v50, 7  ;;  %v1569_v36 = vor.u32 %v1568_v19, %v1567_v0  ;;  %v13403_v29 = vld [vmem:[#allocation14_spill] sm:$0xff]  ;;  %v11255_v17 = vld [vmem:[%s13043_s1 + $0x38] sm:$0x3]  ;;  %8791 = vmatmul.mubr.msk.bf16.gmra.mrb[8].mxu1 %vm436_vm5, %v11135_v23  ;;  %9233 = vmatmul.mubr.msk.bf16.vlgmr.msra.gmra.mrb[0].mxu0 %vm436_vm5, %v11197_v2 }
  0x6c   : > { %v11246_v3 = vcombine.low %v1561_v10, %v1566_v51  ;;  %v7779_v57 = vcombine.low %v11231_v53, %v743_v44  ;;  %v1573_v27 = vor.u32 %v1572_v48, %v1571_v56  ;;  %v7771_v20 = vrot.slane %v13401_v26, 9  ;;  %9249 = vmatpush3.bf16.msra.mxu0 %v11161_v41  ;;  %8794 = vmatprep.mubr.msk.bf16.mxu1 %vm436_vm5, %v11165_v47 }
  0x6d   : > { %v1578_v31 = vor.u32 %v1577_v61, %v1576_v58  ;;  %v746_v4 = vrot.slane %v13402_v25, 5  ;;  %v749_v22 = vrot.slane %v13403_v29, 5  ;;  %v1570_v53 = vrot.slane %v1569_v36, 4  ;;  %v13404_v25 = vld [vmem:[#allocation51_spill] sm:$0xff]  ;;  %9236 = vmatprep.mubr.msk.bf16.mxu0 %vm436_vm5, %v11226_v28  ;;  %10443 = vmatprep.subr.msk.bf16.mxu0 %vm461_vm0, %v11255_v17 }
  0x6e   : > { %13400 = vst [vmem:[#allocation43_spill] sm:$0xff] %v11246_v3  ;;  %v1575_v11 = vrot.slane %v1573_v27, 4  ;;  %v11263_v0 = vsel %vm461_vm0, %v11152_v45, 0  ;;  %v11266_v10 = vshrl.u32 %v13404_v25, 16  ;;  %v11274_v48 = vshll.u32 %v13404_v25, 16 }
  0x6f   : > { %v747_v19 = vsel %vm11213_vm15, %v7771_v20, %v746_v4  ;;  %v748_v56 = vrot.slane %v746_v4, 4  ;;  %v11277_v51 = vshll.u32 %v11027_v18, 16  ;;  %v1574_v45 = vsel %vm11141_vm14, %v1570_v53, %v1573_v27 }
  0x70   : > { %v1579_v41 = vsel %vm11141_vm14, %v1575_v11, %v1578_v31  ;;  %v11286_v44 = vshrl.u32 %v11027_v18, 16  ;;  %v11289_v4 = vshll.u32 %v11037_v52, 16  ;;  %v13156_v36 = vshrl.u32 %v11037_v52, 16 }
  0x71   : > { %v11293_v58 = vcombine.low %v1574_v45, %v1579_v41  ;;  %v750_v61 = vsel %vm11213_vm15, %v748_v56, %v749_v22  ;;  %v2647_v27 = vrot.slane %v11266_v10, 6  ;;  %v2648_v31 = vrot.slane %v11274_v48, 7 }
  0x72   : > { %13405 = vst [vmem:[#allocation44_spill] sm:$0xff] %v11289_v4  ;;  %v11299_v26 = vcombine.low %v747_v19, %v750_v61  ;;  %v2651_v20 = vrot.slane %v11286_v44, 6  ;;  %v2652_v29 = vrot.slane %v11277_v51, 7  ;;  %v2656_v53 = vrot.slane %v13156_v36, 6 }
  0x73   : > { %13406 = vst [vmem:[#allocation45_spill] sm:$0xff] %v11293_v58  ;;  %v2657_v11 = vrot.slane %v11289_v4, 7  ;;  %v7772_v45 = vrot.slane %v10742_v42, 9  ;;  %v753_v22 = vrot.slane %v10763_v62, 5  ;;  %v2649_v56 = vor.u32 %v2648_v31, %v2647_v27  ;;  %8795 = vmatmul.mubr.msk.bf16.gmra.mrb[12].mxu1 %vm436_vm5, %v11190_v63  ;;  %9237 = vmatmul.mubr.msk.bf16.gmra.mrb[4].mxu0 %vm436_vm5, %v11246_v3 }
  0x74   : > { %13407 = vst [vmem:[#allocation47_spill] sm:$0xff] %v11299_v26  ;;  %v2653_v41 = vor.u32 %v2652_v29, %v2651_v20  ;;  %v756_v19 = vrot.slane %v13408_v6, 5  ;;  %v11311_v61 = vshrl.u32 %v11051_v9, 16  ;;  %v11316_v36 = vshll.u32 %v11051_v9, 16  ;;  %8800 = vmatprep.mubr.msk.bf16.mxu1 %vm436_vm5, %v7779_v57  ;;  %9240 = vmatprep.mubr.msk.bf16.mxu0 %vm436_vm5, %v11293_v58 }
  0x75   : > { %v2658_v12 = vor.u32 %v2657_v11, %v2656_v53  ;;  %v754_v43 = vsel %vm11213_vm15, %v7772_v45, %v753_v22  ;;  %v755_v1 = vrot.slane %v753_v22, 4  ;;  %v2650_v42 = vrot.slane %v2649_v56, 4 }
  0x76   : > { %13409 = vst [vmem:[#allocation46_spill] sm:$0xff] %v11311_v61  ;;  %13410 = vst [vmem:[#allocation48_spill] sm:$0xff] %v11316_v36  ;;  %v2655_v62 = vrot.slane %v2653_v41, 4  ;;  %v11323_v6 = vshll.u32 %v11054_v33, 16  ;;  %v11326_v27 = vshrl.u32 %v11054_v33, 16  ;;  %v11334_v20 = vshll.u32 %v11063_v34, 16 }
  0x77   : > { %v757_v31 = vsel %vm11213_vm15, %v755_v1, %v756_v19  ;;  %v13166_v29 = vshrl.u32 %v11063_v34, 16  ;;  %v3591_v53 = vrot.slane %v11311_v61, 6  ;;  %v2654_v11 = vsel %vm11141_vm14, %v2650_v42, %v2653_v41  ;;  %v13416_v42 = vld [vmem:[#allocation9_spill] sm:$0xff] }
  0x78   : > { %13411 = vst [vmem:[#allocation10_spill] sm:$0xff] %v11323_v6  ;;  %13412 = vst [vmem:[#allocation12_spill] sm:$0xff] %v11326_v27  ;;  %v2659_v45 = vsel %vm11141_vm14, %v2655_v62, %v2658_v12  ;;  %v11342_v57 = vcombine.low %v754_v43, %v757_v31  ;;  %v3592_v22 = vrot.slane %v11316_v36, 7  ;;  %v3595_v1 = vrot.slane %v11326_v27, 6  ;;  %v13417_v31 = vld [vmem:[#allocation55_spill] sm:$0xff] }
  0x79   : > { %13413 = vst [vmem:[#allocation14_spill] sm:$0xff] %v11334_v20  ;;  %v11345_v56 = vcombine.low %v2654_v11, %v2659_v45  ;;  %v3596_v19 = vrot.slane %v11323_v6, 7  ;;  %v3600_v30 = vrot.slane %v13166_v29, 6  ;;  %v3601_v3 = vrot.slane %v11334_v20, 7  ;;  %v10489_v27 = vld [vmem:[%s10578_s25 + $0x2c] sm:$0x7] }
  0x7a   : > { %13414 = vst [vmem:[#allocation51_spill] sm:$0xff] %v11342_v57  ;;  %v3593_v58 = vor.u32 %v3592_v22, %v3591_v53  ;;  %v7773_v41 = vrot.slane %v10602_v13, 9  ;;  %v760_v12 = vrot.slane %v13416_v42, 5  ;;  %v763_v62 = vrot.slane %v10611_v16, 5  ;;  %v13422_v16 = vld [vmem:[#allocation59_spill] sm:$0xff]  ;;  %v13519_v24 = vld [vmem:[#allocation45_spill] sm:$0xff] }
  0x7b   : > { %13415 = vst [vmem:[#allocation26_spill] sm:$0xff] %v11345_v56  ;;  %v3597_v43 = vor.u32 %v3596_v19, %v3595_v1  ;;  %v11356_v11 = vshrl.u32 %v13417_v31, 16  ;;  %v11359_v45 = vshll.u32 %v13417_v31, 16  ;;  %v3602_v2 = vor.u32 %v3601_v3, %v3600_v30  ;;  %v11375_v42 = vld [vmem:[%s13043_s1 + $0x8] sm:$0x3]  ;;  %8801 = vmatmul.mubr.msk.bf16.vlgmr.msra.gmra.mrb[0].mxu1 %vm436_vm5, %v11299_v26  ;;  %9241 = vmatmul.mubr.msk.bf16.gmra.mrb[8].mxu0 %vm436_vm5, %v11345_v56 }
  0x7c   : > { %v3594_v28 = vrot.slane %v3593_v58, 4  ;;  %v761_v53 = vsel %vm11213_vm15, %v7773_v41, %v760_v12  ;;  %v762_v22 = vrot.slane %v760_v12, 4  ;;  %v11364_v13 = vshll.u32 %v11079_v59, 16  ;;  %8817 = vmatpush3.bf16.msra.mxu1 %v11263_v0  ;;  %8804 = vmatprep.mubr.msk.bf16.mxu1 %vm436_vm5, %v11342_v57 }
  0x7d   : > { %13418 = vst [vmem:[#allocation9_spill] sm:$0xff] %v11356_v11  ;;  %13419 = vst [vmem:[#allocation55_spill] sm:$0xff] %v11359_v45  ;;  %v3599_v29 = vrot.slane %v3597_v43, 4  ;;  %v11367_v1 = vshrl.u32 %v11079_v59, 16  ;;  %v11370_v19 = vshll.u32 %v13422_v16, 16  ;;  %v13174_v58 = vshrl.u32 %v13422_v16, 16  ;;  %10418 = vmatprep.subr.msk.bf16.mxu1 %vm461_vm0, %v11375_v42 }
  0x7e   : > { %13420 = vst [vmem:[#allocation71_spill] sm:$0xff] %v11364_v13  ;;  %v3598_v30 = vsel %vm11141_vm14, %v3594_v28, %v3597_v43  ;;  %v764_v3 = vsel %vm11213_vm15, %v762_v22, %v763_v62  ;;  %v4535_v41 = vrot.slane %v11356_v11, 6  ;;  %v4536_v56 = vrot.slane %v11359_v45, 7  ;;  %v10488_v11 = vld [vmem:[%s10578_s25 + $0x28] sm:$0xf] }
  0x7f   : > { %13421 = vst [vmem:[#allocation72_spill] sm:$0xff] %v11367_v1  ;;  %13423 = vst [vmem:[#allocation73_spill] sm:$0xff] %v11370_v19  ;;  %v3603_v12 = vsel %vm11141_vm14, %v3599_v29, %v3602_v2  ;;  %v11392_v26 = vcombine.low %v761_v53, %v764_v3  ;;  %v4539_v28 = vrot.slane %v11367_v1, 6  ;;  %v4540_v62 = vrot.slane %v11364_v13, 7  ;;  %v13426_v29 = vld [vmem:[#allocation21_spill] sm:$0xff]  ;;  %v13427_v3 = vld [vmem:[#allocation22_spill] sm:$0xff] }
  0x80   : > { %v11396_v43 = vcombine.low %v3598_v30, %v3603_v12  ;;  %v4544_v22 = vrot.slane %v13174_v58, 6  ;;  %v4545_v0 = vrot.slane %v11370_v19, 7  ;;  %v4537_v2 = vor.u32 %v4536_v56, %v4535_v41  ;;  %v10487_v1 = vld [vmem:[%s10578_s25 + $0x24] sm:$0xf] }
  0x81   : > { %13424 = vst [vmem:[#allocation74_spill] sm:$0xff] %v11392_v26  ;;  %v7774_v53 = vrot.slane %v13426_v29, 9  ;;  %v767_v57 = vrot.slane %v13427_v3, 5  ;;  %v770_v30 = vrot.slane %v13428_v21, 5  ;;  %v4541_v12 = vor.u32 %v4540_v62, %v4539_v28 }
  0x82   : > { %13425 = vst [vmem:[#allocation75_spill] sm:$0xff] %v11396_v43  ;;  %9244 = vmatprep.mubr.msk.bf16.mxu0 %vm436_vm5, %v11396_v43  ;;  %v4546_v58 = vor.u32 %v4545_v0, %v4544_v22  ;;  %vm1746_vm1 = vcmask 1040384   ;;  %vm1747_vm2 = vcmask 1044484   ;;  %v4538_v19 = vrot.slane %v4537_v2, 4 }
  0x83   : > { %v768_v20 = vsel %vm11213_vm15, %v7774_v53, %v767_v57  ;;  %v769_v56 = vrot.slane %v767_v57, 4  ;;  %vm11411_vm3 = vmor %vm1746_vm1, %vm1747_vm2  ;;  %v13429_v41 = vmov 0  ;;  %v7857_v13 = vrot.slane %v10487_v1, 11  ;;  %8805 = vmatmul.mubr.msk.bf16.gmra.mrb[4].mxu1 %vm436_vm5, %v11392_v26 }
  0x84   : > { %v13430_v41 = vsel %vm11411_vm3, 4294967295, %v13429_v41  ;;  %v4543_v45 = vrot.slane %v4541_v12, 4  ;;  %v1772_v4 = vrot.slane %v10488_v11, 7  ;;  %v1775_v43 = vrot.slane %v10489_v27, 7 }
  0x85   : > { %13431 = vst [vmem:[#allocation21_spill] sm:$0xff] %v13430_v41  ;;  %v7775_v28 = vrot.slane %v10775_v32, 9  ;;  %v4542_v62 = vsel %vm11141_vm14, %v4538_v19, %v4541_v12  ;;  %v771_v22 = vsel %vm11213_vm15, %v769_v56, %v770_v30  ;;  %v774_v57 = vrot.slane %v10792_v35, 5  ;;  %v12303_v41 = vld [vmem:[%s10578_s25 + $0x94] sm:$0xf] }
  0x86   : > { %v777_v0 = vrot.slane %v10799_v5, 5  ;;  %v4547_v11 = vsel %vm11141_vm14, %v4543_v45, %v4546_v58  ;;  %v11429_v1 = vcombine.low %v768_v20, %v771_v22  ;;  %v1773_v27 = vsel %vm11411_vm3, %v7857_v13, %v1772_v4 }
  0x87   : > { %v1774_v2 = vrot.slane %v1772_v4, 4  ;;  %v11433_v19 = vcombine.low %v4542_v62, %v4547_v11  ;;  %v775_v53 = vsel %vm11213_vm15, %v7775_v28, %v774_v57  ;;  %v776_v30 = vrot.slane %v774_v57, 4 }
  0x88   : > { %13432 = vst [vmem:[#allocation22_spill] sm:$0xff] %v11429_v1  ;;  %v7858_v12 = vrot.slane %v13426_v29, 11  ;;  %8808 = vmatprep.mubr.msk.bf16.mxu1 %vm436_vm5, %v11429_v1  ;;  %v1779_v20 = vrot.slane %v13427_v3, 7  ;;  %v1782_v58 = vrot.slane %v13428_v21, 7  ;;  %v4814_v4 = vsel %vm461_vm0, %v11255_v17, 0  ;;  %v13460_v1 = vld [vmem:[#allocation30_spill] sm:$0xff] }
  0x89   : > { %13433 = vst [vmem:[#allocation23_spill] sm:$0xff] %v11433_v19  ;;  %v1776_v45 = vsel %vm11411_vm3, %v1774_v2, %v1775_v43  ;;  %9245 = vmatmul.mubr.msk.bf16.gmra.mrb[12].mxu0 %vm436_vm5, %v11433_v19  ;;  %v778_v29 = vsel %vm11213_vm15, %v776_v30, %v777_v0  ;;  %v7776_v56 = vrot.slane %v10841_v46, 9  ;;  %v781_v28 = vrot.slane %v10854_v40, 5 }
  0x8a   : > { %v11448_v13 = vcombine.low %v1773_v27, %v1776_v45  ;;  %v11454_v43 = vcombine.low %v775_v53, %v778_v29  ;;  %v1780_v21 = vsel %vm11411_vm3, %v7858_v12, %v1779_v20  ;;  %v1781_v3 = vrot.slane %v1779_v20, 4 }
  0x8b   : > { %v784_v17 = vrot.slane %v10857_v14, 5  ;;  %v782_v62 = vsel %vm11213_vm15, %v7776_v56, %v781_v28  ;;  %v783_v22 = vrot.slane %v781_v28, 4  ;;  %v7859_v57 = vrot.slane %v10775_v32, 11 }
  0x8c   : > { %13434 = vst [vmem:[#allocation76_spill] sm:$0xff] %v11448_v13  ;;  %13435 = vst [vmem:[#allocation77_spill] sm:$0xff] %v11454_v43  ;;  %9250 = vmatprep.mubr.msk.bf16.mxu0 %vm436_vm5, %v11448_v13  ;;  %v1786_v0 = vrot.slane %v10792_v35, 7  ;;  %v1783_v11 = vsel %vm11411_vm3, %v1781_v3, %v1782_v58  ;;  %v1789_v27 = vrot.slane %v10799_v5, 7  ;;  %v7777_v2 = vrot.slane %v10952_v55, 9  ;;  %8809 = vmatmul.mubr.msk.bf16.gmra.mrb[8].mxu1 %vm436_vm5, %v11454_v43  ;;  %v13450_v13 = vld [vmem:[#allocation18_spill] sm:$0xff] }
  0x8d   : > { %v788_v53 = vrot.slane %v10962_v37, 5  ;;  %v11470_v30 = vcombine.low %v1780_v21, %v1783_v11  ;;  %v785_v12 = vsel %vm11213_vm15, %v783_v22, %v784_v17  ;;  %v791_v58 = vrot.slane %v13394_v8, 5 }
  0x8e   : > { %v1787_v45 = vsel %vm11411_vm3, %v7859_v57, %v1786_v0  ;;  %v1788_v32 = vrot.slane %v1786_v0, 4  ;;  %v11478_v35 = vcombine.low %v782_v62, %v785_v12  ;;  %v7860_v56 = vrot.slane %v10841_v46, 11  ;;  %v13439_v62 = vld [vmem:[#allocation4_spill] sm:$0xff]  ;;  %v13440_v57 = vld [vmem:[#allocation5_spill] sm:$0xff]  ;;  %v13443_v12 = vld [vmem:[#allocation6_spill] sm:$0xff] }
  0x8f   : > { %13436 = vst [vmem:[#allocation78_spill] sm:$0xff] %v11470_v30  ;;  %v789_v5 = vsel %vm11213_vm15, %v7777_v2, %v788_v53  ;;  %v790_v20 = vrot.slane %v788_v53, 4  ;;  %v1793_v28 = vrot.slane %v10854_v40, 7  ;;  %v1796_v21 = vrot.slane %v10857_v14, 7  ;;  %v11499_v46 = vld [vmem:[%s13043_s1 + $0x3a] sm:$0x3] }
  0x90   : > { %13437 = vst [vmem:[#allocation79_spill] sm:$0xff] %v11478_v35  ;;  %v1790_v29 = vsel %vm11411_vm3, %v1788_v32, %v1789_v27  ;;  %8812 = vmatprep.mubr.msk.bf16.mxu1 %vm436_vm5, %v11478_v35  ;;  %v962_v22 = vrot.slane %v13439_v62, 5  ;;  %v963_v0 = vrot.slane %v13440_v57, 6  ;;  %v13442_v27 = vld [vmem:[#allocation7_spill] sm:$0xff]  ;;  %v13451_v38 = vrot.slane %v13450_v13, 5  ;;  %v13452_v35 = vld [vmem:[#allocation17_spill] sm:$0xff] }
  0x91   : > { %v11490_v3 = vcombine.low %v1787_v45, %v1790_v29  ;;  %v792_v17 = vsel %vm11213_vm15, %v790_v20, %v791_v58  ;;  %9251 = vmatmul.mubr.msk.bf16.vlgmr.msra.gmra.mrb[0].mxu0 %vm436_vm5, %v11470_v30  ;;  %v1794_v40 = vsel %vm11411_vm3, %v7860_v56, %v1793_v28  ;;  %v1795_v11 = vrot.slane %v1793_v28, 4  ;;  %v11512_v32 = vld [vmem:[%s10578_s25 + $0x8] sm:$0x7]  ;;  %v13444_v58 = vld [vmem:[#allocation8_spill] sm:$0xff] }
  0x92   : > { %v11503_v14 = vcombine.low %v789_v5, %v792_v17  ;;  %v966_v2 = vrot.slane %v13442_v27, 5  ;;  %9267 = vmatpush3.bf16.msra.mxu0 %v4814_v4  ;;  %v964_v53 = vor.u32 %v963_v0, %v962_v22  ;;  %v967_v45 = vrot.slane %v13443_v12, 6 }
  0x93   : > { %13438 = vst [vmem:[#allocation80_spill] sm:$0xff] %v11490_v3  ;;  %9254 = vmatprep.mubr.msk.bf16.mxu0 %vm436_vm5, %v11490_v3  ;;  %v13209_v20 = vshrl.u32 %v11512_v32, 16  ;;  %v974_v5 = vrot.slane %v13444_v58, 6  ;;  %v1797_v29 = vsel %vm11411_vm3, %v1795_v11, %v1796_v21  ;;  %v7861_v56 = vrot.slane %v10952_v55, 11  ;;  %10444 = vmatprep.subr.msk.bf16.mxu0 %vm461_vm0, %v11499_v46  ;;  %v13446_v55 = vld [vmem:[#allocation13_spill] sm:$0xff]  ;;  %v13448_v3 = vld [vmem:[#allocation15_spill] sm:$0xff] }
  0x94   : > { %13441 = vst [vmem:[#allocation4_spill] sm:$0xff] %v11503_v14  ;;  %v1800_v4 = vrot.slane %v10962_v37, 7  ;;  %v1803_v28 = vrot.slane %v13394_v8, 7  ;;  %v11523_v17 = vcombine.low %v1794_v40, %v1797_v29  ;;  %v965_v22 = vrot.slane %v964_v53, 4  ;;  %8813 = vmatmul.mubr.msk.bf16.gmra.mrb[12].mxu1 %vm436_vm5, %v11503_v14 }
  0x95   : > { %v968_v0 = vor.u32 %v967_v45, %v966_v2  ;;  %v973_v19 = vrot.slane %v13209_v20, 5  ;;  %v13447_v26 = vrot.slane %v13446_v55, 5  ;;  %v13449_v37 = vrot.slane %v13448_v3, 6 }
  0x96   : > { %13445 = vst [vmem:[#allocation5_spill] sm:$0xff] %v11523_v17  ;;  %v1801_v21 = vsel %vm11411_vm3, %v7861_v56, %v1800_v4  ;;  %v1802_v11 = vrot.slane %v1800_v4, 4  ;;  %v13453_v43 = vrot.slane %v13452_v35, 6  ;;  %v11542_v56 = vld [vmem:[%s10578_s25 + $0x14] sm:$0x7]  ;;  %v3730_v61 = vrot.slane %v11054_v33, 7 }
  0x97   : > { %v979_v30 = vor.u32 %v13449_v37, %v13447_v26  ;;  %v969_v53 = vsel %vm10668_vm7, %v965_v22, %v968_v0  ;;  %v970_v45 = vrot.slane %v968_v0, 4  ;;  %v975_v29 = vor.u32 %v974_v5, %v973_v19  ;;  %v13456_v0 = vld [vmem:[#allocation19_spill] sm:$0xff] }
  0x98   : > { %v983_v40 = vor.u32 %v13453_v43, %v13451_v38  ;;  %v13212_v4 = vshrl.u32 %v11542_v56, 16  ;;  %v1804_v26 = vsel %vm11411_vm3, %v1802_v11, %v1803_v28  ;;  %v1358_v38 = vsel %vm461_vm0, %v11375_v42, 0 }
  0x99   : > { %v980_v37 = vrot.slane %v979_v30, 4  ;;  %v976_v43 = vsel %vm10668_vm7, %v970_v45, %v975_v29  ;;  %v11551_v14 = vcombine.low %v1801_v21, %v1804_v26  ;;  %v7941_v5 = vrot.slane %v13404_v25, 11  ;;  %9255 = vmatmul.mubr.msk.bf16.gmra.mrb[4].mxu0 %vm436_vm5, %v11523_v17  ;;  %v13458_v45 = vld [vmem:[#allocation24_spill] sm:$0xff] }
  0x9a   : > { %v985_v20 = vrot.slane %v983_v40, 4  ;;  %v988_v19 = vrot.slane %v13212_v4, 5  ;;  %v7796_v28 = vcombine.low %v969_v53, %v976_v43  ;;  %v2786_v42 = vrot.slane %v11027_v18, 7  ;;  %v13459_v26 = vld [vmem:[#allocation28_spill] sm:$0xff] }
  0x9b   : > { %13455 = vst [vmem:[#allocation7_spill] sm:$0xff] %v11551_v14  ;;  %v984_v30 = vsel %vm10668_vm7, %v980_v37, %v983_v40  ;;  %v2789_v22 = vrot.slane %v11037_v52, 7  ;;  %9258 = vmatprep.mubr.msk.bf16.mxu0 %vm436_vm5, %v11551_v14  ;;  %v13457_v21 = vrot.slane %v13456_v0, 6  ;;  %v992_v29 = vrot.slane %v13458_v45, 5  ;;  %v13461_v37 = vld [vmem:[#allocation29_spill] sm:$0xff]  ;;  %v13462_v45 = vld [vmem:[#allocation31_spill] sm:$0xff] }
  0x9c   : > { %v993_v4 = vrot.slane %v13459_v26, 6  ;;  %v996_v17 = vrot.slane %v13460_v1, 5  ;;  %8818 = vmatprep.mubr.msk.bf16.mxu1 %vm436_vm5, %v7796_v28  ;;  %v2787_v40 = vsel %vm11411_vm3, %v7941_v5, %v2786_v42  ;;  %v2788_v53 = vrot.slane %v2786_v42, 4  ;;  %v11574_v52 = vld [vmem:[%s10578_s25 + $0x20] sm:$0x7] }
  0x9d   : > { %v990_v11 = vor.u32 %v13457_v21, %v988_v19  ;;  %v997_v43 = vrot.slane %v13461_v37, 6  ;;  %v13226_v14 = vshrl.u32 %v11574_v52, 16  ;;  %v1004_v26 = vrot.slane %v13462_v45, 6 }
  0x9e   : > { %v994_v21 = vor.u32 %v993_v4, %v992_v29  ;;  %v8014_v1 = vrot.slane %v11051_v9, 11  ;;  %v2790_v5 = vsel %vm11411_vm3, %v2788_v53, %v2789_v22  ;;  %v11594_v4 = vld [vmem:[%s13043_s1 + $0xa] sm:$0x3]  ;;  %v8087_v22 = vrot.slane %v13417_v31, 11 }
  0x9f   : > { %v991_v19 = vsel %vm10668_vm7, %v985_v20, %v990_v11  ;;  %v998_v28 = vor.u32 %v997_v43, %v996_v17  ;;  %v1003_v42 = vrot.slane %v13226_v14, 5  ;;  %v11587_v37 = vcombine.low %v2787_v40, %v2790_v5 }
  0xa0   : > { %v11581_v6 = vcombine.low %v984_v30, %v991_v19  ;;  %v995_v36 = vrot.slane %v994_v21, 4  ;;  %v3733_v20 = vrot.slane %v11063_v34, 7  ;;  %v4674_v11 = vrot.slane %v11079_v59, 7 }
  0xa1   : > { %13464 = vst [vmem:[#allocation8_spill] sm:$0xff] %v11587_v37  ;;  %v1000_v30 = vrot.slane %v998_v28, 4  ;;  %v1005_v17 = vor.u32 %v1004_v26, %v1003_v42  ;;  %v3731_v40 = vsel %vm11411_vm3, %v8014_v1, %v3730_v61  ;;  %v3732_v53 = vrot.slane %v3730_v61, 4  ;;  %9259 = vmatmul.mubr.msk.bf16.gmra.mrb[8].mxu0 %vm436_vm5, %v11587_v37  ;;  %v13493_v37 = vld [vmem:[#allocation44_spill] sm:$0xff] }
  0xa2   : > { %13463 = vst [vmem:[#allocation6_spill] sm:$0xff] %v11581_v6  ;;  %8819 = vmatmul.mubr.msk.bf16.vlgmr.msra.gmra.mrb[0].mxu1 %vm436_vm5, %v11581_v6  ;;  %v999_v29 = vsel %vm10668_vm7, %v995_v36, %v998_v28  ;;  %v4677_v43 = vrot.slane %v13422_v16, 7  ;;  %v4676_v19 = vrot.slane %v4674_v11, 4  ;;  %v4675_v61 = vsel %vm11411_vm3, %v8087_v22, %v4674_v11  ;;  %v13469_v22 = vld [vmem:[#allocation32_spill] sm:$0xff] }
  0xa3   : > { %8835 = vmatpush3.bf16.msra.mxu1 %v1358_v38  ;;  %v1006_v26 = vsel %vm10668_vm7, %v1000_v30, %v1005_v17  ;;  %v3734_v36 = vsel %vm11411_vm3, %v3732_v53, %v3733_v20  ;;  %v1067_v5 = vrot.slane %v13395_v15, 5  ;;  %v1068_v28 = vrot.slane %v13396_v7, 6  ;;  %v13468_v17 = vld [vmem:[#allocation20_spill] sm:$0xff] }
  0xa4   : > { %10419 = vmatprep.subr.msk.bf16.mxu1 %vm461_vm0, %v11594_v4  ;;  %v11611_v38 = vcombine.low %v999_v29, %v1006_v26  ;;  %v11617_v1 = vcombine.low %v3731_v40, %v3734_v36  ;;  %v4678_v21 = vsel %vm11411_vm3, %v4676_v19, %v4677_v43  ;;  %v1071_v42 = vrot.slane %v13397_v39, 5  ;;  %v11649_v36 = vld [vmem:[%s10578_s25] sm:$0xf] }
  0xa5   : > { %v1072_v20 = vrot.slane %v13398_v49, 6  ;;  %v11629_v30 = vcombine.low %v4675_v61, %v4678_v21  ;;  %v1069_v11 = vor.u32 %v1068_v28, %v1067_v5  ;;  %v13470_v7 = vshrl.u32 %v13394_v8, 16  ;;  %v11641_v49 = vld [vmem:[%s10578_s25 + $0x4] sm:$0xf] }
  0xa6   : > { %13465 = vst [vmem:[#allocation13_spill] sm:$0xff] %v11611_v38  ;;  %13466 = vst [vmem:[#allocation15_spill] sm:$0xff] %v11617_v1  ;;  %8822 = vmatprep.mubr.msk.bf16.mxu1 %vm436_vm5, %v11611_v38  ;;  %9262 = vmatprep.mubr.msk.bf16.mxu0 %vm436_vm5, %v11617_v1  ;;  %v1079_v39 = vrot.slane %v13399_v50, 6  ;;  %v1253_v40 = vrot.slane %v11641_v49, 6  ;;  %v1489_v53 = vrot.slane %v13446_v55, 6  ;;  %v1490_v8 = vrot.slane %v13448_v3, 7 }
  0xa7   : > { %13467 = vst [vmem:[#allocation18_spill] sm:$0xff] %v11629_v30  ;;  %v1073_v15 = vor.u32 %v1072_v20, %v1071_v42  ;;  %v1078_v29 = vrot.slane %v13470_v7, 5  ;;  %v1070_v43 = vrot.slane %v1069_v11, 4  ;;  %v7812_v50 = vrot.slane %v11649_v36, 10  ;;  %v13471_v42 = vld [vmem:[#allocation35_spill] sm:$0xff]  ;;  %v13472_v20 = vld [vmem:[#allocation38_spill] sm:$0xff] }
  0xa8   : > { %v1255_v61 = vrot.slane %v1253_v40, 4  ;;  %v1256_v21 = vrot.slane %v11512_v32, 6  ;;  %v1493_v5 = vrot.slane %v13450_v13, 6  ;;  %v1494_v28 = vrot.slane %v13452_v35, 7  ;;  %v11667_v7 = vld [vmem:[%s10578_s25 + $0x10] sm:$0xf] }
  0xa9   : > { %9263 = vmatmul.mubr.msk.bf16.gmra.mrb[12].mxu0 %vm436_vm5, %v11629_v30  ;;  %v1075_v26 = vrot.slane %v1073_v15, 4  ;;  %v1080_v19 = vor.u32 %v1079_v39, %v1078_v29  ;;  %v4962_v55 = vsel %vm461_vm0, %v11499_v46, 0  ;;  %v1499_v3 = vrot.slane %v13456_v0, 7  ;;  %v11673_v46 = vld [vmem:[%s13043_s1 + $0x3c] sm:$0x3] }
  0xaa   : > { %8823 = vmatmul.mubr.msk.bf16.gmra.mrb[4].mxu1 %vm436_vm5, %v13468_v17  ;;  %9268 = vmatprep.mubr.msk.bf16.mxu0 %vm436_vm5, %v11112_v60  ;;  %v1074_v11 = vsel %vm10668_vm7, %v1070_v43, %v1073_v15  ;;  %v1260_v35 = vrot.slane %v11667_v7, 6  ;;  %v1254_v0 = vsel %vm10908_vm9, %v7812_v50, %v1253_v40  ;;  %v1257_v15 = vsel %vm10908_vm9, %v1255_v61, %v1256_v21  ;;  %v11682_v29 = vld [vmem:[%s10578_s25 + $0x1c] sm:$0xf]  ;;  %v11692_v40 = vld [vmem:[%s10578_s25 + $0xc] sm:$0xf] }
  0xab   : > { %8826 = vmatprep.mubr.msk.bf16.mxu1 %vm436_vm5, %v13469_v22  ;;  %v1081_v13 = vsel %vm10668_vm7, %v1075_v26, %v1080_v19  ;;  %v1267_v39 = vrot.slane %v11682_v29, 6  ;;  %v1491_v43 = vor.u32 %v1490_v8, %v1489_v53  ;;  %v1495_v26 = vor.u32 %v1494_v28, %v1493_v5  ;;  %v11699_v5 = vld [vmem:[%s10578_s25 + $0x18] sm:$0xf] }
  0xac   : > { %v13473_v19 = vshrl.u32 %v11542_v56, 16  ;;  %v11689_v30 = vcombine.low %v1074_v11, %v1081_v13  ;;  %v7813_v50 = vrot.slane %v11692_v40, 10  ;;  %v1263_v61 = vrot.slane %v11542_v56, 6 }
  0xad   : > { %v1492_v53 = vrot.slane %v1491_v43, 4  ;;  %v7821_v8 = vcombine.low %v1254_v0, %v1257_v15  ;;  %v1262_v21 = vrot.slane %v1260_v35, 4  ;;  %v7814_v28 = vrot.slane %v11699_v5, 10 }
  0xae   : > { %v1498_v14 = vrot.slane %v13473_v19, 6  ;;  %13474 = vst [vmem:[#allocation17_spill] sm:$0xff] %v11689_v30  ;;  %v1269_v11 = vrot.slane %v1267_v39, 4  ;;  %v1270_v13 = vrot.slane %v11574_v52, 6  ;;  %v11707_v17 = vcombine.low %v13404_v25, %v11027_v18 }
  0xaf   : > { %v1496_v19 = vsel %vm11141_vm14, %v1492_v53, %v1495_v26  ;;  %v1264_v15 = vsel %vm10908_vm9, %v1262_v21, %v1263_v61  ;;  %v1268_v18 = vsel %vm10908_vm9, %v7814_v28, %v1267_v39  ;;  %v11740_v39 = vcombine.low %v13417_v31, %v11079_v59 }
  0xb0   : > { %v1500_v1 = vor.u32 %v1499_v3, %v1498_v14  ;;  %13475 = vst [vmem:[#allocation19_spill] sm:$0xff] %v11707_v17  ;;  %v1261_v3 = vsel %vm10908_vm9, %v7813_v50, %v1260_v35  ;;  %v1271_v25 = vsel %vm10908_vm9, %v1269_v11, %v1270_v13  ;;  %v1631_v35 = vsel %vm461_vm0, %v11594_v4, 0  ;;  %v11745_v50 = vld [vmem:[%s13043_s1 + $0xc] sm:$0x3]  ;;  %v11752_v4 = vld [vmem:[%s10578_s25 + $0x84] sm:$0xf] }
  0xb1   : > { %9269 = vmatmul.mubr.msk.bf16.vlgmr.msra.gmra.mrb[0].mxu0 %vm436_vm5, %v11135_v23  ;;  %v11730_v43 = vcombine.low %v1268_v18, %v1271_v25  ;;  %13479 = vst [vmem:[#allocation83_spill] sm:$0xff] %v11740_v39  ;;  %v1477_v59 = vrot.slane %v13440_v57, 7  ;;  %v1480_v31 = vrot.slane %v13442_v27, 6  ;;  %v1481_v61 = vrot.slane %v13443_v12, 7  ;;  %v13482_v13 = vld [vmem:[#allocation40_spill] sm:$0xff]  ;;  %v13484_v25 = vld [vmem:[#allocation39_spill] sm:$0xff] }
  0xb2   : > { %8827 = vmatmul.mubr.msk.bf16.gmra.mrb[8].mxu1 %vm436_vm5, %v13471_v42  ;;  %9285 = vmatpush3.bf16.msra.mxu0 %v4962_v55  ;;  %v1497_v55 = vrot.slane %v1495_v26, 4  ;;  %v11736_v26 = vcombine.low %v11051_v9, %v11054_v33  ;;  %v11755_v9 = vld [vmem:[%s10578_s25 + $0x88] sm:$0xf]  ;;  %v1476_v33 = vrot.slane %v13439_v62, 6  ;;  %v13481_v57 = vshrl.u32 %v11512_v32, 16  ;;  %v13498_v23 = vld [vmem:[#allocation72_spill] sm:$0xff] }
  0xb3   : > { %8830 = vmatprep.mubr.msk.bf16.mxu1 %vm436_vm5, %v13472_v20  ;;  %9272 = vmatprep.mubr.msk.bf16.mxu0 %vm436_vm5, %v11165_v47  ;;  %13477 = vst [vmem:[#allocation81_spill] sm:$0xff] %v11730_v43  ;;  %v11769_v53 = vcombine.low %v11752_v4, %v11755_v9  ;;  %v1486_v21 = vrot.slane %v13444_v58, 7  ;;  %v2100_v27 = vrot.slane %v11266_v10, 4  ;;  %v2103_v12 = vrot.slane %v11274_v48, 5 }
  0xb4   : > { %10445 = vmatprep.subr.msk.bf16.mxu0 %vm461_vm0, %v11673_v46  ;;  %v1501_v0 = vsel %vm11141_vm14, %v1497_v55, %v1500_v1  ;;  %v11728_v1 = vcombine.low %v1261_v3, %v1264_v15  ;;  %13478 = vst [vmem:[#allocation82_spill] sm:$0xff] %v11736_v26  ;;  %v1478_v62 = vor.u32 %v1477_v59, %v1476_v33  ;;  %v2109_v28 = vrot.slane %v11277_v51, 5  ;;  %v13486_v59 = vld [vmem:[#allocation48_spill] sm:$0xff] }
  0xb5   : > { %v11713_v14 = vcombine.low %v1496_v19, %v1501_v0  ;;  %13480 = vst [vmem:[#allocation84_spill] sm:$0xff] %v11769_v53  ;;  %v1482_v55 = vor.u32 %v1481_v61, %v1480_v31  ;;  %v2113_v11 = vrot.slane %v11286_v44, 4  ;;  %v13483_v19 = vld [vmem:[#allocation41_spill] sm:$0xff]  ;;  %v2104_v15 = vor.u32 %v2103_v12, %v2100_v27  ;;  %v13487_v61 = vld [vmem:[#allocation10_spill] sm:$0xff] }
  0xb6   : > { %13476 = vst [vmem:[#allocation31_spill] sm:$0xff] %v11728_v1  ;;  %v1479_v58 = vrot.slane %v1478_v62, 4  ;;  %v3047_v31 = vrot.slane %v13486_v59, 5  ;;  %v5094_v12 = vsel %vm461_vm0, %v11673_v46, 0  ;;  %v2119_v6 = vrot.slane %v13493_v37, 5  ;;  %v13497_v46 = vld [vmem:[#allocation71_spill] sm:$0xff] }
  0xb7   : > { %v1484_v3 = vrot.slane %v1482_v55, 4  ;;  %v2114_v18 = vor.u32 %v2113_v11, %v2109_v28 }
  0xb8   : > { %v1483_v11 = vsel %vm11141_vm14, %v1479_v58, %v1482_v55  ;;  %v4001_v55 = vrot.slane %v13498_v23, 4  ;;  %v13499_v58 = vld [vmem:[#allocation57_spill] sm:$0xff] }
  0xb9   : > { %9273 = vmatmul.mubr.msk.bf16.gmra.mrb[4].mxu0 %vm436_vm5, %v11190_v63  ;;  %v2115_v54 = vrot.slane %v2114_v18, 4  ;;  %v13496_v63 = vld [vmem:[#allocation55_spill] sm:$0xff] }
  0xba   : > { %8831 = vmatmul.mubr.msk.bf16.gmra.mrb[12].mxu1 %vm436_vm5, %v11689_v30  ;;  %9276 = vmatprep.mubr.msk.bf16.mxu0 %vm436_vm5, %v11707_v17  ;;  %v3991_v47 = vrot.slane %v13496_v63, 5  ;;  %v13504_v30 = vld [vmem:[#allocation14_spill] sm:$0xff] }
  0xbb   : > { %8836 = vmatprep.mubr.msk.bf16.mxu1 %vm436_vm5, %v7821_v8  ;;  %v1485_v8 = vrot.slane %v13481_v57, 6  ;;  %v3053_v57 = vrot.slane %v13487_v61, 5  ;;  %v3063_v16 = vrot.slane %v13504_v30, 5 }
  0xbd   : > { %v1487_v0 = vor.u32 %v1486_v21, %v1485_v8  ;;  %v13490_v21 = vld [vmem:[#allocation28_spill] sm:$0xff] }
  0xbf   : > { %v1488_v38 = vsel %vm11141_vm14, %v1484_v3, %v1487_v0 }
  0xc0   : > { %v7838_v42 = vcombine.low %v1483_v11, %v1488_v38 }
  0xc1   : > { %9277 = vmatmul.mubr.msk.bf16.gmra.mrb[8].mxu0 %vm436_vm5, %v11736_v26  ;;  %v1503_v26 = vrot.slane %v13490_v21, 7  ;;  %v13494_v21 = vld [vmem:[#allocation50_spill] sm:$0xff] }
  0xc2   : > { %8837 = vmatmul.mubr.msk.bf16.vlgmr.msra.gmra.mrb[0].mxu1 %vm436_vm5, %v11728_v1  ;;  %9280 = vmatprep.mubr.msk.bf16.mxu0 %vm436_vm5, %v11740_v39  ;;  %v13488_v39 = vld [vmem:[#allocation12_spill] sm:$0xff]  ;;  %v13492_v1 = vld [vmem:[#allocation29_spill] sm:$0xff] }
  0xc3   : > { %8853 = vmatpush3.bf16.msra.mxu1 %v1631_v35  ;;  %8840 = vmatprep.mubr.msk.bf16.mxu1 %vm436_vm5, %v11730_v43  ;;  %v13485_v35 = vld [vmem:[#allocation46_spill] sm:$0xff]  ;;  %v13489_v43 = vld [vmem:[#allocation24_spill] sm:$0xff]  ;;  %v1507_v27 = vrot.slane %v13492_v1, 7 }
  0xc4   : > { %10420 = vmatprep.subr.msk.bf16.mxu1 %vm461_vm0, %v11745_v50  ;;  %v3044_v33 = vrot.slane %v13485_v35, 4  ;;  %v1502_v8 = vrot.slane %v13489_v43, 6 }
  0xc6   : > { %v3048_v43 = vor.u32 %v3047_v31, %v3044_v33  ;;  %v1504_v0 = vor.u32 %v1503_v26, %v1502_v8  ;;  %v11815_v33 = vld [vmem:[%s13043_s1 + $0x3e] sm:$0x3]  ;;  %v13501_v31 = vld [vmem:[#allocation42_spill] sm:$0xff]  ;;  %v11826_v26 = vshll.u32 %v11755_v9, 16 }
  0xc7   : > { %v13502_v8 = vld [vmem:[#allocation49_spill] sm:$0xff] }
  0xc9   : > { %9281 = vmatmul.mubr.msk.bf16.gmra.mrb[12].mxu0 %vm436_vm5, %v11769_v53  ;;  %v13491_v53 = vld [vmem:[#allocation30_spill] sm:$0xff] }
  0xca   : > { %8841 = vmatmul.mubr.msk.bf16.gmra.mrb[4].mxu1 %vm436_vm5, %v13482_v13  ;;  %9286 = vmatprep.mubr.msk.bf16.mxu0 %vm436_vm5, %v13484_v25  ;;  %v3057_v13 = vrot.slane %v13488_v39, 4  ;;  %v1506_v62 = vrot.slane %v13491_v53, 6  ;;  %v2105_v25 = vrot.slane %v2104_v15, 4  ;;  %v13495_v53 = vld [vmem:[#allocation9_spill] sm:$0xff]  ;;  %v13500_v15 = vshrl.u32 %v11574_v52, 16 }
  0xcb   : > { %8844 = vmatprep.mubr.msk.bf16.mxu1 %vm436_vm5, %v13483_v19  ;;  %v3988_v1 = vrot.slane %v13495_v53, 4  ;;  %v3997_v19 = vrot.slane %v13497_v46, 5 }
  0xcc   : > { %v3058_v17 = vor.u32 %v3057_v13, %v3053_v57  ;;  %v1508_v3 = vor.u32 %v1507_v27, %v1506_v62  ;;  %v1511_v18 = vrot.slane %v13500_v15, 6  ;;  %v1512_v13 = vrot.slane %v13462_v45, 7  ;;  %v10507_v62 = vld [vmem:[%s10578_s25 + $0x80] sm:$0x7] }
  0xcd   : > { %v11829_v45 = vshrl.u32 %v11755_v9, 16  ;;  %v2110_v27 = vsel %vm10639_vm6, %v2105_v25, %v2109_v28  ;;  %v2120_v15 = vsel %vm10639_vm6, %v2115_v54, %v2119_v6  ;;  %v3992_v20 = vor.u32 %v3991_v47, %v3988_v1 }
  0xce   : > { %v3059_v60 = vrot.slane %v3058_v17, 4  ;;  %v4002_v34 = vor.u32 %v4001_v55, %v3997_v19  ;;  %v1510_v46 = vrot.slane %v1508_v3, 4  ;;  %v1513_v23 = vor.u32 %v1512_v13, %v1511_v18  ;;  %v13507_v55 = vld [vmem:[#allocation73_spill] sm:$0xff] }
  0xcf   : > { %v4941_v54 = vrot.slane %v11826_v26, 5  ;;  %v4945_v6 = vrot.slane %v11829_v45, 4  ;;  %v11847_v17 = vcombine.low %v2110_v27, %v2120_v15  ;;  %v3993_v11 = vrot.slane %v3992_v20, 4  ;;  %v13508_v27 = vld [vmem:[#allocation56_spill] sm:$0xff] }
  0xd0   : > { %v3064_v38 = vsel %vm10639_vm6, %v3059_v60, %v3063_v16  ;;  %v4003_v1 = vrot.slane %v4002_v34, 4  ;;  %v1856_v34 = vsel %vm461_vm0, %v11745_v50, 0 }
  0xd1   : > { %9287 = vmatmul.mubr.msk.bf16.vlgmr.msra.gmra.mrb[0].mxu0 %vm436_vm5, %v13501_v31  ;;  %v3049_v31 = vrot.slane %v3048_v43, 4  ;;  %13505 = vst [vmem:[#allocation46_spill] sm:$0xff] %v11847_v17  ;;  %v13506_v43 = vld [vmem:[#allocation60_spill] sm:$0xff]  ;;  %v4946_v15 = vor.u32 %v4945_v6, %v4941_v54  ;;  %v3998_v20 = vsel %vm10639_vm6, %v3993_v11, %v3997_v19  ;;  %v11886_v19 = vld [vmem:[%s13043_s1 + $0xe] sm:$0x3] }
  0xd2   : > { %8845 = vmatmul.mubr.msk.bf16.gmra.mrb[8].mxu1 %vm436_vm5, %v13494_v21  ;;  %v11820_v21 = vshrl.u32 %v11752_v4, 16  ;;  %9303 = vmatpush3.bf16.msra.mxu0 %v5094_v12  ;;  %v1505_v12 = vrot.slane %v1504_v0, 4  ;;  %v4007_v0 = vrot.slane %v13507_v55, 5 }
  0xd3   : > { %8848 = vmatprep.mubr.msk.bf16.mxu1 %vm436_vm5, %v13499_v58  ;;  %v11823_v58 = vshll.u32 %v11752_v4, 16  ;;  %9290 = vmatprep.mubr.msk.bf16.mxu0 %vm436_vm5, %v13502_v8  ;;  %v11841_v8 = vld [vmem:[%s10578_s25 + $0x8c] sm:$0x7]  ;;  %v3054_v47 = vsel %vm10639_vm6, %v3049_v31, %v3053_v57  ;;  %v1514_v57 = vsel %vm11141_vm14, %v1510_v46, %v1513_v23  ;;  %v5213_v46 = vrot.slane %v11829_v45, 5 }
  0xd4   : > { %10446 = vmatprep.subr.msk.bf16.mxu0 %vm461_vm0, %v11815_v33  ;;  %v4932_v28 = vrot.slane %v11820_v21, 4  ;;  %v1509_v18 = vsel %vm11141_vm14, %v1505_v12, %v1508_v3  ;;  %v4949_v13 = vshll.u32 %v11841_v8, 16  ;;  %v5209_v60 = vrot.slane %v11820_v21, 5 }
  0xd5   : > { %v4935_v25 = vrot.slane %v11823_v58, 5  ;;  %v11869_v16 = vcombine.low %v3054_v47, %v3064_v38  ;;  %v4008_v23 = vsel %vm10639_vm6, %v4003_v1, %v4007_v0  ;;  %v5214_v3 = vrot.slane %v11826_v26, 6 }
  0xd6   : > { %v11878_v12 = vcombine.low %v1509_v18, %v1514_v57  ;;  %v5218_v50 = vshrl.u32 %v11841_v8, 16  ;;  %v4947_v47 = vrot.slane %v4946_v15, 4 }
  0xd7   : > { %v4936_v31 = vor.u32 %v4935_v25, %v4932_v28  ;;  %v4951_v28 = vrot.slane %v4949_v13, 5  ;;  %v5215_v38 = vor.u32 %v5214_v3, %v5213_v46  ;;  %v5489_v3 = vrot.slane %v4949_v13, 7 }
  0xd8   : > { %v5220_v1 = vrot.slane %v5218_v50, 5 }
  0xd9   : > { %9291 = vmatmul.mubr.msk.bf16.gmra.mrb[4].mxu0 %vm436_vm5, %v13508_v27  ;;  %v4937_v6 = vrot.slane %v4936_v31, 4  ;;  %v11881_v27 = vcombine.low %v3998_v20, %v4008_v23  ;;  %v5217_v0 = vrot.slane %v5215_v38, 4  ;;  %v4952_v15 = vsel %vm10639_vm6, %v4947_v47, %v4951_v28  ;;  %v13510_v47 = vld [vmem:[#allocation27_spill] sm:$0xff] }
  0xda   : > { %8849 = vmatmul.mubr.msk.bf16.gmra.mrb[12].mxu1 %vm436_vm5, %v13506_v43  ;;  %9294 = vmatprep.mubr.msk.bf16.mxu0 %vm436_vm5, %v11847_v17  ;;  %v5221_v17 = vrot.slane %v4949_v13, 6  ;;  %v5488_v20 = vrot.slane %v5218_v50, 6  ;;  %v1751_v50 = vrot.slane %v11641_v49, 7  ;;  %v10500_v49 = vld [vmem:[%s10578_s25 + $0x60] sm:$0xf] }
  0xdb   : > { %8854 = vmatprep.mubr.msk.bf16.mxu1 %vm436_vm5, %v7838_v42  ;;  %v5210_v42 = vrot.slane %v11823_v58, 6  ;;  %v4942_v31 = vsel %vm10639_vm6, %v4937_v6, %v4941_v54  ;;  %v5484_v54 = vrot.slane %v11826_v26, 7  ;;  %v13511_v26 = vld [vmem:[#allocation70_spill] sm:$0xff] }
  0xdc   : > { %v5222_v57 = vor.u32 %v5221_v17, %v5220_v1  ;;  %v10499_v1 = vld [vmem:[%s10578_s25 + $0x64] sm:$0xf] }
  0xdd   : > { %v5211_v25 = vor.u32 %v5210_v42, %v5209_v60  ;;  %v5479_v60 = vrot.slane %v11820_v21, 6  ;;  %v5483_v42 = vrot.slane %v11829_v45, 6  ;;  %v11912_v21 = vcombine.low %v4942_v31, %v4952_v15  ;;  %v13514_v15 = vld [vmem:[#allocation3_spill] sm:$0xff] }
  0xde   : > { %v5223_v17 = vsel %vm10668_vm7, %v5217_v0, %v5222_v57  ;;  %v2248_v0 = vrot.slane %v10499_v1, 5  ;;  %v1753_v57 = vrot.slane %v1751_v50, 4  ;;  %v1754_v31 = vrot.slane %v11512_v32, 7  ;;  %v11944_v32 = vld [vmem:[%s13043_s1 + $0x40] sm:$0x3] }
  0xdf   : > { %v5212_v11 = vrot.slane %v5211_v25, 4  ;;  %v5485_v28 = vor.u32 %v5484_v54, %v5483_v42  ;;  %v5490_v25 = vor.u32 %v5489_v3, %v5488_v20  ;;  %v10501_v42 = vld [vmem:[%s10578_s25 + $0x68] sm:$0x7] }
  0xe0   : > { %v2251_v54 = vrot.slane %v10501_v42, 5  ;;  %v13515_v20 = vld [vmem:[#allocation43_spill] sm:$0xff]  ;;  %v1755_v3 = vsel %vm11411_vm3, %v1753_v57, %v1754_v31  ;;  %v1761_v31 = vrot.slane %v11542_v56, 7  ;;  %v4139_v56 = vrot.slane %v10507_v62, 5 }
  0xe1   : > { %v5216_v18 = vsel %vm10668_vm7, %v5212_v11, %v5215_v38  ;;  %9295 = vmatmul.mubr.msk.bf16.gmra.mrb[8].mxu0 %vm436_vm5, %v11869_v16  ;;  %v5487_v6 = vrot.slane %v5485_v28, 4  ;;  %v13513_v11 = vld [vmem:[#allocation22_spill] sm:$0xff] }
  0xe2   : > { %8855 = vmatmul.mubr.msk.bf16.vlgmr.msra.gmra.mrb[0].mxu1 %vm436_vm5, %v11713_v14  ;;  %9298 = vmatprep.mubr.msk.bf16.mxu0 %vm436_vm5, %v11881_v27  ;;  %v11910_v23 = vcombine.low %v5216_v18, %v5223_v17  ;;  %v7854_v18 = vrot.slane %v11649_v36, 11  ;;  %v2250_v17 = vrot.slane %v2248_v0, 4  ;;  %v1758_v36 = vrot.slane %v11667_v7, 7  ;;  %v10502_v7 = vld [vmem:[%s10578_s25 + $0x70] sm:$0xf] }
  0xe3   : > { %8871 = vmatpush3.bf16.msra.mxu1 %v1856_v34  ;;  %8858 = vmatprep.mubr.msk.bf16.mxu1 %vm436_vm5, %v11878_v12  ;;  %v5480_v34 = vrot.slane %v11823_v58, 7  ;;  %v5491_v13 = vsel %vm11141_vm14, %v5487_v6, %v5490_v25  ;;  %v3192_v25 = vrot.slane %v10502_v7, 5  ;;  %v10505_v7 = vld [vmem:[%s10578_s25 + $0x74] sm:$0x7] }
  0xe4   : > { %10421 = vmatprep.subr.msk.bf16.mxu1 %vm461_vm0, %v11886_v19  ;;  %13509 = vst [vmem:[#allocation48_spill] sm:$0xff] %v11910_v23  ;;  %v1760_v57 = vrot.slane %v1758_v36, 4 }
  0xe5   : > { %v5481_v46 = vor.u32 %v5480_v34, %v5479_v60  ;;  %v5233_v60 = vsel %vm461_vm0, %v11815_v33, 0  ;;  %v7899_v34 = vrot.slane %v10500_v49, 9  ;;  %v1752_v33 = vsel %vm11411_vm3, %v7854_v18, %v1751_v50  ;;  %v10503_v50 = vld [vmem:[%s10578_s25 + $0x7c] sm:$0xf] }
  0xe6   : > { %v4136_v1 = vrot.slane %v10503_v50, 5  ;;  %v7855_v18 = vrot.slane %v11692_v40, 11  ;;  %v1768_v49 = vrot.slane %v11574_v52, 7  ;;  %v3195_v50 = vrot.slane %v10505_v7, 5  ;;  %v10506_v40 = vld [vmem:[%s10578_s25 + $0x78] sm:$0xf] }
  0xe7   : > { %v5482_v58 = vrot.slane %v5481_v46, 4  ;;  %v13516_v46 = vld [vmem:[#allocation77_spill] sm:$0xff] }
  0xe8   : > { %v1759_v52 = vsel %vm11411_vm3, %v7855_v18, %v1758_v36 }
  0xe9   : > { %v5486_v45 = vsel %vm11141_vm14, %v5482_v58, %v5485_v28  ;;  %9299 = vmatmul.mubr.msk.bf16.gmra.mrb[12].mxu0 %vm436_vm5, %v11912_v21  ;;  %v1765_v28 = vrot.slane %v11682_v29, 7  ;;  %v13517_v58 = vld [vmem:[#allocation79_spill] sm:$0xff]  ;;  %v7863_v29 = vcombine.low %v1752_v33, %v1755_v3  ;;  %v8045_v33 = vrot.slane %v10506_v40, 9 }
  0xea   : > { %8859 = vmatmul.mubr.msk.bf16.gmra.mrb[4].mxu1 %vm436_vm5, %v13510_v47  ;;  %v11925_v38 = vcombine.low %v5486_v45, %v5491_v13  ;;  %9304 = vmatprep.mubr.msk.bf16.mxu0 %vm436_vm5, %v13513_v11  ;;  %v2249_v45 = vsel %vm11213_vm15, %v7899_v34, %v2248_v0  ;;  %v2252_v13 = vsel %vm11213_vm15, %v2250_v17, %v2251_v54  ;;  %v10504_v17 = vld [vmem:[%s10578_s25 + $0x6c] sm:$0xf]  ;;  %v3194_v54 = vrot.slane %v3192_v25, 4 }
  0xeb   : > { %8862 = vmatprep.mubr.msk.bf16.mxu1 %vm436_vm5, %v13511_v26  ;;  %v1767_v0 = vrot.slane %v1765_v28, 4  ;;  %v11967_v34 = vcombine.low %v2249_v45, %v2252_v13  ;;  %v7972_v42 = vrot.slane %v10504_v17, 9  ;;  %v4138_v3 = vrot.slane %v4136_v1, 4  ;;  %v13520_v45 = vld [vmem:[#allocation4_spill] sm:$0xff] }
  0xec   : > { %13512 = vst [vmem:[#allocation10_spill] sm:$0xff] %v11925_v38  ;;  %v3196_v36 = vsel %vm11213_vm15, %v3194_v54, %v3195_v50  ;;  %v5083_v54 = vrot.slane %v11841_v8, 5  ;;  %v2377_v40 = vrot.slane %v11266_v10, 5 }
  0xed   : > { %v1769_v17 = vsel %vm11411_vm3, %v1767_v0, %v1768_v49  ;;  %v3193_v62 = vsel %vm11213_vm15, %v7972_v42, %v3192_v25  ;;  %v8118_v49 = vrot.slane %v11752_v4, 9 }
  0xee   : > { %v12003_v0 = vcombine.low %v3193_v62, %v3196_v36 }
  0xf1   : > { %9305 = vmatmul.mubr.msk.bf16.vlgmr.msra.gmra.mrb[0].mxu0 %vm436_vm5, %v13516_v46 }
  0xf2   : > { %8863 = vmatmul.mubr.msk.bf16.gmra.mrb[8].mxu1 %vm436_vm5, %v13514_v15  ;;  %9321 = vmatpush3.bf16.msra.mxu0 %v5233_v60  ;;  %v7856_v60 = vrot.slane %v11699_v5, 11  ;;  %v1762_v5 = vsel %vm11411_vm3, %v1760_v57, %v1761_v31  ;;  %v4137_v57 = vsel %vm11213_vm15, %v8045_v33, %v4136_v1  ;;  %v12012_v1 = vld [vmem:[%s13043_s1 + $0x10] sm:$0x3]  ;;  %v2378_v33 = vrot.slane %v11274_v48, 6 }
  0xf3   : > { %8866 = vmatprep.mubr.msk.bf16.mxu1 %vm436_vm5, %v13515_v20  ;;  %9308 = vmatprep.mubr.msk.bf16.mxu0 %vm436_vm5, %v13517_v58  ;;  %v11993_v18 = vcombine.low %v1759_v52, %v1762_v5  ;;  %v13522_v52 = vld [vmem:[#allocation76_spill] sm:$0xff]  ;;  %v13523_v5 = vld [vmem:[#allocation78_spill] sm:$0xff] }
  0xf4   : > { %10447 = vmatprep.subr.msk.bf16.mxu0 %vm461_vm0, %v11944_v32  ;;  %v1766_v13 = vsel %vm11411_vm3, %v7856_v60, %v1765_v28  ;;  %v4140_v28 = vsel %vm11213_vm15, %v4138_v3, %v4139_v56  ;;  %v1982_v60 = vsel %vm461_vm0, %v11886_v19, 0  ;;  %v2381_v3 = vrot.slane %v11286_v44, 5 }
  0xf5   : > { %v11999_v31 = vcombine.low %v1766_v13, %v1769_v17  ;;  %v12005_v25 = vcombine.low %v4137_v57, %v4140_v28  ;;  %v2382_v56 = vrot.slane %v11277_v51, 6  ;;  %v2379_v13 = vor.u32 %v2378_v33, %v2377_v40  ;;  %v13524_v17 = vld [vmem:[#allocation52_spill] sm:$0xff]  ;;  %v13528_v40 = vld [vmem:[#allocation71_spill] sm:$0xff] }
  0xf6   : > { %v13525_v48 = vshrl.u32 %v13524_v17, 16  ;;  %v2389_v44 = vrot.slane %v13493_v37, 6  ;;  %v5364_v51 = vsel %vm461_vm0, %v11944_v32, 0  ;;  %v3322_v57 = vrot.slane %v13486_v59, 6  ;;  %v13530_v59 = vld [vmem:[#allocation35_spill] sm:$0xff] }
  0xf7   : > { %v2383_v10 = vor.u32 %v2382_v56, %v2381_v3  ;;  %v2380_v36 = vrot.slane %v2379_v13, 4  ;;  %v4266_v37 = vrot.slane %v13496_v63, 6  ;;  %v4270_v33 = vrot.slane %v13528_v40, 6  ;;  %v13531_v3 = vld [vmem:[#allocation54_spill] sm:$0xff]  ;;  %v13534_v40 = vld [vmem:[#allocation59_spill] sm:$0xff] }
  0xf8   : > { %v2388_v62 = vrot.slane %v13525_v48, 5  ;;  %v13532_v56 = vshrl.u32 %v13531_v3, 16  ;;  %v13533_v63 = vld [vmem:[#allocation38_spill] sm:$0xff]  ;;  %v4277_v3 = vrot.slane %v13507_v55, 6 }
  0xf9   : > { %9309 = vmatmul.mubr.msk.bf16.gmra.mrb[4].mxu0 %vm436_vm5, %v13520_v45  ;;  %v2385_v28 = vrot.slane %v2383_v10, 4  ;;  %v2384_v13 = vsel %vm10668_vm7, %v2380_v36, %v2383_v10  ;;  %v13536_v36 = vld [vmem:[#allocation7_spill] sm:$0xff] }
  0xfa   : > { %8867 = vmatmul.mubr.msk.bf16.gmra.mrb[12].mxu1 %vm436_vm5, %v13519_v24  ;;  %9312 = vmatprep.mubr.msk.bf16.mxu0 %vm436_vm5, %v11967_v34 }
  0xfb   : > { %8872 = vmatprep.mubr.msk.bf16.mxu1 %vm436_vm5, %v7863_v29  ;;  %v5080_v29 = vrot.slane %v11755_v9, 5 }
  0xfd   : > { %v5082_v42 = vrot.slane %v5080_v29, 4  ;;  %v5081_v19 = vsel %vm11213_vm15, %v8118_v49, %v5080_v29  ;;  %v3321_v29 = vrot.slane %v13485_v35, 5  ;;  %v3325_v49 = vrot.slane %v13488_v39, 5  ;;  %v13529_v35 = vld [vmem:[#allocation5_spill] sm:$0xff]  ;;  %v8150_v39 = vld [vmem:[%s13043_s1 + $0x42] sm:$0x3] }
  0xff   : > { %v5084_v7 = vsel %vm11213_vm15, %v5082_v42, %v5083_v54  ;;  %v3326_v42 = vrot.slane %v13487_v61, 6  ;;  %v13526_v54 = vld [vmem:[#allocation80_spill] sm:$0xff]  ;;  %v3323_v61 = vor.u32 %v3322_v57, %v3321_v29  ;;  %v13535_v29 = vshrl.u32 %v13534_v40, 16  ;;  %v13545_v40 = vld [vmem:[#allocation69_spill] sm:$0xff] }
 0x100   : > { %v12028_v50 = vcombine.low %v5081_v19, %v5084_v7  ;;  %v4265_v19 = vrot.slane %v13495_v53, 5  ;;  %v13527_v7 = vld [vmem:[#allocation72_spill] sm:$0xff]  ;;  %v3332_v53 = vrot.slane %v13532_v56, 5 }
 0x101   : > { %9313 = vmatmul.mubr.msk.bf16.gmra.mrb[8].mxu0 %vm436_vm5, %v12003_v0  ;;  %v4269_v32 = vrot.slane %v13527_v7, 5  ;;  %v3327_v48 = vor.u32 %v3326_v42, %v3325_v49  ;;  %v4276_v57 = vrot.slane %v13535_v29, 5  ;;  %v3324_v56 = vrot.slane %v3323_v61, 4  ;;  %v13537_v49 = vld [vmem:[#allocation53_spill] sm:$0xff]  ;;  %v8161_v29 = vld [vmem:[%s13043_s1 + $0x44] sm:$0x3] }
 0x102   : > { %8873 = vmatmul.mubr.msk.bf16.vlgmr.msra.gmra.mrb[0].mxu1 %vm436_vm5, %v11993_v18  ;;  %9316 = vmatprep.mubr.msk.bf16.mxu0 %vm436_vm5, %v12005_v25  ;;  %13521 = vst [vmem:[#allocation12_spill] sm:$0xff] %v12028_v50  ;;  %v13538_v42 = vld [vmem:[#allocation17_spill] sm:$0xff] }
 0x103   : > { %8889 = vmatpush3.bf16.msra.mxu1 %v1982_v60  ;;  %8876 = vmatprep.mubr.msk.bf16.mxu1 %vm436_vm5, %v11999_v31  ;;  %v2390_v60 = vor.u32 %v2389_v44, %v2388_v62  ;;  %v3333_v62 = vrot.slane %v13504_v30, 6  ;;  %v4267_v44 = vor.u32 %v4266_v37, %v4265_v19  ;;  %v4271_v7 = vor.u32 %v4270_v33, %v4269_v32 }
 0x104   : > { %10422 = vmatprep.subr.msk.bf16.mxu1 %vm461_vm0, %v12012_v1  ;;  %v3329_v6 = vrot.slane %v3327_v48, 4  ;;  %v4278_v30 = vor.u32 %v4277_v3, %v4276_v57  ;;  %v3328_v55 = vsel %vm10668_vm7, %v3324_v56, %v3327_v48  ;;  %v2130_v33 = vsel %vm461_vm0, %v12012_v1, 0  ;;  %v13541_v1 = vld [vmem:[#allocation62_spill] sm:$0xff]  ;;  %v13542_v48 = vld [vmem:[#allocation65_spill] sm:$0xff]  ;;  %v13548_v56 = vld [vmem:[#allocation19_spill] sm:$0xff] }
 0x105   : > { %v2391_v17 = vsel %vm10668_vm7, %v2385_v28, %v2390_v60  ;;  %v3334_v10 = vor.u32 %v3333_v62, %v3332_v53  ;;  %v4268_v28 = vrot.slane %v4267_v44, 4  ;;  %v4273_v60 = vrot.slane %v4271_v7, 4  ;;  %v13543_v62 = vld [vmem:[#allocation41_spill] sm:$0xff]  ;;  %v13544_v44 = vld [vmem:[#allocation68_spill] sm:$0xff]  ;;  %v13546_v57 = vld [vmem:[#allocation50_spill] sm:$0xff] }
 0x106   : > { %v13547_v3 = vld [vmem:[#allocation57_spill] sm:$0xff] }
 0x107   : > { %v3335_v19 = vsel %vm10668_vm7, %v3329_v6, %v3334_v10  ;;  %v4272_v37 = vsel %vm10668_vm7, %v4268_v28, %v4271_v7  ;;  %v4279_v32 = vsel %vm10668_vm7, %v4273_v60, %v4278_v30  ;;  %v13540_v6 = vld [vmem:[#allocation61_spill] sm:$0xff]  ;;  %v5501_v7 = vsel %vm461_vm0, %v8150_v39, 0  ;;  %v13550_v10 = vld [vmem:[#allocation63_spill] sm:$0xff] }
 0x108   : > { %v12097_v61 = vcombine.low %v3328_v55, %v3335_v19  ;;  %v12099_v53 = vcombine.low %v4272_v37, %v4279_v32  ;;  %v5350_v28 = vrot.slane %v11755_v9, 6  ;;  %v8139_v30 = vrot.slane %v11752_v4, 10  ;;  %v7910_v19 = vld [vmem:[%s13043_s1 + $0x14] sm:$0x3]  ;;  %v13551_v37 = vld [vmem:[#allocation33_spill] sm:$0xff] }
 0x109   : > { %9317 = vmatmul.mubr.msk.bf16.gmra.mrb[12].mxu0 %vm436_vm5, %v12028_v50  ;;  %v5353_v55 = vrot.slane %v11841_v8, 6  ;;  %v13552_v32 = vld [vmem:[#allocation36_spill] sm:$0xff] }
 0x10a   : > { %8877 = vmatmul.mubr.msk.bf16.gmra.mrb[4].mxu1 %vm436_vm5, %v13522_v52  ;;  %9322 = vmatprep.mubr.msk.bf16.mxu0 %vm436_vm5, %v13469_v22 }
 0x10b   : > { %8880 = vmatprep.mubr.msk.bf16.mxu1 %vm436_vm5, %v13523_v5 }
 0x111   : > { %9323 = vmatmul.mubr.msk.bf16.vlgmr.msra.gmra.mrb[0].mxu0 %vm436_vm5, %v13530_v59 }
 0x112   : > { %8881 = vmatmul.mubr.msk.bf16.gmra.mrb[8].mxu1 %vm436_vm5, %v13526_v54  ;;  %9339 = vmatpush3.bf16.msra.mxu0 %v5364_v51  ;;  %v12077_v51 = vcombine.low %v2384_v13, %v2391_v17  ;;  %v7900_v13 = vld [vmem:[%s13043_s1 + $0x12] sm:$0x3]  ;;  %v13539_v17 = vld [vmem:[#allocation58_spill] sm:$0xff] }
 0x113   : > { %8884 = vmatprep.mubr.msk.bf16.mxu1 %vm436_vm5, %v13529_v35  ;;  %9326 = vmatprep.mubr.msk.bf16.mxu0 %vm436_vm5, %v13533_v63  ;;  %v2262_v60 = vsel %vm461_vm0, %v7900_v13, 0 }
 0x114   : > { %10448 = vmatprep.subr.msk.bf16.mxu0 %vm461_vm0, %v8150_v39  ;;  %v13549_v39 = vld [vmem:[#allocation25_spill] sm:$0xff] }
 0x119   : > { %9327 = vmatmul.mubr.msk.bf16.gmra.mrb[4].mxu0 %vm436_vm5, %v13538_v42 }
 0x11a   : > { %8885 = vmatmul.mubr.msk.bf16.gmra.mrb[12].mxu1 %vm436_vm5, %v13536_v36  ;;  %9330 = vmatprep.mubr.msk.bf16.mxu0 %vm436_vm5, %v12077_v51 }
 0x11b   : > { %8890 = vmatprep.mubr.msk.bf16.mxu1 %vm436_vm5, %v13537_v49  ;;  %v5352_v49 = vrot.slane %v5350_v28, 4 }
 0x11d   : > { %v5354_v2 = vsel %vm10908_vm9, %v5352_v49, %v5353_v55  ;;  %v13561_v49 = vld [vmem:[#allocation46_spill] sm:$0xff] }
 0x11e   : > { %v13563_v55 = vld [vmem:[#allocation26_spill] sm:$0xff] }
 0x121   : > { %9331 = vmatmul.mubr.msk.bf16.gmra.mrb[8].mxu0 %vm436_vm5, %v12097_v61 }
 0x122   : > { %8891 = vmatmul.mubr.msk.bf16.vlgmr.msra.gmra.mrb[0].mxu1 %vm436_vm5, %v13539_v17  ;;  %9334 = vmatprep.mubr.msk.bf16.mxu0 %vm436_vm5, %v12099_v53 }
 0x123   : > { %8907 = vmatpush3.bf16.msra.mxu1 %v2130_v33  ;;  %8894 = vmatprep.mubr.msk.bf16.mxu1 %vm436_vm5, %v13540_v6  ;;  %v13553_v33 = vld [vmem:[#allocation64_spill] sm:$0xff] }
 0x124   : > { %10423 = vmatprep.subr.msk.bf16.mxu1 %vm461_vm0, %v7900_v13  ;;  %v13554_v13 = vld [vmem:[#allocation66_spill] sm:$0xff] }
 0x129   : > { %9335 = vmatmul.mubr.msk.bf16.gmra.mrb[12].mxu0 %vm436_vm5, %v11910_v23 }
 0x12a   : > { %8895 = vmatmul.mubr.msk.bf16.gmra.mrb[4].mxu1 %vm436_vm5, %v13541_v1  ;;  %9340 = vmatprep.mubr.msk.bf16.mxu0 %vm436_vm5, %v13543_v62 }
 0x12b   : > { %8898 = vmatprep.mubr.msk.bf16.mxu1 %vm436_vm5, %v13542_v48 }
 0x131   : > { %9341 = vmatmul.mubr.msk.bf16.vlgmr.msra.gmra.mrb[0].mxu0 %vm436_vm5, %v13546_v57 }
 0x132   : > { %8899 = vmatmul.mubr.msk.bf16.gmra.mrb[8].mxu1 %vm436_vm5, %v13544_v44  ;;  %9357 = vmatpush3.bf16.msra.mxu0 %v5501_v7  ;;  %v13564_v7 = vld [vmem:[#allocation51_spill] sm:$0xff] }
 0x133   : > { %8902 = vmatprep.mubr.msk.bf16.mxu1 %vm436_vm5, %v13545_v40  ;;  %9344 = vmatprep.mubr.msk.bf16.mxu0 %vm436_vm5, %v13547_v3 }
 0x134   : > { %10449 = vmatprep.subr.msk.bf16.mxu0 %vm461_vm0, %v8161_v29 }
 0x139   : > { %9345 = vmatmul.mubr.msk.bf16.gmra.mrb[4].mxu0 %vm436_vm5, %v13506_v43 }
 0x13a   : > { %8903 = vmatmul.mubr.msk.bf16.gmra.mrb[12].mxu1 %vm436_vm5, %v13548_v56  ;;  %9348 = vmatprep.mubr.msk.bf16.mxu0 %vm436_vm5, %v13550_v10 }
 0x13b   : > { %8908 = vmatprep.mubr.msk.bf16.mxu1 %vm436_vm5, %v13549_v39  ;;  %v5351_v39 = vsel %vm10908_vm9, %v8139_v30, %v5350_v28  ;;  %v5632_v28 = vsel %vm461_vm0, %v8161_v29, 0  ;;  %v13560_v30 = vld [vmem:[#allocation56_spill] sm:$0xff]  ;;  %v13562_v29 = vld [vmem:[#allocation47_spill] sm:$0xff] }
 0x13c   : > { %v12162_v23 = vcombine.low %v5351_v39, %v5354_v2  ;;  %v8171_v2 = vld [vmem:[%s13043_s1 + $0x46] sm:$0x3]  ;;  %v2401_v39 = vsel %vm461_vm0, %v7910_v19, 0 }
 0x13e   : > { %13556 = vst [vmem:[#allocation24_spill] sm:$0xff] %v12162_v23 }
 0x141   : > { %9349 = vmatmul.mubr.msk.bf16.gmra.mrb[8].mxu0 %vm436_vm5, %v13553_v33  ;;  %v13571_v33 = vld [vmem:[#allocation20_spill] sm:$0xff] }
 0x142   : > { %8909 = vmatmul.mubr.msk.bf16.vlgmr.msra.gmra.mrb[0].mxu1 %vm436_vm5, %v13551_v37  ;;  %9352 = vmatprep.mubr.msk.bf16.mxu0 %vm436_vm5, %v13554_v13  ;;  %v13559_v13 = vld [vmem:[#allocation49_spill] sm:$0xff]  ;;  %v13572_v37 = vld [vmem:[#allocation15_spill] sm:$0xff] }
 0x143   : > { %8925 = vmatpush3.bf16.msra.mxu1 %v2262_v60  ;;  %8912 = vmatprep.mubr.msk.bf16.mxu1 %vm436_vm5, %v13552_v32  ;;  %v13557_v60 = vld [vmem:[#allocation39_spill] sm:$0xff]  ;;  %v13558_v32 = vld [vmem:[#allocation42_spill] sm:$0xff] }
 0x144   : > { %10424 = vmatprep.subr.msk.bf16.mxu1 %vm461_vm0, %v7910_v19  ;;  %v5758_v19 = vsel %vm461_vm0, %v8171_v2, 0 }
 0x149   : > { %9353 = vmatmul.mubr.msk.bf16.gmra.mrb[12].mxu0 %vm436_vm5, %v12162_v23  ;;  %v13565_v23 = vld [vmem:[#allocation74_spill] sm:$0xff] }
 0x14a   : > { %8913 = vmatmul.mubr.msk.bf16.gmra.mrb[4].mxu1 %vm436_vm5, %v13557_v60  ;;  %9358 = vmatprep.mubr.msk.bf16.mxu0 %vm436_vm5, %v13511_v26  ;;  %v13567_v60 = vld [vmem:[#allocation23_spill] sm:$0xff] }
 0x14b   : > { %8916 = vmatprep.mubr.msk.bf16.mxu1 %vm436_vm5, %v13558_v32 }
 0x151   : > { %9359 = vmatmul.mubr.msk.bf16.vlgmr.msra.gmra.mrb[0].mxu0 %vm436_vm5, %v13514_v15 }
 0x152   : > { %8917 = vmatmul.mubr.msk.bf16.gmra.mrb[8].mxu1 %vm436_vm5, %v13559_v13  ;;  %9375 = vmatpush3.bf16.msra.mxu0 %v5632_v28  ;;  %v7921_v28 = vld [vmem:[%s13043_s1 + $0x16] sm:$0x3] }
 0x153   : > { %8920 = vmatprep.mubr.msk.bf16.mxu1 %vm436_vm5, %v13560_v30  ;;  %9362 = vmatprep.mubr.msk.bf16.mxu0 %vm436_vm5, %v13515_v20 }
 0x154   : > { %10450 = vmatprep.subr.msk.bf16.mxu0 %vm461_vm0, %v8171_v2  ;;  %v13568_v2 = vld [vmem:[#allocation6_spill] sm:$0xff] }
 0x159   : > { %9363 = vmatmul.mubr.msk.bf16.gmra.mrb[4].mxu0 %vm436_vm5, %v13519_v24 }
 0x15a   : > { %8921 = vmatmul.mubr.msk.bf16.gmra.mrb[12].mxu1 %vm436_vm5, %v13561_v49  ;;  %9366 = vmatprep.mubr.msk.bf16.mxu0 %vm436_vm5, %v13563_v55 }
 0x15b   : > { %8926 = vmatprep.mubr.msk.bf16.mxu1 %vm436_vm5, %v13562_v29  ;;  %v13566_v29 = vld [vmem:[#allocation75_spill] sm:$0xff] }
 0x161   : > { %9367 = vmatmul.mubr.msk.bf16.gmra.mrb[8].mxu0 %vm436_vm5, %v13566_v29  ;;  %v5621_v29 = vrot.slane %v11841_v8, 7 }
 0x162   : > { %8927 = vmatmul.mubr.msk.bf16.vlgmr.msra.gmra.mrb[0].mxu1 %vm436_vm5, %v13564_v7  ;;  %9370 = vmatprep.mubr.msk.bf16.mxu0 %vm436_vm5, %v13567_v60  ;;  %v5618_v60 = vrot.slane %v11755_v9, 7  ;;  %v7931_v7 = vld [vmem:[%s13043_s1 + $0x18] sm:$0x3] }
 0x163   : > { %8943 = vmatpush3.bf16.msra.mxu1 %v2401_v39  ;;  %8930 = vmatprep.mubr.msk.bf16.mxu1 %vm436_vm5, %v13565_v23  ;;  %v8181_v39 = vld [vmem:[%s13043_s1 + $0x48] sm:$0x3] }
 0x164   : > { %10425 = vmatprep.subr.msk.bf16.mxu1 %vm461_vm0, %v7921_v28  ;;  %v5620_v23 = vrot.slane %v5618_v60, 4 }
 0x166   : > { %v5622_v8 = vsel %vm11411_vm3, %v5620_v23, %v5621_v29  ;;  %v8192_v23 = vld [vmem:[%s13043_s1 + $0x4a] sm:$0x3]  ;;  %v13576_v29 = vld [vmem:[#allocation82_spill] sm:$0xff] }
 0x169   : > { %9371 = vmatmul.mubr.msk.bf16.gmra.mrb[12].mxu0 %vm436_vm5, %v11925_v38  ;;  %v13569_v38 = vld [vmem:[#allocation8_spill] sm:$0xff] }
 0x16a   : > { %8931 = vmatmul.mubr.msk.bf16.gmra.mrb[4].mxu1 %vm436_vm5, %v13513_v11  ;;  %9376 = vmatprep.mubr.msk.bf16.mxu0 %vm436_vm5, %v13523_v5  ;;  %v8160_v11 = vrot.slane %v11752_v4, 11  ;;  %v13573_v4 = vld [vmem:[#allocation18_spill] sm:$0xff] }
 0x16b   : > { %8934 = vmatprep.mubr.msk.bf16.mxu1 %vm436_vm5, %v13516_v46 }
 0x16c   : > { %v5619_v9 = vsel %vm11411_vm3, %v8160_v11, %v5618_v60  ;;  %v5906_v11 = vsel %vm461_vm0, %v8181_v39, 0  ;;  %v13575_v60 = vld [vmem:[#allocation31_spill] sm:$0xff] }
 0x171   : > { %9377 = vmatmul.mubr.msk.bf16.vlgmr.msra.gmra.mrb[0].mxu0 %vm436_vm5, %v13526_v54 }
 0x172   : > { %8935 = vmatmul.mubr.msk.bf16.gmra.mrb[8].mxu1 %vm436_vm5, %v13517_v58  ;;  %9393 = vmatpush3.bf16.msra.mxu0 %v5758_v19  ;;  %v2532_v19 = vsel %vm461_vm0, %v7921_v28, 0  ;;  %v12255_v28 = vcombine.low %v5619_v9, %v5622_v8  ;;  %v13577_v9 = vld [vmem:[#allocation81_spill] sm:$0xff]  ;;  %v13578_v8 = vld [vmem:[#allocation40_spill] sm:$0xff] }
 0x173   : > { %8938 = vmatprep.mubr.msk.bf16.mxu1 %vm436_vm5, %v13520_v45  ;;  %9380 = vmatprep.mubr.msk.bf16.mxu0 %vm436_vm5, %v13529_v35 }
 0x174   : > { %10451 = vmatprep.subr.msk.bf16.mxu0 %vm461_vm0, %v8181_v39  ;;  %13574 = vst [vmem:[#allocation28_spill] sm:$0xff] %v12255_v28  ;;  %v2669_v39 = vsel %vm461_vm0, %v7931_v7, 0 }
 0x179   : > { %9381 = vmatmul.mubr.msk.bf16.gmra.mrb[4].mxu0 %vm436_vm5, %v13536_v36 }
 0x17a   : > { %8939 = vmatmul.mubr.msk.bf16.gmra.mrb[12].mxu1 %vm436_vm5, %v11967_v34  ;;  %9384 = vmatprep.mubr.msk.bf16.mxu0 %vm436_vm5, %v13569_v38 }
 0x17b   : > { %8944 = vmatprep.mubr.msk.bf16.mxu1 %vm436_vm5, %v13568_v2  ;;  %v13570_v2 = vld [vmem:[#allocation13_spill] sm:$0xff] }
 0x181   : > { %9385 = vmatmul.mubr.msk.bf16.gmra.mrb[8].mxu0 %vm436_vm5, %v13572_v37 }
 0x182   : > { %8945 = vmatmul.mubr.msk.bf16.vlgmr.msra.gmra.mrb[0].mxu1 %vm436_vm5, %v13570_v2  ;;  %9388 = vmatprep.mubr.msk.bf16.mxu0 %vm436_vm5, %v13573_v4 }
 0x183   : > { %8961 = vmatpush3.bf16.msra.mxu1 %v2532_v19  ;;  %8948 = vmatprep.mubr.msk.bf16.mxu1 %vm436_vm5, %v13571_v33  ;;  %v7942_v19 = vld [vmem:[%s13043_s1 + $0x1a] sm:$0x3] }
 0x184   : > { %10426 = vmatprep.subr.msk.bf16.mxu1 %vm461_vm0, %v7931_v7  ;;  %v12300_v7 = vld [vmem:[%s10578_s25 + $0x90] sm:$0xf] }
 0x189   : > { %9389 = vmatmul.mubr.msk.bf16.gmra.mrb[12].mxu0 %vm436_vm5, %v12255_v28  ;;  %v12307_v28 = vcombine.low %v12300_v7, %v12303_v41 }
 0x18a   : > { %8949 = vmatmul.mubr.msk.bf16.gmra.mrb[4].mxu1 %vm436_vm5, %v13469_v22  ;;  %9394 = vmatprep.mubr.msk.bf16.mxu0 %vm436_vm5, %v13542_v48  ;;  %v12349_v22 = vld [vmem:[%s10578_s25 + $0x98] sm:$0x7] }
 0x18b   : > { %8952 = vmatprep.mubr.msk.bf16.mxu1 %vm436_vm5, %v13530_v59  ;;  %13581 = vst [vmem:[#allocation30_spill] sm:$0xff] %v12307_v28  ;;  %v12358_v2 = vshll.u32 %v12349_v22, 16 }
 0x191   : > { %9395 = vmatmul.mubr.msk.bf16.vlgmr.msra.gmra.mrb[0].mxu0 %vm436_vm5, %v13544_v44 }
 0x192   : > { %8953 = vmatmul.mubr.msk.bf16.gmra.mrb[8].mxu1 %vm436_vm5, %v13533_v63  ;;  %9411 = vmatpush3.bf16.msra.mxu0 %v5906_v11  ;;  %v13579_v11 = vld [vmem:[#allocation83_spill] sm:$0xff] }
 0x193   : > { %8956 = vmatprep.mubr.msk.bf16.mxu1 %vm436_vm5, %v13538_v42  ;;  %9398 = vmatprep.mubr.msk.bf16.mxu0 %vm436_vm5, %v13545_v40 }
 0x194   : > { %10452 = vmatprep.subr.msk.bf16.mxu0 %vm461_vm0, %v8192_v23 }
 0x199   : > { %9399 = vmatmul.mubr.msk.bf16.gmra.mrb[4].mxu0 %vm436_vm5, %v13548_v56 }
 0x19a   : > { %8957 = vmatmul.mubr.msk.bf16.gmra.mrb[12].mxu1 %vm436_vm5, %v12077_v51  ;;  %9402 = vmatprep.mubr.msk.bf16.mxu0 %vm436_vm5, %v13576_v29 }
 0x19b   : > { %8962 = vmatprep.mubr.msk.bf16.mxu1 %vm436_vm5, %v13575_v60  ;;  %v13580_v60 = vld [vmem:[#allocation84_spill] sm:$0xff] }
 0x1a1   : > { %9403 = vmatmul.mubr.msk.bf16.gmra.mrb[8].mxu0 %vm436_vm5, %v13579_v11 }
 0x1a2   : > { %8963 = vmatmul.mubr.msk.bf16.vlgmr.msra.gmra.mrb[0].mxu1 %vm436_vm5, %v13577_v9  ;;  %9406 = vmatprep.mubr.msk.bf16.mxu0 %vm436_vm5, %v13580_v60  ;;  %v8202_v60 = vld [vmem:[%s13043_s1 + $0x4c] sm:$0x3] }
 0x1a3   : > { %8979 = vmatpush3.bf16.msra.mxu1 %v2669_v39  ;;  %8966 = vmatprep.mubr.msk.bf16.mxu1 %vm436_vm5, %v13578_v8  ;;  %v6038_v39 = vsel %vm461_vm0, %v8192_v23, 0  ;;  %v12333_v23 = vshll.u32 %v12300_v7, 16  ;;  %v12339_v8 = vshrl.u32 %v12303_v41, 16 }
 0x1a4   : > { %10427 = vmatprep.subr.msk.bf16.mxu1 %vm461_vm0, %v7942_v19 }
 0x1a5   : > { %v5889_v4 = vrot.slane %v12339_v8, 4 }
 0x1a9   : > { %9407 = vmatmul.mubr.msk.bf16.gmra.mrb[12].mxu0 %vm436_vm5, %v12307_v28  ;;  %v12330_v28 = vshrl.u32 %v12300_v7, 16 }
 0x1aa   : > { %8967 = vmatmul.mubr.msk.bf16.gmra.mrb[4].mxu1 %vm436_vm5, %v13543_v62  ;;  %9412 = vmatprep.mubr.msk.bf16.mxu0 %vm436_vm5, %v13558_v32  ;;  %v12336_v62 = vshll.u32 %v12303_v41, 16 }
 0x1ab   : > { %8970 = vmatprep.mubr.msk.bf16.mxu1 %vm436_vm5, %v13546_v57  ;;  %v5876_v11 = vrot.slane %v12330_v28, 4 }
 0x1ac   : > { %v5885_v9 = vrot.slane %v12336_v62, 5 }
 0x1ae   : > { %v5890_v37 = vor.u32 %v5889_v4, %v5885_v9 }
 0x1b0   : > { %v5891_v32 = vrot.slane %v5890_v37, 4 }
 0x1b1   : > { %9413 = vmatmul.mubr.msk.bf16.vlgmr.msra.gmra.mrb[0].mxu0 %vm436_vm5, %v13559_v13 }
 0x1b2   : > { %8971 = vmatmul.mubr.msk.bf16.gmra.mrb[8].mxu1 %vm436_vm5, %v13547_v3  ;;  %9429 = vmatpush3.bf16.msra.mxu0 %v6038_v39  ;;  %v5879_v39 = vrot.slane %v12333_v23, 5 }
 0x1b3   : > { %8974 = vmatprep.mubr.msk.bf16.mxu1 %vm436_vm5, %v13506_v43  ;;  %9416 = vmatprep.mubr.msk.bf16.mxu0 %vm436_vm5, %v13560_v30  ;;  %v2800_v30 = vsel %vm461_vm0, %v7942_v19, 0 }
 0x1b4   : > { %10453 = vmatprep.subr.msk.bf16.mxu0 %vm461_vm0, %v8202_v60  ;;  %v5880_v33 = vor.u32 %v5879_v39, %v5876_v11  ;;  %v7962_v39 = vld [vmem:[%s13043_s1 + $0x1e] sm:$0x3] }
 0x1b6   : > { %v5881_v13 = vrot.slane %v5880_v33, 4 }
 0x1b8   : > { %v5886_v33 = vsel %vm10639_vm6, %v5881_v13, %v5885_v9  ;;  %v6177_v13 = vsel %vm461_vm0, %v8202_v60, 0  ;;  %v8191_v9 = vrot.slane %v12300_v7, 9  ;;  %v6027_v60 = vrot.slane %v12349_v22, 5 }
 0x1b9   : > { %9417 = vmatmul.mubr.msk.bf16.gmra.mrb[4].mxu0 %vm436_vm5, %v13561_v49 }
 0x1ba   : > { %8975 = vmatmul.mubr.msk.bf16.gmra.mrb[12].mxu1 %vm436_vm5, %v13550_v10  ;;  %9420 = vmatprep.mubr.msk.bf16.mxu0 %vm436_vm5, %v11869_v16  ;;  %v5895_v10 = vrot.slane %v12358_v2, 5 }
 0x1bb   : > { %8980 = vmatprep.mubr.msk.bf16.mxu1 %vm436_vm5, %v11713_v14  ;;  %v7952_v14 = vld [vmem:[%s13043_s1 + $0x1c] sm:$0x3] }
 0x1bc   : > { %v5896_v4 = vsel %vm10639_vm6, %v5891_v32, %v5895_v10  ;;  %v8213_v10 = vld [vmem:[%s13043_s1 + $0x4e] sm:$0x3]  ;;  %v6024_v32 = vrot.slane %v12303_v41, 5 }
 0x1bd   : > { %v12378_v19 = vcombine.low %v5886_v33, %v5896_v4 }
 0x1be   : > { %v6026_v11 = vrot.slane %v6024_v32, 4 }
 0x1c0   : > { %v6028_v33 = vsel %vm11213_vm15, %v6026_v11, %v6027_v60  ;;  %v6158_v11 = vrot.slane %v12336_v62, 6  ;;  %v13292_v60 = vshrl.u32 %v12349_v22, 16 }
 0x1c1   : > { %9421 = vmatmul.mubr.msk.bf16.gmra.mrb[8].mxu0 %vm436_vm5, %v11881_v27 }
 0x1c2   : > { %8981 = vmatmul.mubr.msk.bf16.vlgmr.msra.gmra.mrb[0].mxu1 %vm436_vm5, %v11878_v12  ;;  %9424 = vmatprep.mubr.msk.bf16.mxu0 %vm436_vm5, %v11912_v21 }
 0x1c3   : > { %8997 = vmatpush3.bf16.msra.mxu1 %v2800_v30  ;;  %8984 = vmatprep.mubr.msk.bf16.mxu1 %vm436_vm5, %v13510_v47  ;;  %v2926_v30 = vsel %vm461_vm0, %v7952_v14, 0 }
 0x1c4   : > { %10428 = vmatprep.subr.msk.bf16.mxu1 %vm461_vm0, %v7952_v14  ;;  %v6025_v14 = vsel %vm11213_vm15, %v8191_v9, %v6024_v32  ;;  %v8223_v32 = vld [vmem:[%s13043_s1 + $0x50] sm:$0x3]  ;;  %v6157_v9 = vrot.slane %v12339_v8, 5 }
 0x1c5   : > { %v12429_v4 = vcombine.low %v6025_v14, %v6028_v33 }
 0x1c6   : > { %v6159_v33 = vor.u32 %v6158_v11, %v6157_v9  ;;  %v6294_v11 = vrot.slane %v12303_v41, 6 }
 0x1c7   : > { %13584 = vst [vmem:[#allocation29_spill] sm:$0xff] %v12429_v4 }
 0x1c9   : > { %9425 = vmatmul.mubr.msk.bf16.gmra.mrb[12].mxu0 %vm436_vm5, %v12378_v19 }
 0x1ca   : > { %8985 = vmatmul.mubr.msk.bf16.gmra.mrb[4].mxu1 %vm436_vm5, %v13511_v26  ;;  %9430 = vmatprep.mubr.msk.bf16.mxu0 %vm436_vm5, %v13516_v46 }
 0x1cb   : > { %8988 = vmatprep.mubr.msk.bf16.mxu1 %vm436_vm5, %v13514_v15 }
 0x1d1   : > { %9431 = vmatmul.mubr.msk.bf16.vlgmr.msra.gmra.mrb[0].mxu0 %vm436_vm5, %v13517_v58 }
 0x1d2   : > { %8989 = vmatmul.mubr.msk.bf16.gmra.mrb[8].mxu1 %vm436_vm5, %v13515_v20  ;;  %9447 = vmatpush3.bf16.msra.mxu0 %v6177_v13  ;;  %v6308_v13 = vsel %vm461_vm0, %v8213_v10, 0 }
 0x1d3   : > { %8992 = vmatprep.mubr.msk.bf16.mxu1 %vm436_vm5, %v13519_v24  ;;  %9434 = vmatprep.mubr.msk.bf16.mxu0 %vm436_vm5, %v13520_v45 }
 0x1d4   : > { %10454 = vmatprep.subr.msk.bf16.mxu0 %vm461_vm0, %v8213_v10  ;;  %v6154_v10 = vrot.slane %v12333_v23, 6 }
 0x1d9   : > { %9435 = vmatmul.mubr.msk.bf16.gmra.mrb[4].mxu0 %vm436_vm5, %v11967_v34 }
 0x1da   : > { %8993 = vmatmul.mubr.msk.bf16.gmra.mrb[12].mxu1 %vm436_vm5, %v13563_v55  ;;  %9438 = vmatprep.mubr.msk.bf16.mxu0 %vm436_vm5, %v12003_v0 }
 0x1db   : > { %8998 = vmatprep.mubr.msk.bf16.mxu1 %vm436_vm5, %v11993_v18  ;;  %v6165_v18 = vrot.slane %v12358_v2, 6 }
 0x1e1   : > { %9439 = vmatmul.mubr.msk.bf16.gmra.mrb[8].mxu0 %vm436_vm5, %v12005_v25 }
 0x1e2   : > { %8999 = vmatmul.mubr.msk.bf16.vlgmr.msra.gmra.mrb[0].mxu1 %vm436_vm5, %v11999_v31  ;;  %9442 = vmatprep.mubr.msk.bf16.mxu0 %vm436_vm5, %v12028_v50 }
 0x1e3   : > { %9015 = vmatpush3.bf16.msra.mxu1 %v2926_v30  ;;  %9002 = vmatprep.mubr.msk.bf16.mxu1 %vm436_vm5, %v13522_v52  ;;  %v6153_v30 = vrot.slane %v12330_v28, 5 }
 0x1e4   : > { %10429 = vmatprep.subr.msk.bf16.mxu1 %vm461_vm0, %v7962_v39 }
 0x1e5   : > { %v6155_v14 = vor.u32 %v6154_v10, %v6153_v30 }
 0x1e7   : > { %v6156_v50 = vrot.slane %v6155_v14, 4 }
 0x1e9   : > { %9443 = vmatmul.mubr.msk.bf16.gmra.mrb[12].mxu0 %vm436_vm5, %v12429_v4  ;;  %v3074_v4 = vsel %vm461_vm0, %v7962_v39, 0  ;;  %v13585_v39 = vld [vmem:[#allocation48_spill] sm:$0xff]  ;;  %v6160_v30 = vsel %vm10668_vm7, %v6156_v50, %v6159_v33  ;;  %v6445_v50 = vsel %vm461_vm0, %v8223_v32, 0 }
 0x1ea   : > { %9003 = vmatmul.mubr.msk.bf16.gmra.mrb[4].mxu1 %vm436_vm5, %v13523_v5  ;;  %9448 = vmatprep.mubr.msk.bf16.mxu0 %vm436_vm5, %v13530_v59  ;;  %v6161_v5 = vrot.slane %v6159_v33, 4  ;;  %v8212_v33 = vrot.slane %v12300_v7, 10 }
 0x1eb   : > { %9006 = vmatprep.mubr.msk.bf16.mxu1 %vm436_vm5, %v13526_v54 }
 0x1f1   : > { %9449 = vmatmul.mubr.msk.bf16.vlgmr.msra.gmra.mrb[0].mxu0 %vm436_vm5, %v13533_v63 }
 0x1f2   : > { %9007 = vmatmul.mubr.msk.bf16.gmra.mrb[8].mxu1 %vm436_vm5, %v13529_v35  ;;  %9465 = vmatpush3.bf16.msra.mxu0 %v6308_v13  ;;  %v6164_v13 = vrot.slane %v13292_v60, 5  ;;  %v13593_v60 = vld [vmem:[#allocation66_spill] sm:$0xff] }
 0x1f3   : > { %9010 = vmatprep.mubr.msk.bf16.mxu1 %vm436_vm5, %v13536_v36  ;;  %9452 = vmatprep.mubr.msk.bf16.mxu0 %vm436_vm5, %v13538_v42 }
 0x1f4   : > { %10455 = vmatprep.subr.msk.bf16.mxu0 %vm461_vm0, %v8223_v32  ;;  %v6166_v52 = vor.u32 %v6165_v18, %v6164_v13  ;;  %v13590_v32 = vld [vmem:[#allocation64_spill] sm:$0xff]  ;;  %v6296_v13 = vrot.slane %v6294_v11, 4 }
 0x1f6   : > { %v6167_v10 = vsel %vm10668_vm7, %v6161_v5, %v6166_v52  ;;  %v8234_v52 = vld [vmem:[%s13043_s1 + $0x52] sm:$0x3]  ;;  %v13588_v5 = vld [vmem:[#allocation33_spill] sm:$0xff] }
 0x1f7   : > { %v12485_v9 = vcombine.low %v6160_v30, %v6167_v10  ;;  %v6297_v30 = vrot.slane %v12349_v22, 6  ;;  %v7983_v10 = vld [vmem:[%s13043_s1 + $0x22] sm:$0x3] }
 0x1f9   : > { %9453 = vmatmul.mubr.msk.bf16.gmra.mrb[4].mxu0 %vm436_vm5, %v12077_v51  ;;  %13587 = vst [vmem:[#allocation44_spill] sm:$0xff] %v12485_v9 }
 0x1fa   : > { %9011 = vmatmul.mubr.msk.bf16.gmra.mrb[12].mxu1 %vm436_vm5, %v13569_v38  ;;  %9456 = vmatprep.mubr.msk.bf16.mxu0 %vm436_vm5, %v12097_v61 }
 0x1fb   : > { %9016 = vmatprep.mubr.msk.bf16.mxu1 %vm436_vm5, %v13539_v17  ;;  %v7973_v17 = vld [vmem:[%s13043_s1 + $0x20] sm:$0x3] }
 0x1fc   : > { %v3206_v14 = vsel %vm461_vm0, %v7973_v17, 0 }
 0x201   : > { %9457 = vmatmul.mubr.msk.bf16.gmra.mrb[8].mxu0 %vm436_vm5, %v12099_v53 }
 0x202   : > { %9017 = vmatmul.mubr.msk.bf16.vlgmr.msra.gmra.mrb[0].mxu1 %vm436_vm5, %v13540_v6  ;;  %9460 = vmatprep.mubr.msk.bf16.mxu0 %vm436_vm5, %v13585_v39  ;;  %v6298_v39 = vsel %vm10908_vm9, %v6296_v13, %v6297_v30  ;;  %v6428_v13 = vrot.slane %v12336_v62, 7  ;;  %v13600_v30 = vld [vmem:[#allocation51_spill] sm:$0xff]  ;;  %v3345_v62 = vsel %vm461_vm0, %v7983_v10, 0 }
 0x203   : > { %9033 = vmatpush3.bf16.msra.mxu1 %v3074_v4  ;;  %9020 = vmatprep.mubr.msk.bf16.mxu1 %vm436_vm5, %v13541_v1  ;;  %v13589_v4 = vld [vmem:[#allocation63_spill] sm:$0xff]  ;;  %v13603_v1 = vld [vmem:[#allocation74_spill] sm:$0xff] }
 0x204   : > { %10430 = vmatprep.subr.msk.bf16.mxu1 %vm461_vm0, %v7973_v17  ;;  %v13594_v17 = vld [vmem:[#allocation24_spill] sm:$0xff] }
 0x209   : > { %9461 = vmatmul.mubr.msk.bf16.gmra.mrb[12].mxu0 %vm436_vm5, %v12485_v9  ;;  %v6295_v9 = vsel %vm10908_vm9, %v8212_v33, %v6294_v11  ;;  %v6576_v11 = vsel %vm461_vm0, %v8234_v52, 0  ;;  %v6427_v33 = vrot.slane %v12339_v8, 6  ;;  %v6433_v8 = vrot.slane %v12358_v2, 7  ;;  %v13606_v2 = vld [vmem:[#allocation10_spill] sm:$0xff] }
 0x20a   : > { %9021 = vmatmul.mubr.msk.bf16.gmra.mrb[4].mxu1 %vm436_vm5, %v13542_v48  ;;  %9466 = vmatprep.mubr.msk.bf16.mxu0 %vm436_vm5, %v13546_v57  ;;  %v12536_v48 = vcombine.low %v6295_v9, %v6298_v39  ;;  %v8244_v39 = vld [vmem:[%s13043_s1 + $0x54] sm:$0x3]  ;;  %v6423_v9 = vrot.slane %v12330_v28, 6 }
 0x20b   : > { %9024 = vmatprep.mubr.msk.bf16.mxu1 %vm436_vm5, %v13544_v44  ;;  %v6429_v28 = vor.u32 %v6428_v13, %v6427_v33  ;;  %v6562_v13 = vrot.slane %v12303_v41, 7  ;;  %v13614_v41 = vld [vmem:[#allocation28_spill] sm:$0xff] }
 0x20c   : > { %13596 = vst [vmem:[#allocation9_spill] sm:$0xff] %v12536_v48 }
 0x211   : > { %9467 = vmatmul.mubr.msk.bf16.vlgmr.msra.gmra.mrb[0].mxu0 %vm436_vm5, %v13547_v3 }
 0x212   : > { %9025 = vmatmul.mubr.msk.bf16.gmra.mrb[8].mxu1 %vm436_vm5, %v13545_v40  ;;  %9483 = vmatpush3.bf16.msra.mxu0 %v6445_v50  ;;  %v13591_v50 = vld [vmem:[#allocation36_spill] sm:$0xff] }
 0x213   : > { %9028 = vmatprep.mubr.msk.bf16.mxu1 %vm436_vm5, %v13548_v56  ;;  %9470 = vmatprep.mubr.msk.bf16.mxu0 %vm436_vm5, %v13506_v43 }
 0x214   : > { %10456 = vmatprep.subr.msk.bf16.mxu0 %vm461_vm0, %v8234_v52  ;;  %v6424_v52 = vrot.slane %v12333_v23, 7  ;;  %v13602_v23 = vshrl.u32 %v12349_v22, 16 }
 0x216   : > { %v6425_v18 = vor.u32 %v6424_v52, %v6423_v9  ;;  %v13604_v9 = vld [vmem:[#allocation22_spill] sm:$0xff]  ;;  %v13605_v52 = vld [vmem:[#allocation23_spill] sm:$0xff] }
 0x219   : > { %9471 = vmatmul.mubr.msk.bf16.gmra.mrb[4].mxu0 %vm436_vm5, %v13589_v4 }
 0x21a   : > { %9029 = vmatmul.mubr.msk.bf16.gmra.mrb[12].mxu1 %vm436_vm5, %v13576_v29  ;;  %9474 = vmatprep.mubr.msk.bf16.mxu0 %vm436_vm5, %v13590_v32 }
 0x21b   : > { %9034 = vmatprep.mubr.msk.bf16.mxu1 %vm436_vm5, %v13588_v5  ;;  %v13592_v5 = vld [vmem:[#allocation39_spill] sm:$0xff] }
 0x221   : > { %9475 = vmatmul.mubr.msk.bf16.gmra.mrb[8].mxu0 %vm436_vm5, %v13593_v60  ;;  %v6431_v60 = vrot.slane %v6429_v28, 4 }
 0x222   : > { %9035 = vmatmul.mubr.msk.bf16.vlgmr.msra.gmra.mrb[0].mxu1 %vm436_vm5, %v13591_v50  ;;  %9478 = vmatprep.mubr.msk.bf16.mxu0 %vm436_vm5, %v13594_v17  ;;  %v13599_v17 = vld [vmem:[#allocation56_spill] sm:$0xff] }
 0x223   : > { %9051 = vmatpush3.bf16.msra.mxu1 %v3206_v14  ;;  %9038 = vmatprep.mubr.msk.bf16.mxu1 %vm436_vm5, %v13592_v5  ;;  %v13597_v14 = vld [vmem:[#allocation42_spill] sm:$0xff]  ;;  %v13598_v5 = vld [vmem:[#allocation49_spill] sm:$0xff] }
 0x224   : > { %10431 = vmatprep.subr.msk.bf16.mxu1 %vm461_vm0, %v7983_v10 }
 0x229   : > { %9479 = vmatmul.mubr.msk.bf16.gmra.mrb[12].mxu0 %vm436_vm5, %v12536_v48  ;;  %v6432_v48 = vrot.slane %v13602_v23, 6  ;;  %v8233_v23 = vrot.slane %v12300_v7, 11 }
 0x22a   : > { %9039 = vmatmul.mubr.msk.bf16.gmra.mrb[4].mxu1 %vm436_vm5, %v13597_v14  ;;  %9484 = vmatprep.mubr.msk.bf16.mxu0 %vm436_vm5, %v13514_v15  ;;  %v6426_v14 = vrot.slane %v6425_v18, 4 }
 0x22b   : > { %9042 = vmatprep.mubr.msk.bf16.mxu1 %vm436_vm5, %v13598_v5  ;;  %v6434_v50 = vor.u32 %v6433_v8, %v6432_v48  ;;  %v6564_v8 = vrot.slane %v6562_v13, 4  ;;  %v6563_v7 = vsel %vm11411_vm3, %v8233_v23, %v6562_v13 }
 0x22c   : > { %v6430_v18 = vsel %vm11141_vm14, %v6426_v14, %v6429_v28  ;;  %v6702_v14 = vsel %vm461_vm0, %v8244_v39, 0 }
 0x22d   : > { %v6435_v10 = vsel %vm11141_vm14, %v6431_v60, %v6434_v50  ;;  %v8254_v60 = vld [vmem:[%s13043_s1 + $0x56] sm:$0x3]  ;;  %v13609_v50 = vld [vmem:[#allocation13_spill] sm:$0xff] }
 0x22e   : > { %v12591_v33 = vcombine.low %v6430_v18, %v6435_v10  ;;  %v8004_v18 = vld [vmem:[%s13043_s1 + $0x26] sm:$0x3]  ;;  %v13611_v10 = vld [vmem:[#allocation20_spill] sm:$0xff]  ;;  %v6850_v13 = vsel %vm461_vm0, %v8254_v60, 0 }
 0x22f   : > { %v3613_v23 = vsel %vm461_vm0, %v8004_v18, 0 }
 0x230   : > { %13608 = vst [vmem:[#allocation55_spill] sm:$0xff] %v12591_v33 }
 0x231   : > { %9485 = vmatmul.mubr.msk.bf16.vlgmr.msra.gmra.mrb[0].mxu0 %vm436_vm5, %v13515_v20 }
 0x232   : > { %9043 = vmatmul.mubr.msk.bf16.gmra.mrb[8].mxu1 %vm436_vm5, %v13599_v17  ;;  %9501 = vmatpush3.bf16.msra.mxu0 %v6576_v11  ;;  %v13601_v11 = vld [vmem:[#allocation75_spill] sm:$0xff] }
 0x233   : > { %9046 = vmatprep.mubr.msk.bf16.mxu1 %vm436_vm5, %v13561_v49  ;;  %9488 = vmatprep.mubr.msk.bf16.mxu0 %vm436_vm5, %v13519_v24 }
 0x234   : > { %10457 = vmatprep.subr.msk.bf16.mxu0 %vm461_vm0, %v8244_v39  ;;  %v13610_v39 = vld [vmem:[#allocation15_spill] sm:$0xff] }
 0x239   : > { %9489 = vmatmul.mubr.msk.bf16.gmra.mrb[4].mxu0 %vm436_vm5, %v13563_v55 }
 0x23a   : > { %9047 = vmatmul.mubr.msk.bf16.gmra.mrb[12].mxu1 %vm436_vm5, %v11869_v16  ;;  %9492 = vmatprep.mubr.msk.bf16.mxu0 %vm436_vm5, %v13601_v11 }
 0x23b   : > { %9052 = vmatprep.mubr.msk.bf16.mxu1 %vm436_vm5, %v13600_v30  ;;  %v7994_v30 = vld [vmem:[%s13043_s1 + $0x24] sm:$0x3] }
 0x23c   : > { %v3476_v28 = vsel %vm461_vm0, %v7994_v30, 0 }
 0x241   : > { %9493 = vmatmul.mubr.msk.bf16.gmra.mrb[8].mxu0 %vm436_vm5, %v13605_v52 }
 0x242   : > { %9053 = vmatmul.mubr.msk.bf16.vlgmr.msra.gmra.mrb[0].mxu1 %vm436_vm5, %v13603_v1  ;;  %9496 = vmatprep.mubr.msk.bf16.mxu0 %vm436_vm5, %v13606_v2 }
 0x243   : > { %9069 = vmatpush3.bf16.msra.mxu1 %v3345_v62  ;;  %9056 = vmatprep.mubr.msk.bf16.mxu1 %vm436_vm5, %v13604_v9  ;;  %v6565_v62 = vrot.slane %v12349_v22, 7  ;;  %v12733_v22 = vld [vmem:[%s10578_s25 + $0xa4] sm:$0x7] }
 0x244   : > { %10432 = vmatprep.subr.msk.bf16.mxu1 %vm461_vm0, %v7994_v30 }
 0x245   : > { %v6566_v30 = vsel %vm11411_vm3, %v6564_v8, %v6565_v62  ;;  %v8015_v8 = vld [vmem:[%s13043_s1 + $0x28] sm:$0x3]  ;;  %v13619_v62 = vld [vmem:[#allocation40_spill] sm:$0xff] }
 0x246   : > { %v12642_v48 = vcombine.low %v6563_v7, %v6566_v30  ;;  %v13622_v7 = vld [vmem:[#allocation30_spill] sm:$0xff] }
 0x247   : > { %v12690_v30 = vld [vmem:[%s10578_s25 + $0xa0] sm:$0xf] }
 0x248   : > { %13616 = vst [vmem:[#allocation14_spill] sm:$0xff] %v12642_v48 }
 0x249   : > { %9497 = vmatmul.mubr.msk.bf16.gmra.mrb[12].mxu0 %vm436_vm5, %v12591_v33  ;;  %v3744_v33 = vsel %vm461_vm0, %v8015_v8, 0 }
 0x24a   : > { %9057 = vmatmul.mubr.msk.bf16.gmra.mrb[4].mxu1 %vm436_vm5, %v13516_v46  ;;  %9502 = vmatprep.mubr.msk.bf16.mxu0 %vm436_vm5, %v13526_v54 }
 0x24b   : > { %9060 = vmatprep.mubr.msk.bf16.mxu1 %vm436_vm5, %v13517_v58 }
 0x251   : > { %9503 = vmatmul.mubr.msk.bf16.vlgmr.msra.gmra.mrb[0].mxu0 %vm436_vm5, %v13529_v35 }
 0x252   : > { %9061 = vmatmul.mubr.msk.bf16.gmra.mrb[8].mxu1 %vm436_vm5, %v13520_v45  ;;  %9519 = vmatpush3.bf16.msra.mxu0 %v6702_v14  ;;  %v13612_v14 = vld [vmem:[#allocation32_spill] sm:$0xff] }
 0x253   : > { %9064 = vmatprep.mubr.msk.bf16.mxu1 %vm436_vm5, %v11967_v34  ;;  %9506 = vmatprep.mubr.msk.bf16.mxu0 %vm436_vm5, %v13536_v36 }
 0x254   : > { %10458 = vmatprep.subr.msk.bf16.mxu0 %vm461_vm0, %v8254_v60  ;;  %v13617_v60 = vld [vmem:[#allocation81_spill] sm:$0xff] }
 0x259   : > { %9507 = vmatmul.mubr.msk.bf16.gmra.mrb[4].mxu0 %vm436_vm5, %v13569_v38 }
 0x25a   : > { %9065 = vmatmul.mubr.msk.bf16.gmra.mrb[12].mxu1 %vm436_vm5, %v12003_v0  ;;  %9510 = vmatprep.mubr.msk.bf16.mxu0 %vm436_vm5, %v13610_v39 }
 0x25b   : > { %9070 = vmatprep.mubr.msk.bf16.mxu1 %vm436_vm5, %v13609_v50  ;;  %v13613_v50 = vld [vmem:[#allocation18_spill] sm:$0xff] }
 0x261   : > { %9511 = vmatmul.mubr.msk.bf16.gmra.mrb[8].mxu0 %vm436_vm5, %v13613_v50  ;;  %v12742_v50 = vshll.u32 %v12733_v22, 16 }
 0x262   : > { %9071 = vmatmul.mubr.msk.bf16.vlgmr.msra.gmra.mrb[0].mxu1 %vm436_vm5, %v13611_v10  ;;  %9514 = vmatprep.mubr.msk.bf16.mxu0 %vm436_vm5, %v13614_v41  ;;  %v13620_v10 = vld [vmem:[#allocation41_spill] sm:$0xff] }
 0x263   : > { %9087 = vmatpush3.bf16.msra.mxu1 %v3476_v28  ;;  %9074 = vmatprep.mubr.msk.bf16.mxu1 %vm436_vm5, %v13612_v14  ;;  %v13618_v28 = vld [vmem:[#allocation83_spill] sm:$0xff]  ;;  %v13621_v14 = vld [vmem:[#allocation84_spill] sm:$0xff]  ;;  %v6839_v9 = vrot.slane %v12742_v50, 5 }
 0x264   : > { %10433 = vmatprep.subr.msk.bf16.mxu1 %vm461_vm0, %v8004_v18  ;;  %v12687_v18 = vld [vmem:[%s10578_s25 + $0x9c] sm:$0xf] }
 0x269   : > { %9515 = vmatmul.mubr.msk.bf16.gmra.mrb[12].mxu0 %vm436_vm5, %v12642_v48 }
 0x26a   : > { %9075 = vmatmul.mubr.msk.bf16.gmra.mrb[4].mxu1 %vm436_vm5, %v13530_v59  ;;  %9520 = vmatprep.mubr.msk.bf16.mxu0 %vm436_vm5, %v13544_v44  ;;  %v8265_v59 = vld [vmem:[%s13043_s1 + $0x58] sm:$0x3] }
 0x26b   : > { %9078 = vmatprep.mubr.msk.bf16.mxu1 %vm436_vm5, %v13533_v63 }
 0x271   : > { %9521 = vmatmul.mubr.msk.bf16.vlgmr.msra.gmra.mrb[0].mxu0 %vm436_vm5, %v13545_v40 }
 0x272   : > { %9079 = vmatmul.mubr.msk.bf16.gmra.mrb[8].mxu1 %vm436_vm5, %v13538_v42  ;;  %9537 = vmatpush3.bf16.msra.mxu0 %v6850_v13  ;;  %v8245_v13 = vcombine.low %v12687_v18, %v12690_v30 }
 0x273   : > { %9082 = vmatprep.mubr.msk.bf16.mxu1 %vm436_vm5, %v12077_v51  ;;  %9524 = vmatprep.mubr.msk.bf16.mxu0 %vm436_vm5, %v13548_v56 }
 0x274   : > { %10459 = vmatprep.subr.msk.bf16.mxu0 %vm461_vm0, %v8265_v59 }
 0x279   : > { %9525 = vmatmul.mubr.msk.bf16.gmra.mrb[4].mxu0 %vm436_vm5, %v13576_v29 }
 0x27a   : > { %9083 = vmatmul.mubr.msk.bf16.gmra.mrb[12].mxu1 %vm436_vm5, %v12097_v61  ;;  %9528 = vmatprep.mubr.msk.bf16.mxu0 %vm436_vm5, %v13618_v28 }
 0x27b   : > { %9088 = vmatprep.mubr.msk.bf16.mxu1 %vm436_vm5, %v13617_v60  ;;  %v6982_v60 = vsel %vm461_vm0, %v8265_v59, 0  ;;  %v12717_v59 = vshll.u32 %v12687_v18, 16 }
 0x281   : > { %9529 = vmatmul.mubr.msk.bf16.gmra.mrb[8].mxu0 %vm436_vm5, %v13621_v14 }
 0x282   : > { %9089 = vmatmul.mubr.msk.bf16.vlgmr.msra.gmra.mrb[0].mxu1 %vm436_vm5, %v13619_v62  ;;  %9532 = vmatprep.mubr.msk.bf16.mxu0 %vm436_vm5, %v13622_v7  ;;  %v12720_v62 = vshll.u32 %v12690_v30, 16  ;;  %v6823_v7 = vrot.slane %v12717_v59, 5 }
 0x283   : > { %9105 = vmatpush3.bf16.msra.mxu1 %v3613_v23  ;;  %9092 = vmatprep.mubr.msk.bf16.mxu1 %vm436_vm5, %v13620_v10  ;;  %v12714_v23 = vshrl.u32 %v12687_v18, 16  ;;  %v12723_v10 = vshrl.u32 %v12690_v30, 16 }
 0x284   : > { %10434 = vmatprep.subr.msk.bf16.mxu1 %vm461_vm0, %v8015_v8 }
 0x285   : > { %v6820_v14 = vrot.slane %v12714_v23, 4 }
 0x287   : > { %v6824_v48 = vor.u32 %v6823_v7, %v6820_v14  ;;  %v13630_v14 = vld [vmem:[#allocation48_spill] sm:$0xff] }
 0x289   : > { %9533 = vmatmul.mubr.msk.bf16.gmra.mrb[12].mxu0 %vm436_vm5, %v8245_v13  ;;  %v6829_v13 = vrot.slane %v12720_v62, 5  ;;  %v6825_v2 = vrot.slane %v6824_v48, 4 }
 0x28a   : > { %9093 = vmatmul.mubr.msk.bf16.gmra.mrb[4].mxu1 %vm436_vm5, %v13546_v57  ;;  %9538 = vmatprep.mubr.msk.bf16.mxu0 %vm436_vm5, %v13598_v5  ;;  %v8275_v57 = vld [vmem:[%s13043_s1 + $0x5a] sm:$0x3] }
 0x28b   : > { %9096 = vmatprep.mubr.msk.bf16.mxu1 %vm436_vm5, %v13547_v3  ;;  %v6830_v48 = vsel %vm10639_vm6, %v6825_v2, %v6829_v13  ;;  %v13624_v2 = vld [vmem:[#allocation78_spill] sm:$0xff] }
 0x291   : > { %9539 = vmatmul.mubr.msk.bf16.vlgmr.msra.gmra.mrb[0].mxu0 %vm436_vm5, %v13599_v17 }
 0x292   : > { %9097 = vmatmul.mubr.msk.bf16.gmra.mrb[8].mxu1 %vm436_vm5, %v13506_v43  ;;  %9555 = vmatpush3.bf16.msra.mxu0 %v6982_v60  ;;  %v6833_v60 = vrot.slane %v12723_v10, 4 }
 0x293   : > { %9100 = vmatprep.mubr.msk.bf16.mxu1 %vm436_vm5, %v13589_v4  ;;  %9542 = vmatprep.mubr.msk.bf16.mxu0 %vm436_vm5, %v13561_v49 }
 0x294   : > { %10460 = vmatprep.subr.msk.bf16.mxu0 %vm461_vm0, %v8275_v57  ;;  %v6834_v41 = vor.u32 %v6833_v60, %v6829_v13 }
 0x296   : > { %v6835_v46 = vrot.slane %v6834_v41, 4 }
 0x298   : > { %v6840_v41 = vsel %vm10639_vm6, %v6835_v46, %v6839_v9  ;;  %v8264_v46 = vrot.slane %v12687_v18, 9  ;;  %v8035_v9 = vld [vmem:[%s13043_s1 + $0x2c] sm:$0x3] }
 0x299   : > { %9543 = vmatmul.mubr.msk.bf16.gmra.mrb[4].mxu0 %vm436_vm5, %v11869_v16  ;;  %v8255_v8 = vcombine.low %v6830_v48, %v6840_v41  ;;  %v7098_v48 = vrot.slane %v12717_v59, 6  ;;  %v7101_v41 = vrot.slane %v12723_v10, 5 }
 0x29a   : > { %9101 = vmatmul.mubr.msk.bf16.gmra.mrb[12].mxu1 %vm436_vm5, %v13590_v32  ;;  %9546 = vmatprep.mubr.msk.bf16.mxu0 %vm436_vm5, %v11881_v27 }
 0x29b   : > { %9106 = vmatprep.mubr.msk.bf16.mxu1 %vm436_vm5, %v11878_v12  ;;  %v8025_v12 = vld [vmem:[%s13043_s1 + $0x2a] sm:$0x3] }
 0x2a1   : > { %9547 = vmatmul.mubr.msk.bf16.gmra.mrb[8].mxu0 %vm436_vm5, %v11912_v21  ;;  %v7121_v21 = vsel %vm461_vm0, %v8275_v57, 0  ;;  %v13626_v57 = vld [vmem:[#allocation29_spill] sm:$0xff] }
 0x2a2   : > { %9107 = vmatmul.mubr.msk.bf16.vlgmr.msra.gmra.mrb[0].mxu1 %vm436_vm5, %v13510_v47  ;;  %9550 = vmatprep.mubr.msk.bf16.mxu0 %vm436_vm5, %v12378_v19  ;;  %v8286_v47 = vld [vmem:[%s13043_s1 + $0x5c] sm:$0x3]  ;;  %v6971_v19 = vrot.slane %v12733_v22, 5 }
 0x2a3   : > { %9123 = vmatpush3.bf16.msra.mxu1 %v3744_v33  ;;  %9110 = vmatprep.mubr.msk.bf16.mxu1 %vm436_vm5, %v13511_v26  ;;  %v6968_v26 = vrot.slane %v12690_v30, 5  ;;  %v13625_v33 = vld [vmem:[#allocation12_spill] sm:$0xff] }
 0x2a4   : > { %10435 = vmatprep.subr.msk.bf16.mxu1 %vm461_vm0, %v8025_v12 }
 0x2a5   : > { %v6970_v37 = vrot.slane %v6968_v26, 4  ;;  %v6969_v7 = vsel %vm11213_vm15, %v8264_v46, %v6968_v26  ;;  %v7109_v46 = vrot.slane %v12742_v50, 6 }
 0x2a7   : > { %v6972_v13 = vsel %vm11213_vm15, %v6970_v37, %v6971_v19  ;;  %v4018_v37 = vsel %vm461_vm0, %v8035_v9, 0 }
 0x2a8   : > { %v8266_v60 = vcombine.low %v6969_v7, %v6972_v13  ;;  %v13000_v7 = vld [vmem:[%s13044_s2] ss:$0 sm:$0xff] }
 0x2a9   : > { %9551 = vmatmul.mubr.msk.bf16.gmra.mrb[12].mxu0 %vm436_vm5, %v8255_v8  ;;  %v7102_v8 = vrot.slane %v12720_v62, 6 }
 0x2aa   : > { %9111 = vmatmul.mubr.msk.bf16.gmra.mrb[4].mxu1 %vm436_vm5, %v13514_v15  ;;  %9556 = vmatprep.mubr.msk.bf16.mxu0 %vm436_vm5, %v13517_v58  ;;  %v3870_v15 = vsel %vm461_vm0, %v8025_v12, 0  ;;  %v7252_v12 = vsel %vm461_vm0, %v8286_v47, 0 }
 0x2ab   : > { %9114 = vmatprep.mubr.msk.bf16.mxu1 %vm436_vm5, %v13515_v20  ;;  %v7103_v26 = vor.u32 %v7102_v8, %v7101_v41  ;;  %v10508_v41 = vld [vmem:[%s13043_s1 + $0x30] sm:$0x3]  ;;  %v13638_v8 = vld [vmem:[#allocation9_spill] sm:$0xff] }
 0x2b1   : > { %9557 = vmatmul.mubr.msk.bf16.vlgmr.msra.gmra.mrb[0].mxu0 %vm436_vm5, %v13520_v45 }
 0x2b2   : > { %9115 = vmatmul.mubr.msk.bf16.gmra.mrb[8].mxu1 %vm436_vm5, %v13519_v24  ;;  %9573 = vmatpush3.bf16.msra.mxu0 %v7121_v21  ;;  %v7106_v21 = vshrl.u32 %v12733_v22, 16 }
 0x2b3   : > { %9118 = vmatprep.mubr.msk.bf16.mxu1 %vm436_vm5, %v13563_v55  ;;  %9560 = vmatprep.mubr.msk.bf16.mxu0 %vm436_vm5, %v11967_v34 }
 0x2b4   : > { %10461 = vmatprep.subr.msk.bf16.mxu0 %vm461_vm0, %v8286_v47 }
 0x2b9   : > { %9561 = vmatmul.mubr.msk.bf16.gmra.mrb[4].mxu0 %vm436_vm5, %v12003_v0 }
 0x2ba   : > { %9119 = vmatmul.mubr.msk.bf16.gmra.mrb[12].mxu1 %vm436_vm5, %v13601_v11  ;;  %9564 = vmatprep.mubr.msk.bf16.mxu0 %vm436_vm5, %v12005_v25 }
 0x2bb   : > { %9124 = vmatprep.mubr.msk.bf16.mxu1 %vm436_vm5, %v11999_v31  ;;  %v13623_v31 = vld [vmem:[#allocation76_spill] sm:$0xff] }
 0x2c1   : > { %9565 = vmatmul.mubr.msk.bf16.gmra.mrb[8].mxu0 %vm436_vm5, %v13625_v33  ;;  %v13628_v33 = vld [vmem:[#allocation62_spill] sm:$0xff] }
 0x2c2   : > { %9125 = vmatmul.mubr.msk.bf16.vlgmr.msra.gmra.mrb[0].mxu1 %vm436_vm5, %v13623_v31  ;;  %9568 = vmatprep.mubr.msk.bf16.mxu0 %vm436_vm5, %v13626_v57  ;;  %v7105_v31 = vrot.slane %v7103_v26, 4  ;;  %v13629_v57 = vld [vmem:[#allocation65_spill] sm:$0xff] }
 0x2c3   : > { %9141 = vmatpush3.bf16.msra.mxu1 %v3870_v15  ;;  %9128 = vmatprep.mubr.msk.bf16.mxu1 %vm436_vm5, %v13624_v2  ;;  %v7108_v15 = vrot.slane %v7106_v21, 5 }
 0x2c4   : > { %10436 = vmatprep.subr.msk.bf16.mxu1 %vm461_vm0, %v8035_v9  ;;  %v13631_v9 = vld [vmem:[#allocation44_spill] sm:$0xff] }
 0x2c5   : > { %v7110_v2 = vor.u32 %v7109_v46, %v7108_v15 }
 0x2c9   : > { %9569 = vmatmul.mubr.msk.bf16.gmra.mrb[12].mxu0 %vm436_vm5, %v8266_v60  ;;  %v7111_v60 = vsel %vm10668_vm7, %v7105_v31, %v7110_v2 }
 0x2ca   : > { %9129 = vmatmul.mubr.msk.bf16.gmra.mrb[4].mxu1 %vm436_vm5, %v13526_v54  ;;  %9574 = vmatprep.mubr.msk.bf16.mxu0 %vm436_vm5, %v13533_v63  ;;  %v8296_v54 = vld [vmem:[%s13043_s1 + $0x5e] sm:$0x3]  ;;  %v7097_v63 = vrot.slane %v12714_v23, 5 }
 0x2cb   : > { %9132 = vmatprep.mubr.msk.bf16.mxu1 %vm436_vm5, %v13529_v35 }
 0x2cc   : > { %v7099_v47 = vor.u32 %v7098_v48, %v7097_v63  ;;  %v7389_v63 = vsel %vm461_vm0, %v8296_v54, 0  ;;  %v13635_v48 = vld [vmem:[#allocation39_spill] sm:$0xff] }
 0x2ce   : > { %v7100_v19 = vrot.slane %v7099_v47, 4 }
 0x2d0   : > { %v7104_v13 = vsel %vm10668_vm7, %v7100_v19, %v7103_v26  ;;  %v13642_v19 = vld [vmem:[#allocation77_spill] sm:$0xff] }
 0x2d1   : > { %9575 = vmatmul.mubr.msk.bf16.vlgmr.msra.gmra.mrb[0].mxu0 %vm436_vm5, %v13538_v42 }
 0x2d2   : > { %9133 = vmatmul.mubr.msk.bf16.gmra.mrb[8].mxu1 %vm436_vm5, %v13536_v36  ;;  %9591 = vmatpush3.bf16.msra.mxu0 %v7252_v12  ;;  %v8276_v12 = vcombine.low %v7104_v13, %v7111_v60 }
 0x2d3   : > { %9136 = vmatprep.mubr.msk.bf16.mxu1 %vm436_vm5, %v13569_v38  ;;  %9578 = vmatprep.mubr.msk.bf16.mxu0 %vm436_vm5, %v12077_v51 }
 0x2d4   : > { %10462 = vmatprep.subr.msk.bf16.mxu0 %vm461_vm0, %v8296_v54  ;;  %v7241_v54 = vrot.slane %v12733_v22, 6 }
 0x2d9   : > { %9579 = vmatmul.mubr.msk.bf16.gmra.mrb[4].mxu0 %vm436_vm5, %v12097_v61 }
 0x2da   : > { %9137 = vmatmul.mubr.msk.bf16.gmra.mrb[12].mxu1 %vm436_vm5, %v13610_v39  ;;  %9582 = vmatprep.mubr.msk.bf16.mxu0 %vm436_vm5, %v12099_v53 }
 0x2db   : > { %9142 = vmatprep.mubr.msk.bf16.mxu1 %vm436_vm5, %v13540_v6  ;;  %v8046_v6 = vld [vmem:[%s13043_s1 + $0x2e] sm:$0x3] }
 0x2e1   : > { %9583 = vmatmul.mubr.msk.bf16.gmra.mrb[8].mxu0 %vm436_vm5, %v13630_v14 }
 0x2e2   : > { %9143 = vmatmul.mubr.msk.bf16.vlgmr.msra.gmra.mrb[0].mxu1 %vm436_vm5, %v13628_v33  ;;  %9586 = vmatprep.mubr.msk.bf16.mxu0 %vm436_vm5, %v13631_v9 }
 0x2e3   : > { %9159 = vmatpush3.bf16.msra.mxu1 %v4018_v37  ;;  %9146 = vmatprep.mubr.msk.bf16.mxu1 %vm436_vm5, %v13629_v57 }
 0x2e4   : > { %10437 = vmatprep.subr.msk.bf16.mxu1 %vm461_vm0, %v8046_v6 }
 0x2e9   : > { %9587 = vmatmul.mubr.msk.bf16.gmra.mrb[12].mxu0 %vm436_vm5, %v8276_v12 }
 0x2ea   : > { %9147 = vmatmul.mubr.msk.bf16.gmra.mrb[4].mxu1 %vm436_vm5, %v13544_v44  ;;  %9592 = vmatprep.mubr.msk.bf16.mxu0 %vm436_vm5, %v13547_v3  ;;  %v8307_v44 = vld [vmem:[%s13043_s1 + $0x60] sm:$0x3] }
 0x2eb   : > { %9150 = vmatprep.mubr.msk.bf16.mxu1 %vm436_vm5, %v13545_v40  ;;  %v13633_v40 = vld [vmem:[#allocation36_spill] sm:$0xff]  ;;  %v13634_v3 = vld [vmem:[#allocation66_spill] sm:$0xff]  ;;  %v7520_v37 = vsel %vm461_vm0, %v8307_v44, 0 }
 0x2f1   : > { %9593 = vmatmul.mubr.msk.bf16.vlgmr.msra.gmra.mrb[0].mxu0 %vm436_vm5, %v13506_v43  ;;  %v7238_v43 = vrot.slane %v12690_v30, 6 }
 0x2f2   : > { %9151 = vmatmul.mubr.msk.bf16.gmra.mrb[8].mxu1 %vm436_vm5, %v13548_v56  ;;  %9609 = vmatpush3.bf16.msra.mxu0 %v7389_v63  ;;  %v4150_v56 = vsel %vm461_vm0, %v8046_v6, 0 }
 0x2f3   : > { %9154 = vmatprep.mubr.msk.bf16.mxu1 %vm436_vm5, %v13576_v29  ;;  %9596 = vmatprep.mubr.msk.bf16.mxu0 %vm436_vm5, %v13589_v4  ;;  %v8285_v29 = vrot.slane %v12687_v18, 10  ;;  %v7240_v4 = vrot.slane %v7238_v43, 4 }
 0x2f4   : > { %10463 = vmatprep.subr.msk.bf16.mxu0 %vm461_vm0, %v8307_v44 }
 0x2f5   : > { %v7239_v26 = vsel %vm10908_vm9, %v8285_v29, %v7238_v43  ;;  %v7242_v15 = vsel %vm10908_vm9, %v7240_v4, %v7241_v54 }
 0x2f6   : > { %v8287_v46 = vcombine.low %v7239_v26, %v7242_v15 }
 0x2f9   : > { %9597 = vmatmul.mubr.msk.bf16.gmra.mrb[4].mxu0 %vm436_vm5, %v13590_v32  ;;  %v13637_v32 = vld [vmem:[#allocation24_spill] sm:$0xff] }
 0x2fa   : > { %9155 = vmatmul.mubr.msk.bf16.gmra.mrb[12].mxu1 %vm436_vm5, %v13618_v28  ;;  %9600 = vmatprep.mubr.msk.bf16.mxu0 %vm436_vm5, %v13634_v3  ;;  %v13636_v28 = vld [vmem:[#allocation42_spill] sm:$0xff] }
 0x2fb   : > { %9160 = vmatprep.mubr.msk.bf16.mxu1 %vm436_vm5, %v13633_v40 }
 0x301   : > { %9601 = vmatmul.mubr.msk.bf16.gmra.mrb[8].mxu0 %vm436_vm5, %v13637_v32 }
 0x302   : > { %9161 = vmatmul.mubr.msk.bf16.vlgmr.msra.gmra.mrb[0].mxu1 %vm436_vm5, %v13635_v48  ;;  %9604 = vmatprep.mubr.msk.bf16.mxu0 %vm436_vm5, %v13638_v8 }
 0x303   : > { %9177 = vmatpush3.bf16.msra.mxu1 %v4150_v56  ;;  %9164 = vmatprep.mubr.msk.bf16.mxu1 %vm436_vm5, %v13636_v28 }
 0x304   : > { %10439 = vmatprep.subr.msk.bf16.mxu1 %vm461_vm0, %v10508_v41 }
 0x309   : > { %9605 = vmatmul.mubr.msk.bf16.gmra.mrb[12].mxu0 %vm436_vm5, %v8287_v46 }
 0x30a   : > { %9165 = vmatmul.mubr.msk.bf16.gmra.mrb[4].mxu1 %vm436_vm5, %v13598_v5  ;;  %9610 = vmatprep.mubr.msk.bf16.mxu0 %vm436_vm5, %v13515_v20  ;;  %v7367_v5 = vrot.slane %v12714_v23, 6  ;;  %v7371_v20 = vrot.slane %v12723_v10, 6  ;;  %v7377_v23 = vrot.slane %v12742_v50, 7 }
 0x30b   : > { %9168 = vmatprep.mubr.msk.bf16.mxu1 %vm436_vm5, %v13599_v17  ;;  %v7368_v17 = vrot.slane %v12717_v59, 7 }
 0x311   : > { %9611 = vmatmul.mubr.msk.bf16.vlgmr.msra.gmra.mrb[0].mxu0 %vm436_vm5, %v13519_v24  ;;  %v7369_v24 = vor.u32 %v7368_v17, %v7367_v5 }
 0x312   : > { %9169 = vmatmul.mubr.msk.bf16.gmra.mrb[8].mxu1 %vm436_vm5, %v13561_v49  ;;  %9627 = vmatpush3.bf16.msra.mxu0 %v7520_v37  ;;  %v7372_v49 = vrot.slane %v12720_v62, 7 }
 0x313   : > { %9172 = vmatprep.mubr.msk.bf16.mxu1 %vm436_vm5, %v11869_v16  ;;  %9614 = vmatprep.mubr.msk.bf16.mxu0 %vm436_vm5, %v13563_v55  ;;  %v7376_v55 = vrot.slane %v7106_v21, 6  ;;  %v7370_v59 = vrot.slane %v7369_v24, 4 }
 0x314   : > { %v7373_v16 = vor.u32 %v7372_v49, %v7371_v20 }
 0x315   : > { %v7378_v10 = vor.u32 %v7377_v23, %v7376_v55 }
 0x316   : > { %v7375_v62 = vrot.slane %v7373_v16, 4  ;;  %v7374_v50 = vsel %vm11141_vm14, %v7370_v59, %v7373_v16 }
 0x318   : > { %v7379_v31 = vsel %vm11141_vm14, %v7375_v62, %v7378_v10 }
 0x319   : > { %9615 = vmatmul.mubr.msk.bf16.gmra.mrb[4].mxu0 %vm436_vm5, %v13601_v11  ;;  %v13643_v11 = vld [vmem:[#allocation10_spill] sm:$0xff]  ;;  %v8297_v2 = vcombine.low %v7374_v50, %v7379_v31 }
 0x31a   : > { %9173 = vmatmul.mubr.msk.bf16.gmra.mrb[12].mxu1 %vm436_vm5, %v11881_v27  ;;  %9618 = vmatprep.mubr.msk.bf16.mxu0 %vm436_vm5, %v13605_v52  ;;  %v13640_v27 = vld [vmem:[#allocation22_spill] sm:$0xff]  ;;  %v13644_v52 = vld [vmem:[#allocation55_spill] sm:$0xff] }
 0x31b   : > { %9178 = vmatprep.mubr.msk.bf16.mxu1 %vm436_vm5, %v13603_v1  ;;  %v13641_v1 = vld [vmem:[#allocation2_spill] sm:$0xff] }
 0x321   : > { %9619 = vmatmul.mubr.msk.bf16.gmra.mrb[8].mxu0 %vm436_vm5, %v13643_v11 }
 0x322   : > { %9179 = vmatmul.mubr.msk.bf16.vlgmr.msra.gmra.mrb[0].mxu1 %vm436_vm5, %v13640_v27  ;;  %9622 = vmatprep.mubr.msk.bf16.mxu0 %vm436_vm5, %v13644_v52 }
 0x323   : > { %9645 = vmatpush3.bf16.msra.mxu1 %v13641_v1  ;;  %9182 = vmatprep.mubr.msk.bf16.mxu1 %vm436_vm5, %v13642_v19 }
 0x329   : > { %9623 = vmatmul.mubr.msk.bf16.gmra.mrb[12].mxu0 %vm436_vm5, %v8297_v2 }
 0x32a   : > { %9183 = vmatmul.mubr.msk.bf16.gmra.mrb[4].mxu1 %vm436_vm5, %v13517_v58  ;;  %9628 = vmatprep.mubr.msk.bf16.mxu0 %vm436_vm5, %v13529_v35  ;;  %v13646_v58 = vld [vmem:[#allocation18_spill] sm:$0xff]  ;;  %v7509_v35 = vrot.slane %v12733_v22, 7 }
 0x32b   : > { %9186 = vmatprep.mubr.msk.bf16.mxu1 %vm436_vm5, %v13520_v45  ;;  %v8306_v45 = vrot.slane %v12687_v18, 11 }
 0x331   : > { %9629 = vmatmul.mubr.msk.bf16.vlgmr.msra.gmra.mrb[0].mxu0 %vm436_vm5, %v13536_v36 }
 0x332   : > { %9187 = vmatmul.mubr.msk.bf16.gmra.mrb[8].mxu1 %vm436_vm5, %v11967_v34  ;;  %9632 = vmatprep.mubr.msk.bf16.mxu0 %vm436_vm5, %v13569_v38  ;;  %v7506_v34 = vrot.slane %v12690_v30, 7  ;;  %v13647_v38 = vld [vmem:[#allocation28_spill] sm:$0xff] }
 0x333   : > { %9190 = vmatprep.mubr.msk.bf16.mxu1 %vm436_vm5, %v12003_v0 }
 0x334   : > { %v7508_v0 = vrot.slane %v7506_v34, 4 }
 0x339   : > { %9633 = vmatmul.mubr.msk.bf16.gmra.mrb[4].mxu0 %vm436_vm5, %v13610_v39  ;;  %v7510_v39 = vsel %vm11411_vm3, %v7508_v0, %v7509_v35 }
 0x33a   : > { %9191 = vmatmul.mubr.msk.bf16.gmra.mrb[12].mxu1 %vm436_vm5, %v12005_v25  ;;  %9636 = vmatprep.mubr.msk.bf16.mxu0 %vm436_vm5, %v13646_v58  ;;  %v13648_v25 = vld [vmem:[#allocation14_spill] sm:$0xff] }
 0x33b   : > { %9204 = vmatprep.mubr.msk.bf16.mxu1 %vm436_vm5, %v13538_v42  ;;  %v7507_v42 = vsel %vm11411_vm3, %v8306_v45, %v7506_v34 }
 0x33c   : > { %v8308_v22 = vcombine.low %v7507_v42, %v7510_v39 }
 0x341   : > { %9637 = vmatmul.mubr.msk.bf16.gmra.mrb[8].mxu0 %vm436_vm5, %v13647_v38 }
 0x342   : > { %9205 = vmatmul.mubr.msk.bf16.vlgmr.msra.gmra.mrb[8].mxu1 %vm436_vm5, %v12077_v51  ;;  %9640 = vmatprep.mubr.msk.bf16.mxu0 %vm436_vm5, %v13648_v25 }
 0x343   : > { %9208 = vmatprep.mubr.msk.bf16.mxu1 %vm436_vm5, %v12097_v61 }
 0x349   : > { %9641 = vmatmul.mubr.msk.bf16.gmra.mrb[12].mxu0 %vm436_vm5, %v8308_v22 }
 0x34a   : > { %9209 = vmatmul.mubr.msk.bf16.gmra.mrb[12].mxu1 %vm436_vm5, %v12099_v53 }
 0x3f5   : > { %v9180_v51 = vpop.f32.mrb[0].mxu1 }
 0x3f6   : > { %v4186_v61 = vpop.f32.mrb[1].mxu1 }
 0x3f7   : > { %v9181_v18 = vpop.f32.mrb[2].mxu1 }
 0x3f8   : > { %v4189_v30 = vpop.f32.mrb[3].mxu1 }
 0x3fd   : > { %v9184_v6 = vpop.f32.mrb[4].mxu1 }
 0x3fe   : > { %v4202_v33 = vpop.f32.mrb[5].mxu1 }
 0x3ff   : > { %v9185_v57 = vpop.f32.mrb[6].mxu1 }
 0x400   : > { %v4205_v14 = vpop.f32.mrb[7].mxu1 }
 0x404   : > { %v9630_v9 = vpop.f32.mrb[0].mxu0 }
 0x405   : > { %v9646_v13 = vadd.f32 %v9630_v9, %v9180_v51  ;;  %v7556_v60 = vpop.f32.mrb[1].mxu0 }
 0x406   : > { %v9647_v53 = vadd.f32 %v7556_v60, %v4186_v61  ;;  %v9631_v12 = vpop.f32.mrb[2].mxu0 }
 0x407   : > { %v7644_v63 = vadd.f32 %v9646_v13, %v13000_v7  ;;  %v9648_v44 = vadd.f32 %v9631_v12, %v9181_v18  ;;  %v7559_v40 = vpop.f32.mrb[3].mxu0 }
 0x408   : > { %v7642_v3 = vadd.f32 %v9647_v53, %v13000_v7  ;;  %v9649_v43 = vadd.f32 %v7559_v40, %v4189_v30 }
 0x409   : > { %7660 = vst [vmem:[%s13005_s26 + $0x10] sm:$0xff] %v7644_v63  ;;  %v7645_v56 = vadd.f32 %v9648_v44, %v13000_v7 }
 0x40a   : > { %7658 = vst [vmem:[%s13005_s26] sm:$0xff] %v7642_v3  ;;  %v7643_v29 = vadd.f32 %v9649_v43, %v13000_v7 }
 0x40b   : > { %7661 = vst [vmem:[%s13005_s26 + $0x18] sm:$0xff] %v7645_v56 }
 0x40c   : > { %7659 = vst [vmem:[%s13005_s26 + $0x8] sm:$0xff] %v7643_v29  ;;  %v9634_v4 = vpop.f32.mrb[4].mxu0 }
 0x40d   : > { %v9650_v54 = vadd.f32 %v9634_v4, %v9184_v6  ;;  %v7572_v48 = vpop.f32.mrb[5].mxu0 }
 0x40e   : > { %v9651_v28 = vadd.f32 %v7572_v48, %v4202_v33  ;;  %v9635_v32 = vpop.f32.mrb[6].mxu0 }
 0x40f   : > { %v7648_v41 = vadd.f32 %v9650_v54, %v13000_v7  ;;  %v9652_v8 = vadd.f32 %v9635_v32, %v9185_v57  ;;  %v7575_v47 = vpop.f32.mrb[7].mxu0 }
 0x410   : > { %v7646_v26 = vadd.f32 %v9651_v28, %v13000_v7  ;;  %v9653_v15 = vadd.f32 %v7575_v47, %v4205_v14 }
 0x411   : > { %7664 = vst [vmem:[%s13005_s26 + $0x30] sm:$0xff] %v7648_v41  ;;  %v7649_v46 = vadd.f32 %v9652_v8, %v13000_v7 }
 0x412   : > { %7662 = vst [vmem:[%s13005_s26 + $0x20] sm:$0xff] %v7646_v26  ;;  %v7647_v37 = vadd.f32 %v9653_v15, %v13000_v7 }
 0x413   : > { %7665 = vst [vmem:[%s13005_s26 + $0x38] sm:$0xff] %v7649_v46 }
 0x414   : > { %7663 = vst [vmem:[%s13005_s26 + $0x28] sm:$0xff] %v7647_v37  ;;  %v9638_v20 = vpop.f32.mrb[8].mxu0 }
 0x415   : > { %v9206_v5 = vpop.f32.mrb[8].mxu1  ;;  %v7588_v16 = vpop.f32.mrb[9].mxu0 }
 0x416   : > { %v4357_v17 = vpop.f32.mrb[9].mxu1  ;;  %v9654_v24 = vadd.f32 %v9638_v20, %v9206_v5  ;;  %v9639_v59 = vpop.f32.mrb[10].mxu0 }
 0x417   : > { %v9207_v49 = vpop.f32.mrb[10].mxu1  ;;  %v9655_v23 = vadd.f32 %v7588_v16, %v4357_v17  ;;  %v7591_v27 = vpop.f32.mrb[11].mxu0 }
 0x418   : > { %v4360_v55 = vpop.f32.mrb[11].mxu1  ;;  %v7652_v62 = vadd.f32 %v9654_v24, %v13000_v7  ;;  %v9656_v10 = vadd.f32 %v9639_v59, %v9207_v49 }
 0x419   : > { %v7650_v1 = vadd.f32 %v9655_v23, %v13000_v7  ;;  %v9657_v19 = vadd.f32 %v7591_v27, %v4360_v55 }
 0x41a   : > { %7668 = vst [vmem:[%s13005_s26 + $0x50] sm:$0xff] %v7652_v62  ;;  %v7653_v11 = vadd.f32 %v9656_v10, %v13000_v7 }
 0x41b   : > { %7666 = vst [vmem:[%s13005_s26 + $0x40] sm:$0xff] %v7650_v1  ;;  %v7651_v52 = vadd.f32 %v9657_v19, %v13000_v7 }
 0x41c   : > { %7669 = vst [vmem:[%s13005_s26 + $0x58] sm:$0xff] %v7653_v11  ;;  %v9642_v31 = vpop.f32.mrb[12].mxu0 }
 0x41d   : > { %v9210_v21 = vpop.f32.mrb[12].mxu1  ;;  %7667 = vst [vmem:[%s13005_s26 + $0x48] sm:$0xff] %v7651_v52  ;;  %v7604_v34 = vpop.f32.mrb[13].mxu0 }
 0x41e   : > { %v4373_v50 = vpop.f32.mrb[13].mxu1  ;;  %v9658_v58 = vadd.f32 %v9642_v31, %v9210_v21  ;;  %v9643_v35 = vpop.f32.mrb[14].mxu0 }
 0x41f   : > { %v9211_v2 = vpop.f32.mrb[14].mxu1  ;;  %v9659_v0 = vadd.f32 %v7604_v34, %v4373_v50  ;;  %v7607_v36 = vpop.f32.mrb[15].mxu0 }
 0x420   : > { %v4376_v45 = vpop.f32.mrb[15].mxu1  ;;  %v7656_v38 = vadd.f32 %v9658_v58, %v13000_v7  ;;  %v9660_v25 = vadd.f32 %v9643_v35, %v9211_v2 }
 0x421   : > { %v7654_v42 = vadd.f32 %v9659_v0, %v13000_v7  ;;  %v9661_v39 = vadd.f32 %v7607_v36, %v4376_v45 }
 0x422   : > { %7672 = vst [vmem:[%s13005_s26 + $0x70] sm:$0xff] %v7656_v38  ;;  %v7657_v22 = vadd.f32 %v9660_v25, %v13000_v7 }
 0x423   : > { %7670 = vst [vmem:[%s13005_s26 + $0x60] sm:$0xff] %v7654_v42  ;;  %v7655_v51 = vadd.f32 %v9661_v39, %v13000_v7 }
 0x424   : > { %7673 = vst [vmem:[%s13005_s26 + $0x78] sm:$0xff] %v7657_v22 }
 0x425   : > { %7671 = vst [vmem:[%s13005_s26 + $0x68] sm:$0xff] %v7655_v51 }
 0x426 PF: > { %s13_s12 = sadd.s32 1, %s10515_s12  }
 0x427   : > { %p10_p4 = scmp.ge.s32.totalorder %s13_s12, 6  }
 0x429   :  { %12 = sbr.rel (!%p10_p4) target bundleno = 1 (0x1), region = 110 }

</bundles_post_ra>
